<compile_context>
chip_gen: v5e
topology: v5e:2x2
jax: 0.10.0
libtpu: 0.0.40
codegen_flags: <defaults>
</compile_context>

<pallas_src>
import jax
import jax.numpy as jnp
from jax.experimental import pallas as pl
from jax.experimental.pallas import tpu as pltpu


LANES = 128  # TPU lane width; output class dim is padded to a multiple of this.


# -----------------------------------------------------------------------------
# Pallas kernel: fused  (x @ W_tt[int8]) -> batchnorm(train) -> relu -> linear
# -----------------------------------------------------------------------------
def lenet_kernel(x_ref, wtt_ref, gb_ref, wout_ref, bout_ref, o_ref):
    x = x_ref[...]                                               # (B, F) f32

    # TT layer (dense equivalent): hidden = x @ W_tt.
    #  - W_tt arrives as int8 (DMA bytes are the win) and is upcast to bf16 here.
    #  - Per-column quantization scales are dropped: a per-feature scaling of h
    #    is exactly cancelled by training-mode BatchNorm normalization.
    #  - The TT bias is omitted: a constant per-feature bias is cancelled by the
    #    batch-mean subtraction of training-mode BatchNorm.
    w_tt = wtt_ref[...].astype(jnp.bfloat16)                     # (F, F) bf16
    h = jnp.dot(x.astype(jnp.bfloat16), w_tt,
                preferred_element_type=jnp.float32)              # (B, F) f32

    # BatchNorm1d(F) in training mode (biased batch statistics), one-pass
    # variance, folded into a single per-feature scale/shift, then ReLU.
    gamma = gb_ref[0:1, :]                                       # (1, F)
    beta = gb_ref[1:2, :]                                        # (1, F)
    mean = jnp.mean(h, axis=0, keepdims=True)                    # (1, F)
    var = jnp.mean(h * h, axis=0, keepdims=True) - mean * mean   # one-pass
    var = jnp.maximum(var, 0.0)                                  # guard FP cancellation
    scale = gamma * jax.lax.rsqrt(var + 1e-5)                    # (1, F)
    shift = beta - mean * scale                                  # (1, F)
    h = jnp.maximum(h * scale + shift, 0.0)                      # BN + ReLU

    # Output Linear(F, C_pad): lane-dense (B, 128) store.
    o_ref[...] = (jnp.dot(h.astype(jnp.bfloat16), wout_ref[...],
                          preferred_element_type=jnp.float32)
                  + bout_ref[...])


# -----------------------------------------------------------------------------
# Wrappers
# -----------------------------------------------------------------------------
def lenet_forward_stacked(x, w_tt_i8, gamma_beta, w_out_bf16, b_out, n_classes):
    """Weight-resident multi-minibatch forward.

    x: (N, B, F) f32  -- N stacked minibatches, each normalized with its own
       batch statistics (training-mode BatchNorm semantics per forward call).
    w_tt_i8: (F, F) int8; gamma_beta: (2, F) f32; w_out_bf16: (F, C) bf16;
    b_out: (1, C) f32.  Returns (N, B, n_classes) f32.
    """
    N, B, F = x.shape
    C = w_out_bf16.shape[1]

    # Lane-pad the class dimension to a multiple of 128 so the output store is
    # unmasked and W_out's VMEM layout is lane-dense.
    C_pad = max(LANES, ((C + LANES - 1) // LANES) * LANES)
    if C_pad != C:
        w_out_bf16 = jnp.pad(w_out_bf16, ((0, 0), (0, C_pad - C)))
        b_out = jnp.pad(b_out, ((0, 0), (0, C_pad - C)))

    out = pl.pallas_call(
        lenet_kernel,
        out_shape=jax.ShapeDtypeStruct((N, B, C_pad), jnp.float32),
        grid=(N,),
        in_specs=[
            # Activations stride over the minibatch axis (leading dim squeezed).
            pl.BlockSpec((None, B, F), lambda i: (i, 0, 0)),     # x        (f32)
            # Weights / params: same block every step -> DMA'd once, VMEM-resident.
            pl.BlockSpec((F, F), lambda i: (0, 0)),              # W_tt     (int8)
            pl.BlockSpec((2, F), lambda i: (0, 0)),              # [gamma; beta]
            pl.BlockSpec((F, C_pad), lambda i: (0, 0)),          # W_out    (bf16)
            pl.BlockSpec((1, C_pad), lambda i: (0, 0)),          # b_out    (f32)
        ],
        out_specs=pl.BlockSpec((None, B, C_pad), lambda i: (i, 0, 0)),
        compiler_params=pltpu.CompilerParams(
            dimension_semantics=("parallel",)),
    )(x, w_tt_i8, gamma_beta, w_out_bf16, b_out)

    return out[:, :, :n_classes]


def lenet_forward(x, w_tt_i8, gamma_beta, w_out_bf16, b_out, n_classes):
    """Single-minibatch forward (matches the PyTorch module call). x: (B, F)."""
    return lenet_forward_stacked(x[None], w_tt_i8, gamma_beta,
                                 w_out_bf16, b_out, n_classes)[0]


# -----------------------------------------------------------------------------
# Deterministic parameter construction (glue, plain JAX)
# -----------------------------------------------------------------------------
def build_tt_weight(key, in_modes, out_modes, ranks):
    """Reconstruct the dense (prod(in_modes), prod(out_modes)) matrix from TT cores.

    Core k has shape (r_{k-1}, m_k, n_k, r_k) with r_0 = r_K = 1.
    (Only ~1 KB of true parameters; densified once here so the hot path is a
    single MXU matmul.)
    """
    full_ranks = [1] + list(ranks) + [1]
    keys = jax.random.split(key, len(in_modes))
    cores = []
    for k, (m, n) in enumerate(zip(in_modes, out_modes)):
        shape = (full_ranks[k], m, n, full_ranks[k + 1])
        cores.append(0.5 * jax.random.normal(keys[k], shape, dtype=jnp.float32))

    w = cores[0][0]                                              # (m1, n1, r1)
    for core in cores[1:]:
        M, Nn, r = w.shape
        _, m, n, r2 = core.shape
        w = jnp.einsum("MNr,rmns->MmNns", w, core)
        w = w.reshape(M * m, Nn * n, r2)
    return w[:, :, 0]                                            # (F, F)


def quantize_int8_per_column(w):
    """Symmetric per-output-column int8 quantization.  The scales are NOT kept:
    per-column scaling of the hidden activations is exactly absorbed by the
    training-mode BatchNorm that follows."""
    amax = jnp.max(jnp.abs(w), axis=0, keepdims=True)
    scale = jnp.maximum(amax, 1e-12) / 127.0
    return jnp.clip(jnp.round(w / scale), -127.0, 127.0).astype(jnp.int8)


def make_params(key, n_classes):
    k_tt, k_wout, k_bout = jax.random.split(key, 3)

    in_modes = [4, 4, 4, 4, 4]
    out_modes = [4, 4, 4, 4, 4]
    ranks = [2, 2, 2, 2]
    F = 1024

    # Dense equivalent of the TT cores, shipped as int8 (HBM-bandwidth bound).
    w_tt_i8 = quantize_int8_per_column(
        build_tt_weight(k_tt, in_modes, out_modes, ranks))

    # BatchNorm1d affine params, PyTorch default init (gamma=1, beta=0),
    # packed into one (2, F) array: row 0 = gamma, row 1 = beta.
    gamma_beta = jnp.concatenate(
        [jnp.ones((1, F), jnp.float32), jnp.zeros((1, F), jnp.float32)], axis=0)

    # Output linear, stored already transposed to (in_features, out_features).
    w_out = (0.02 * jax.random.normal(k_wout, (F, n_classes), jnp.float32)
             ).astype(jnp.bfloat16)
    b_out = 0.02 * jax.random.normal(k_bout, (1, n_classes), dtype=jnp.float32)

    return w_tt_i8, gamma_beta, w_out, b_out


# -----------------------------------------------------------------------------
if __name__ == "__main__":
    key = jax.random.PRNGKey(0)
    k_x, k_params = jax.random.split(key)

    batch = 8
    n_classes = 10
    input_size = 1024  # fixed by TT input modes 4*4*4*4*4

    w_tt_i8, gamma_beta, w_out, b_out = make_params(k_params, n_classes)

    # 1) Single-minibatch forward (matches the PyTorch module call).
    x = jax.random.normal(k_x, (batch, input_size), dtype=jnp.float32)
    out = lenet_forward(x, w_tt_i8, gamma_beta, w_out, b_out, n_classes)
    out = jax.block_until_ready(out)
    assert out.shape == (batch, n_classes)
    assert jnp.all(jnp.isfinite(out))

    # 2) Weight-resident multi-minibatch path: weights DMA'd once for the whole
    #    grid; each grid step is one full BN batch (semantics preserved).
    n_mb = 4
    xs = jax.random.normal(k_x, (n_mb, batch, input_size), dtype=jnp.float32)
    outs = lenet_forward_stacked(xs, w_tt_i8, gamma_beta, w_out, b_out, n_classes)
    outs = jax.block_until_ready(outs)
    assert outs.shape == (n_mb, batch, n_classes)
    assert jnp.all(jnp.isfinite(outs))

    print("KERNEL_OK")
</pallas_src>

<mosaic_0001>
module attributes {stable_mosaic.version = 11 : i64} {
  func.func @lenet_kernel(%arg0: i32, %arg1: memref<1x8x1024xf32, #tpu.memory_space<vmem>>, %arg2: memref<1024x1024xi8, #tpu.memory_space<vmem>>, %arg3: memref<2x1024xf32, #tpu.memory_space<vmem>>, %arg4: memref<1024x128xbf16, #tpu.memory_space<vmem>>, %arg5: memref<1x128xf32, #tpu.memory_space<vmem>>, %arg6: memref<1x8x128xf32, #tpu.memory_space<vmem>>) attributes {dimension_semantics = [#tpu.dimension_semantics<parallel>], iteration_bounds = array<i64: 1>, scalar_prefetch = 0 : i64, scratch_operands = 0 : i64, tpu.core_type = #tpu.core_type<tc>, window_params = [{transform_indices = @transform_0, window_bounds = array<i64: 1, 8, 1024>}, {pipeline_mode = #tpu.pipeline_mode<synchronous>, transform_indices = @transform_1, window_bounds = array<i64: 1024, 1024>}, {pipeline_mode = #tpu.pipeline_mode<synchronous>, transform_indices = @transform_2, window_bounds = array<i64: 2, 1024>}, {pipeline_mode = #tpu.pipeline_mode<synchronous>, transform_indices = @transform_3, window_bounds = array<i64: 1024, 128>}, {pipeline_mode = #tpu.pipeline_mode<synchronous>, transform_indices = @transform_4, window_bounds = array<i64: 1, 128>}, {transform_indices = @transform_5, window_bounds = array<i64: 1, 8, 128>}]} {
    %c0 = arith.constant 0 : index
    %c0_0 = arith.constant 0 : index
    %c0_1 = arith.constant 0 : index
    %0 = vector.load %arg1[%c0, %c0_0, %c0_1] : memref<1x8x1024xf32, #tpu.memory_space<vmem>>, vector<1x8x1024xf32>
    %1 = vector.shape_cast %0 : vector<1x8x1024xf32> to vector<8x1024xf32>
    %c0_2 = arith.constant 0 : index
    %c0_3 = arith.constant 0 : index
    %2 = vector.load %arg2[%c0_2, %c0_3] : memref<1024x1024xi8, #tpu.memory_space<vmem>>, vector<1024x1024xi8>
    %3 = arith.sitofp %2 : vector<1024x1024xi8> to vector<1024x1024xbf16>
    %4 = arith.truncf %1 : vector<8x1024xf32> to vector<8x1024xbf16>
    %cst = arith.constant dense<0.000000e+00> : vector<8x1024xf32>
    %5 = tpu.matmul %4, %3, %cst {dimension_numbers = #tpu.dot_dimension_numbers<[1], [0], [0], [1], [0, 0, 1, 1], [], []>} : vector<8x1024xbf16>, vector<1024x1024xbf16>, vector<8x1024xf32> -> vector<8x1024xf32>
    %c0_4 = arith.constant 0 : index
    %c0_5 = arith.constant 0 : index
    %6 = vector.load %arg3[%c0_4, %c0_5] : memref<2x1024xf32, #tpu.memory_space<vmem>>, vector<1x1024xf32>
    %c1 = arith.constant 1 : index
    %c0_6 = arith.constant 0 : index
    %7 = vector.load %arg3[%c1, %c0_6] : memref<2x1024xf32, #tpu.memory_space<vmem>>, vector<1x1024xf32>
    %cst_7 = arith.constant dense<0.000000e+00> : vector<1024xf32>
    %8 = vector.multi_reduction <add>, %5, %cst_7 [0] : vector<8x1024xf32> to vector<1024xf32>
    %9 = vector.shape_cast %8 : vector<1024xf32> to vector<1x1024xf32>
    %cst_8 = arith.constant 8.000000e+00 : f32
    %10 = vector.broadcast %cst_8 : f32 to vector<1x1024xf32>
    %11 = arith.divf %9, %10 : vector<1x1024xf32>
    %12 = arith.mulf %5, %5 : vector<8x1024xf32>
    %cst_9 = arith.constant dense<0.000000e+00> : vector<1024xf32>
    %13 = vector.multi_reduction <add>, %12, %cst_9 [0] : vector<8x1024xf32> to vector<1024xf32>
    %14 = vector.shape_cast %13 : vector<1024xf32> to vector<1x1024xf32>
    %cst_10 = arith.constant 8.000000e+00 : f32
    %15 = vector.broadcast %cst_10 : f32 to vector<1x1024xf32>
    %16 = arith.divf %14, %15 : vector<1x1024xf32>
    %17 = arith.mulf %11, %11 : vector<1x1024xf32>
    %18 = arith.subf %16, %17 : vector<1x1024xf32>
    %cst_11 = arith.constant 0.000000e+00 : f32
    %19 = vector.broadcast %cst_11 : f32 to vector<1x1024xf32>
    %20 = arith.maximumf %18, %19 : vector<1x1024xf32>
    %cst_12 = arith.constant 9.99999974E-6 : f32
    %21 = vector.broadcast %cst_12 : f32 to vector<1x1024xf32>
    %22 = arith.addf %20, %21 : vector<1x1024xf32>
    %23 = math.rsqrt %22 : vector<1x1024xf32>
    %24 = arith.mulf %6, %23 : vector<1x1024xf32>
    %25 = arith.mulf %11, %24 : vector<1x1024xf32>
    %26 = arith.subf %7, %25 : vector<1x1024xf32>
    %27 = vector.broadcast %24 : vector<1x1024xf32> to vector<8x1024xf32>
    %28 = arith.mulf %5, %27 : vector<8x1024xf32>
    %29 = vector.broadcast %26 : vector<1x1024xf32> to vector<8x1024xf32>
    %30 = arith.addf %28, %29 : vector<8x1024xf32>
    %cst_13 = arith.constant 0.000000e+00 : f32
    %31 = vector.broadcast %cst_13 : f32 to vector<8x1024xf32>
    %32 = arith.maximumf %30, %31 : vector<8x1024xf32>
    %33 = arith.truncf %32 : vector<8x1024xf32> to vector<8x1024xbf16>
    %c0_14 = arith.constant 0 : index
    %c0_15 = arith.constant 0 : index
    %34 = vector.load %arg4[%c0_14, %c0_15] : memref<1024x128xbf16, #tpu.memory_space<vmem>>, vector<1024x128xbf16>
    %cst_16 = arith.constant dense<0.000000e+00> : vector<8x128xf32>
    %35 = tpu.matmul %33, %34, %cst_16 {dimension_numbers = #tpu.dot_dimension_numbers<[1], [0], [0], [1], [0, 0, 1, 1], [], []>} : vector<8x1024xbf16>, vector<1024x128xbf16>, vector<8x128xf32> -> vector<8x128xf32>
    %c0_17 = arith.constant 0 : index
    %c0_18 = arith.constant 0 : index
    %36 = vector.load %arg5[%c0_17, %c0_18] : memref<1x128xf32, #tpu.memory_space<vmem>>, vector<1x128xf32>
    %37 = vector.broadcast %36 : vector<1x128xf32> to vector<8x128xf32>
    %38 = arith.addf %35, %37 : vector<8x128xf32>
    %c0_19 = arith.constant 0 : index
    %c0_20 = arith.constant 0 : index
    %c0_21 = arith.constant 0 : index
    %39 = vector.load %arg6[%c0_19, %c0_20, %c0_21] : memref<1x8x128xf32, #tpu.memory_space<vmem>>, vector<1x8x128xf32>
    %40 = vector.shape_cast %39 : vector<1x8x128xf32> to vector<8x128xf32>
    %41 = vector.shape_cast %38 : vector<8x128xf32> to vector<1x8x128xf32>
    tpu.vector_store %arg6[%c0_19, %c0_20, %c0_21], %41 {strides = array<i32>} : memref<1x8x128xf32, #tpu.memory_space<vmem>>, vector<1x8x128xf32>,
    return
  }
  func.func @transform_0(%arg0: i32) -> (i32, i32, i32) {
    %c0_i32 = arith.constant 0 : i32
    %c0_i32_0 = arith.constant 0 : i32
    %c0_i32_1 = arith.constant 0 : i32
    return %arg0, %c0_i32, %c0_i32_0 : i32, i32, i32
  }
  func.func @transform_1(%arg0: i32) -> (i32, i32) {
    %c0_i32 = arith.constant 0 : i32
    %c0_i32_0 = arith.constant 0 : i32
    %c0_i32_1 = arith.constant 0 : i32
    return %c0_i32, %c0_i32_0 : i32, i32
  }
  func.func @transform_2(%arg0: i32) -> (i32, i32) {
    %c0_i32 = arith.constant 0 : i32
    %c0_i32_0 = arith.constant 0 : i32
    %c0_i32_1 = arith.constant 0 : i32
    return %c0_i32, %c0_i32_0 : i32, i32
  }
  func.func @transform_3(%arg0: i32) -> (i32, i32) {
    %c0_i32 = arith.constant 0 : i32
    %c0_i32_0 = arith.constant 0 : i32
    %c0_i32_1 = arith.constant 0 : i32
    return %c0_i32, %c0_i32_0 : i32, i32
  }
  func.func @transform_4(%arg0: i32) -> (i32, i32) {
    %c0_i32 = arith.constant 0 : i32
    %c0_i32_0 = arith.constant 0 : i32
    %c0_i32_1 = arith.constant 0 : i32
    return %c0_i32, %c0_i32_0 : i32, i32
  }
  func.func @transform_5(%arg0: i32) -> (i32, i32, i32) {
    %c0_i32 = arith.constant 0 : i32
    %c0_i32_0 = arith.constant 0 : i32
    %c0_i32_1 = arith.constant 0 : i32
    return %arg0, %c0_i32, %c0_i32_0 : i32, i32, i32
  }
}

</mosaic_0001>

<bundles_post_ra>
// kernel: tpu_custom_call.1
= control target key start
LH: loop header
LB: loop body
LE: loop exit
PB: predicated region body
PF: predicated region fallthrough
CT: control target
= control target key end

     0   :  { %10 = vsyncpa [#allocation3], 0  ;;  %s5966_s0 = inlined_call_operand.hbm [shape: f32[1,8,1024], index: 0, kind: input, shape index: {}]   ;;  %s5967_s1 = inlined_call_operand.hbm [shape: s8[1024,1024], index: 1, kind: input, shape index: {}]   ;;  %s5968_s2 = inlined_call_operand.hbm [shape: f32[2,1024], index: 2, kind: input, shape index: {}]   ;;  %s5969_s3 = inlined_call_operand.hbm [shape: bf16[1024,128], index: 3, kind: input, shape index: {}]   ;;  %s5970_s4 = inlined_call_operand.vmem [shape: f32[1,128], index: 4, kind: input, shape index: {}]   ;;  %s5971_s5 = inlined_call_operand.hbm [shape: f32[1,8,128], index: 5, kind: output, shape index: {}]  }
   0x1   :  { %11 = vsyncpa [#allocation6], 0 }
   0x2   :  { %12 = vsyncpa [#allocation9], 0  ;;  %s29_s20 = sshll.u32 %s5967_s1, 4  ;;  %s30_s20 = int_to_ptr.hbm [resolvable:$true] %s29_s20 }
   0x3   :  { %13 = vsyncpa [#allocation4], 0  ;;  %s5231_s21 = smov [#allocation5]   ;;  %s19_s25 = sshll.u32 %s5966_s0, 4  ;;  %s20_s25 = int_to_ptr.hbm [resolvable:$true] %s19_s25 }
   0x4   :  { %s31_s22 = sshll.u32 %s5231_s21, 4  ;;  %s5232_s26 = smov 1024   ;;  %s32_s22 = int_to_ptr.vmem [resolvable:$true] %s31_s22 }
   0x5   :  { %s5233_s27 = smov 64   ;;  %s5234_s28 = smov [#allocation2]  }
   0x6   :  { %37 = dma.hbm_to_vmem [thread:$0]  %s30_s20, 32768, %s32_s22, [#allocation6], %s5232_s26, %s5232_s26, %s5233_s27  }
   0x7   :  { %s21_s29 = sshll.u32 %s5234_s28, 4  ;;  %s43_s7 = sshll.u32 %s5968_s2, 4  ;;  %s22_s29 = int_to_ptr.vmem [resolvable:$true] %s21_s29  ;;  %s44_s7 = int_to_ptr.hbm [resolvable:$true] %s43_s7 }
   0x8   :  { %24 = dma.hbm_to_vmem [thread:$0]  %s20_s25, 1024, %s22_s29, [#allocation3]  }
   0x9   :  { %s53_s9 = sshll.u32 %s5969_s3, 4  ;;  %s5235_s10 = smov [#allocation7]   ;;  %s54_s9 = int_to_ptr.hbm [resolvable:$true] %s53_s9 }
   0xa   :  { %s45_s11 = sshll.u32 %s5235_s10, 4  ;;  %s5236_s0 = smov [#allocation8]   ;;  %s46_s11 = int_to_ptr.vmem [resolvable:$true] %s45_s11 }
   0xb   :  { %48 = dma.hbm_to_vmem [thread:$0]  %s44_s7, 256, %s46_s11, [#allocation6]  }
   0xc   :  { %s55_s12 = sshll.u32 %s5236_s0, 4  ;;  %s5237_s13 = smov 4   ;;  %s56_s12 = int_to_ptr.vmem [resolvable:$true] %s55_s12 }
   0xd   :  { %61 = dma.hbm_to_vmem [thread:$0]  %s54_s9, 8192, %s56_s12, [#allocation9], %s5233_s27, %s5233_s27, %s5237_s13  }
   0xe   :  { %5223 = dma.done.wait [#allocation3], 1024  }
   0xf   :  { %5224 = vsyncadd [#allocation3], 4294966272 }
  0x10   :  { %5225 = dma.done.wait [#allocation6], 33024  }
  0x11   :  { %5226 = vsyncadd [#allocation6], 4294934272 }
  0x12   :  { %5227 = dma.done.wait [#allocation9], 8192  }
  0x13   :  { %5228 = vsyncadd [#allocation9], 4294959104  ;;  %v112_v0 = vld [vmem:[#allocation5 + $0xc0] sm:$0xff]  ;;  %vm4001_vm7 = vcmask 1040384   ;;  %vm4003_vm14 = vcmask 1042434   ;;  %vm4005_vm15 = vcmask 1041408  }
  0x14   :  { %v144_v1 = vld [vmem:[#allocation5 + $0x1c0] sm:$0xff]  ;;  %v456_v3 = vunpack.c.2.s8 %v112_v0  ;;  %v464_v4 = vunpack.c.3.s8 %v112_v0  ;;  %v440_v22 = vunpack.c.0.s8 %v112_v0  ;;  %v448_v23 = vunpack.c.1.s8 %v112_v0  ;;  %s5239_s14 = smov [#allocation10]   ;;  %s4743_s18 = sshll.u32 %s5971_s5, 4  ;;  %s4744_s18 = int_to_ptr.hbm [resolvable:$true] %s4743_s18 }
  0x15   :  { %v176_v2 = vld [vmem:[#allocation5 + $0x2c0] sm:$0xff]  ;;  %v584_v5 = vunpack.c.2.s8 %v144_v1  ;;  %v592_v6 = vunpack.c.3.s8 %v144_v1  ;;  %v568_v26 = vunpack.c.0.s8 %v144_v1  ;;  %v576_v27 = vunpack.c.1.s8 %v144_v1  ;;  %s4741_s15 = sshll.u32 %s5239_s14, 4  ;;  %s4742_s15 = int_to_ptr.vmem [resolvable:$true] %s4741_s15 }
  0x16   :  { %v208_v7 = vld [vmem:[#allocation5 + $0x3c0] sm:$0xff]  ;;  %v712_v8 = vunpack.c.2.s8 %v176_v2  ;;  %v720_v9 = vunpack.c.3.s8 %v176_v2  ;;  %v1480_v12 = vcvt.s32.f32 %v456_v3  ;;  %v1488_v13 = vcvt.s32.f32 %v464_v4 }
  0x17   :  { %v840_v10 = vunpack.c.2.s8 %v208_v7  ;;  %v848_v11 = vunpack.c.3.s8 %v208_v7  ;;  %v1608_v14 = vcvt.s32.f32 %v584_v5  ;;  %v1616_v15 = vcvt.s32.f32 %v592_v6  ;;  %v104_v28 = vld [vmem:[#allocation5 + $0x80] sm:$0xff] }
  0x18   :  { %v1736_v16 = vcvt.s32.f32 %v712_v8  ;;  %v1744_v17 = vcvt.s32.f32 %v720_v9  ;;  %v2448_v20 = vpack.c.bf16 %v1488_v13, %v1480_v12  ;;  %v1464_v29 = vcvt.s32.f32 %v440_v22  ;;  %v136_v37 = vld [vmem:[#allocation5 + $0x180] sm:$0xff] }
  0x19   :  { %v1864_v18 = vcvt.s32.f32 %v840_v10  ;;  %v1872_v19 = vcvt.s32.f32 %v848_v11  ;;  %v2512_v21 = vpack.c.bf16 %v1616_v15, %v1608_v14  ;;  %v1472_v30 = vcvt.s32.f32 %v448_v23  ;;  %v168_v42 = vld [vmem:[#allocation5 + $0x280] sm:$0xff] }
  0x1a   :  { %v2576_v24 = vpack.c.bf16 %v1744_v17, %v1736_v16  ;;  %2912 = vmatpush.bf16.msra.mxu0 %v2448_v20  ;;  %v696_v31 = vunpack.c.0.s8 %v176_v2  ;;  %v704_v32 = vunpack.c.1.s8 %v176_v2  ;;  %v1592_v33 = vcvt.s32.f32 %v568_v26  ;;  %v200_v47 = vld [vmem:[#allocation5 + $0x380] sm:$0xff] }
  0x1b   :  { %v2640_v25 = vpack.c.bf16 %v1872_v19, %v1864_v18  ;;  %2925 = vmatpush.bf16.msra.mxu1 %v2512_v21  ;;  %v1600_v34 = vcvt.s32.f32 %v576_v27  ;;  %v824_v35 = vunpack.c.0.s8 %v208_v7  ;;  %v832_v36 = vunpack.c.1.s8 %v208_v7  ;;  %v96_v8 = vld [vmem:[#allocation5 + $0x40] sm:$0xff] }
  0x1c   :  { %2938 = vmatpush.bf16.msra.mxu2 %v2576_v24  ;;  %v2440_v38 = vpack.c.bf16 %v1472_v30, %v1464_v29  ;;  %v1720_v39 = vcvt.s32.f32 %v696_v31  ;;  %v1728_v40 = vcvt.s32.f32 %v704_v32  ;;  %v424_v41 = vunpack.c.2.s8 %v104_v28  ;;  %v128_v17 = vld [vmem:[#allocation5 + $0x140] sm:$0xff] }
  0x1d   :  { %2951 = vmatpush.bf16.msra.mxu3 %v2640_v25  ;;  %v2504_v43 = vpack.c.bf16 %v1600_v34, %v1592_v33  ;;  %v1848_v44 = vcvt.s32.f32 %v824_v35  ;;  %v1856_v45 = vcvt.s32.f32 %v832_v36  ;;  %v432_v46 = vunpack.c.3.s8 %v104_v28  ;;  %v160_v22 = vld [vmem:[#allocation5 + $0x240] sm:$0xff] }
  0x1e   :  { %2913 = vmatpush.bf16.msra.mxu0 %v2440_v38  ;;  %v2568_v48 = vpack.c.bf16 %v1728_v40, %v1720_v39  ;;  %v1448_v49 = vcvt.s32.f32 %v424_v41  ;;  %v552_v50 = vunpack.c.2.s8 %v136_v37  ;;  %v560_v51 = vunpack.c.3.s8 %v136_v37  ;;  %v192_v27 = vld [vmem:[#allocation5 + $0x340] sm:$0xff] }
  0x1f   :  { %2926 = vmatpush.bf16.msra.mxu1 %v2504_v43  ;;  %v2632_v52 = vpack.c.bf16 %v1856_v45, %v1848_v44  ;;  %v1456_v53 = vcvt.s32.f32 %v432_v46  ;;  %v680_v54 = vunpack.c.2.s8 %v168_v42  ;;  %v688_v55 = vunpack.c.3.s8 %v168_v42 }
  0x20   :  { %2939 = vmatpush.bf16.msra.mxu2 %v2568_v48  ;;  %v1576_v56 = vcvt.s32.f32 %v552_v50  ;;  %v1584_v57 = vcvt.s32.f32 %v560_v51  ;;  %v808_v58 = vunpack.c.2.s8 %v200_v47  ;;  %v816_v59 = vunpack.c.3.s8 %v200_v47 }
  0x21   :  { %2952 = vmatpush.bf16.msra.mxu3 %v2632_v52  ;;  %v2432_v60 = vpack.c.bf16 %v1456_v53, %v1448_v49  ;;  %v1704_v61 = vcvt.s32.f32 %v680_v54  ;;  %v1712_v62 = vcvt.s32.f32 %v688_v55  ;;  %v408_v63 = vunpack.c.0.s8 %v104_v28  ;;  %v88_v52 = vld [vmem:[#allocation5] sm:$0xff] }
  0x22   :  { %v2496_v0 = vpack.c.bf16 %v1584_v57, %v1576_v56  ;;  %v1832_v1 = vcvt.s32.f32 %v808_v58  ;;  %v1840_v2 = vcvt.s32.f32 %v816_v59  ;;  %v416_v3 = vunpack.c.1.s8 %v104_v28 }
  0x23   :  { %2914 = vmatpush.bf16.msra.mxu0 %v2432_v60  ;;  %v2560_v4 = vpack.c.bf16 %v1712_v62, %v1704_v61  ;;  %v1432_v5 = vcvt.s32.f32 %v408_v63  ;;  %v536_v6 = vunpack.c.0.s8 %v136_v37  ;;  %v544_v7 = vunpack.c.1.s8 %v136_v37  ;;  %v120_v61 = vld [vmem:[#allocation5 + $0x100] sm:$0xff] }
  0x24   :  { %2927 = vmatpush.bf16.msra.mxu1 %v2496_v0  ;;  %v2624_v9 = vpack.c.bf16 %v1840_v2, %v1832_v1  ;;  %v1440_v10 = vcvt.s32.f32 %v416_v3  ;;  %v664_v11 = vunpack.c.0.s8 %v168_v42  ;;  %v672_v12 = vunpack.c.1.s8 %v168_v42  ;;  %v152_v2 = vld [vmem:[#allocation5 + $0x200] sm:$0xff] }
  0x25   :  { %2940 = vmatpush.bf16.msra.mxu2 %v2560_v4  ;;  %v1560_v13 = vcvt.s32.f32 %v536_v6  ;;  %v1568_v14 = vcvt.s32.f32 %v544_v7  ;;  %v792_v15 = vunpack.c.0.s8 %v200_v47  ;;  %v800_v16 = vunpack.c.1.s8 %v200_v47  ;;  %v184_v7 = vld [vmem:[#allocation5 + $0x300] sm:$0xff] }
  0x26   :  { %2953 = vmatpush.bf16.msra.mxu3 %v2624_v9  ;;  %v2424_v18 = vpack.c.bf16 %v1440_v10, %v1432_v5  ;;  %v1688_v19 = vcvt.s32.f32 %v664_v11  ;;  %v1696_v20 = vcvt.s32.f32 %v672_v12  ;;  %v392_v21 = vunpack.c.2.s8 %v96_v8 }
  0x27   :  { %v2488_v23 = vpack.c.bf16 %v1568_v14, %v1560_v13  ;;  %v1816_v24 = vcvt.s32.f32 %v792_v15  ;;  %v1824_v25 = vcvt.s32.f32 %v800_v16  ;;  %v400_v26 = vunpack.c.3.s8 %v96_v8 }
  0x28   :  { %2915 = vmatpush.bf16.msra.mxu0 %v2424_v18  ;;  %v2552_v28 = vpack.c.bf16 %v1696_v20, %v1688_v19  ;;  %v1416_v29 = vcvt.s32.f32 %v392_v21  ;;  %v520_v30 = vunpack.c.2.s8 %v128_v17  ;;  %v528_v31 = vunpack.c.3.s8 %v128_v17 }
  0x29   :  { %2928 = vmatpush.bf16.msra.mxu1 %v2488_v23  ;;  %v2616_v32 = vpack.c.bf16 %v1824_v25, %v1816_v24  ;;  %v1424_v33 = vcvt.s32.f32 %v400_v26  ;;  %v648_v34 = vunpack.c.2.s8 %v160_v22  ;;  %v656_v35 = vunpack.c.3.s8 %v160_v22 }
  0x2a   :  { %2941 = vmatpush.bf16.msra.mxu2 %v2552_v28  ;;  %v1544_v36 = vcvt.s32.f32 %v520_v30  ;;  %v1552_v37 = vcvt.s32.f32 %v528_v31  ;;  %v776_v38 = vunpack.c.2.s8 %v192_v27  ;;  %v784_v39 = vunpack.c.3.s8 %v192_v27 }
  0x2b   :  { %2954 = vmatpush.bf16.msra.mxu3 %v2616_v32  ;;  %v2416_v40 = vpack.c.bf16 %v1424_v33, %v1416_v29  ;;  %v1672_v41 = vcvt.s32.f32 %v648_v34  ;;  %v1680_v42 = vcvt.s32.f32 %v656_v35  ;;  %v376_v43 = vunpack.c.0.s8 %v96_v8  ;;  %v240_v32 = vld [vmem:[#allocation5 + $0x4c0] sm:$0xff] }
  0x2c   :  { %v2480_v44 = vpack.c.bf16 %v1552_v37, %v1544_v36  ;;  %v1800_v45 = vcvt.s32.f32 %v776_v38  ;;  %v1808_v46 = vcvt.s32.f32 %v784_v39  ;;  %v384_v47 = vunpack.c.1.s8 %v96_v8 }
  0x2d   :  { %2916 = vmatpush.bf16.msra.mxu0 %v2416_v40  ;;  %v2544_v48 = vpack.c.bf16 %v1680_v42, %v1672_v41  ;;  %v1400_v49 = vcvt.s32.f32 %v376_v43  ;;  %v504_v50 = vunpack.c.0.s8 %v128_v17  ;;  %v512_v51 = vunpack.c.1.s8 %v128_v17  ;;  %v272_v41 = vld [vmem:[#allocation5 + $0x5c0] sm:$0xff] }
  0x2e   :  { %2929 = vmatpush.bf16.msra.mxu1 %v2480_v44  ;;  %v2608_v53 = vpack.c.bf16 %v1808_v46, %v1800_v45  ;;  %v1408_v54 = vcvt.s32.f32 %v384_v47  ;;  %v632_v55 = vunpack.c.0.s8 %v160_v22  ;;  %v640_v56 = vunpack.c.1.s8 %v160_v22  ;;  %v304_v46 = vld [vmem:[#allocation5 + $0x6c0] sm:$0xff] }
  0x2f   :  { %2942 = vmatpush.bf16.msra.mxu2 %v2544_v48  ;;  %v1528_v57 = vcvt.s32.f32 %v504_v50  ;;  %v1536_v58 = vcvt.s32.f32 %v512_v51  ;;  %v760_v59 = vunpack.c.0.s8 %v192_v27  ;;  %v768_v60 = vunpack.c.1.s8 %v192_v27  ;;  %v336_v51 = vld [vmem:[#allocation5 + $0x7c0] sm:$0xff] }
  0x30   :  { %2955 = vmatpush.bf16.msra.mxu3 %v2608_v53  ;;  %v2408_v62 = vpack.c.bf16 %v1408_v54, %v1400_v49  ;;  %v1656_v63 = vcvt.s32.f32 %v632_v55  ;;  %v1664_v0 = vcvt.s32.f32 %v640_v56  ;;  %v360_v1 = vunpack.c.2.s8 %v88_v52 }
  0x31   :  { %v2472_v3 = vpack.c.bf16 %v1536_v58, %v1528_v57  ;;  %v1784_v4 = vcvt.s32.f32 %v760_v59  ;;  %v1792_v5 = vcvt.s32.f32 %v768_v60  ;;  %v368_v6 = vunpack.c.3.s8 %v88_v52 }
  0x32   :  { %2917 = vmatpush.bf16.msra.mxu0 %v2408_v62  ;;  %v2536_v8 = vpack.c.bf16 %v1664_v0, %v1656_v63  ;;  %v1384_v9 = vcvt.s32.f32 %v360_v1  ;;  %v488_v10 = vunpack.c.2.s8 %v120_v61  ;;  %v496_v11 = vunpack.c.3.s8 %v120_v61 }
  0x33   :  { %2930 = vmatpush.bf16.msra.mxu1 %v2472_v3  ;;  %v2600_v12 = vpack.c.bf16 %v1792_v5, %v1784_v4  ;;  %v1392_v13 = vcvt.s32.f32 %v368_v6  ;;  %v616_v14 = vunpack.c.2.s8 %v152_v2  ;;  %v624_v15 = vunpack.c.3.s8 %v152_v2 }
  0x34   :  { %2943 = vmatpush.bf16.msra.mxu2 %v2536_v8  ;;  %v1512_v16 = vcvt.s32.f32 %v488_v10  ;;  %v1520_v17 = vcvt.s32.f32 %v496_v11  ;;  %v744_v18 = vunpack.c.2.s8 %v184_v7  ;;  %v752_v19 = vunpack.c.3.s8 %v184_v7 }
  0x35   :  { %2956 = vmatpush.bf16.msra.mxu3 %v2600_v12  ;;  %v2400_v20 = vpack.c.bf16 %v1392_v13, %v1384_v9  ;;  %v1640_v21 = vcvt.s32.f32 %v616_v14  ;;  %v1648_v22 = vcvt.s32.f32 %v624_v15  ;;  %v344_v23 = vunpack.c.0.s8 %v88_v52  ;;  %v232_v12 = vld [vmem:[#allocation5 + $0x480] sm:$0xff] }
  0x36   :  { %v2464_v24 = vpack.c.bf16 %v1520_v17, %v1512_v16  ;;  %v1768_v25 = vcvt.s32.f32 %v744_v18  ;;  %v1776_v26 = vcvt.s32.f32 %v752_v19  ;;  %v352_v27 = vunpack.c.1.s8 %v88_v52 }
  0x37   :  { %2918 = vmatpush.bf16.msra.mxu0 %v2400_v20  ;;  %v2528_v28 = vpack.c.bf16 %v1648_v22, %v1640_v21  ;;  %v1368_v29 = vcvt.s32.f32 %v344_v23  ;;  %v472_v30 = vunpack.c.0.s8 %v120_v61  ;;  %v480_v31 = vunpack.c.1.s8 %v120_v61  ;;  %v264_v21 = vld [vmem:[#allocation5 + $0x580] sm:$0xff] }
  0x38   :  { %2931 = vmatpush.bf16.msra.mxu1 %v2464_v24  ;;  %v2592_v33 = vpack.c.bf16 %v1776_v26, %v1768_v25  ;;  %v1376_v34 = vcvt.s32.f32 %v352_v27  ;;  %v600_v35 = vunpack.c.0.s8 %v152_v2  ;;  %v608_v36 = vunpack.c.1.s8 %v152_v2  ;;  %v296_v26 = vld [vmem:[#allocation5 + $0x680] sm:$0xff] }
  0x39   :  { %2944 = vmatpush.bf16.msra.mxu2 %v2528_v28  ;;  %v1496_v37 = vcvt.s32.f32 %v472_v30  ;;  %v1504_v38 = vcvt.s32.f32 %v480_v31  ;;  %v728_v39 = vunpack.c.0.s8 %v184_v7  ;;  %v736_v40 = vunpack.c.1.s8 %v184_v7  ;;  %v328_v31 = vld [vmem:[#allocation5 + $0x780] sm:$0xff] }
  0x3a   :  { %2957 = vmatpush.bf16.msra.mxu3 %v2592_v33  ;;  %v2392_v42 = vpack.c.bf16 %v1376_v34, %v1368_v29  ;;  %v1624_v43 = vcvt.s32.f32 %v600_v35  ;;  %v1632_v44 = vcvt.s32.f32 %v608_v36  ;;  %v968_v45 = vunpack.c.2.s8 %v240_v32 }
  0x3b   :  { %v2456_v47 = vpack.c.bf16 %v1504_v38, %v1496_v37  ;;  %v1752_v48 = vcvt.s32.f32 %v728_v39  ;;  %v1760_v49 = vcvt.s32.f32 %v736_v40  ;;  %v976_v50 = vunpack.c.3.s8 %v240_v32 }
  0x3c   :  { %2919 = vmatpush.bf16.msra.mxu0 %v2392_v42  ;;  %v2520_v52 = vpack.c.bf16 %v1632_v44, %v1624_v43  ;;  %v1992_v53 = vcvt.s32.f32 %v968_v45  ;;  %v1096_v54 = vunpack.c.2.s8 %v272_v41  ;;  %v1104_v55 = vunpack.c.3.s8 %v272_v41 }
  0x3d   :  { %2932 = vmatpush.bf16.msra.mxu1 %v2456_v47  ;;  %v2584_v56 = vpack.c.bf16 %v1760_v49, %v1752_v48  ;;  %v2000_v57 = vcvt.s32.f32 %v976_v50  ;;  %v1224_v58 = vunpack.c.2.s8 %v304_v46  ;;  %v1232_v59 = vunpack.c.3.s8 %v304_v46 }
  0x3e   :  { %2945 = vmatpush.bf16.msra.mxu2 %v2520_v52  ;;  %v2120_v60 = vcvt.s32.f32 %v1096_v54  ;;  %v2128_v61 = vcvt.s32.f32 %v1104_v55  ;;  %v1352_v62 = vunpack.c.2.s8 %v336_v51  ;;  %v1360_v63 = vunpack.c.3.s8 %v336_v51 }
  0x3f   :  { %2958 = vmatpush.bf16.msra.mxu3 %v2584_v56  ;;  %v2704_v0 = vpack.c.bf16 %v2000_v57, %v1992_v53  ;;  %v2248_v1 = vcvt.s32.f32 %v1224_v58  ;;  %v2256_v2 = vcvt.s32.f32 %v1232_v59  ;;  %v952_v3 = vunpack.c.0.s8 %v240_v32  ;;  %v82_v56 = vld [vmem:[#allocation2 + $0x10] sm:$0xff] }
  0x40   :  { %v2768_v4 = vpack.c.bf16 %v2128_v61, %v2120_v60  ;;  %v2376_v5 = vcvt.s32.f32 %v1352_v62  ;;  %v2384_v6 = vcvt.s32.f32 %v1360_v63  ;;  %v960_v7 = vunpack.c.1.s8 %v240_v32  ;;  %v5282_v61 = vld [vmem:[#allocation5 + $0x440] sm:$0xff] }
  0x41   :  { %2964 = vmatpush.bf16.msrb.mxu0 %v2704_v0  ;;  %v2832_v8 = vpack.c.bf16 %v2256_v2, %v2248_v1  ;;  %v1976_v9 = vcvt.s32.f32 %v952_v3  ;;  %v1080_v10 = vunpack.c.0.s8 %v272_v41  ;;  %v1088_v11 = vunpack.c.1.s8 %v272_v41  ;;  %v256_v2 = vld [vmem:[#allocation5 + $0x540] sm:$0xff] }
  0x42   :  { %2977 = vmatpush.bf16.msrb.mxu1 %v2768_v4  ;;  %v2896_v13 = vpack.c.bf16 %v2384_v6, %v2376_v5  ;;  %v1984_v14 = vcvt.s32.f32 %v960_v7  ;;  %v1208_v15 = vunpack.c.0.s8 %v304_v46  ;;  %v1216_v16 = vunpack.c.1.s8 %v304_v46  ;;  %v288_v7 = vld [vmem:[#allocation5 + $0x640] sm:$0xff] }
  0x43   :  { %2990 = vmatpush.bf16.msrb.mxu2 %v2832_v8  ;;  %v2104_v17 = vcvt.s32.f32 %v1080_v10  ;;  %v2112_v18 = vcvt.s32.f32 %v1088_v11  ;;  %v1336_v19 = vunpack.c.0.s8 %v336_v51  ;;  %v1344_v20 = vunpack.c.1.s8 %v336_v51 }
  0x44   :  { %3003 = vmatpush.bf16.msrb.mxu3 %v2896_v13  ;;  %v2696_v22 = vpack.c.bf16 %v1984_v14, %v1976_v9  ;;  %v2232_v23 = vcvt.s32.f32 %v1208_v15  ;;  %v2240_v24 = vcvt.s32.f32 %v1216_v16  ;;  %v936_v25 = vunpack.c.2.s8 %v232_v12 }
  0x45   :  { %v2760_v27 = vpack.c.bf16 %v2112_v18, %v2104_v17  ;;  %v2360_v28 = vcvt.s32.f32 %v1336_v19  ;;  %v2368_v29 = vcvt.s32.f32 %v1344_v20  ;;  %v944_v30 = vunpack.c.3.s8 %v232_v12  ;;  %v80_v17 = vld [vmem:[#allocation2] sm:$0xff] }
  0x46   :  { %2965 = vmatpush.bf16.msrb.mxu0 %v2696_v22  ;;  %v2824_v32 = vpack.c.bf16 %v2240_v24, %v2232_v23  ;;  %v1960_v33 = vcvt.s32.f32 %v936_v25  ;;  %v1064_v34 = vunpack.c.2.s8 %v264_v21  ;;  %v1072_v35 = vunpack.c.3.s8 %v264_v21  ;;  %v83_v22 = vld [vmem:[#allocation2 + $0x18] sm:$0xff] }
  0x47   :  { %2978 = vmatpush.bf16.msrb.mxu1 %v2760_v27  ;;  %v2888_v36 = vpack.c.bf16 %v2368_v29, %v2360_v28  ;;  %v1968_v37 = vcvt.s32.f32 %v944_v30  ;;  %v1192_v38 = vunpack.c.2.s8 %v296_v26  ;;  %v1200_v39 = vunpack.c.3.s8 %v296_v26  ;;  %v81_v27 = vld [vmem:[#allocation2 + $0x8] sm:$0xff] }
  0x48   :  { %2991 = vmatpush.bf16.msrb.mxu2 %v2824_v32  ;;  %v2088_v40 = vcvt.s32.f32 %v1064_v34  ;;  %v2096_v41 = vcvt.s32.f32 %v1072_v35  ;;  %v1320_v42 = vunpack.c.2.s8 %v328_v31  ;;  %v1328_v43 = vunpack.c.3.s8 %v328_v31 }
  0x49   :  { %3004 = vmatpush.bf16.msrb.mxu3 %v2888_v36  ;;  %v2688_v44 = vpack.c.bf16 %v1968_v37, %v1960_v33  ;;  %v2216_v45 = vcvt.s32.f32 %v1192_v38  ;;  %v2224_v46 = vcvt.s32.f32 %v1200_v39  ;;  %v920_v47 = vunpack.c.0.s8 %v232_v12 }
  0x4a   :  { %v2752_v48 = vpack.c.bf16 %v2096_v41, %v2088_v40  ;;  %v2344_v49 = vcvt.s32.f32 %v1320_v42  ;;  %v2352_v50 = vcvt.s32.f32 %v1328_v43  ;;  %v928_v51 = vunpack.c.1.s8 %v232_v12  ;;  %v5287_v12 = vld [vmem:[#allocation5 + $0x740] sm:$0xff] }
  0x4b   :  { %2966 = vmatpush.bf16.msrb.mxu0 %v2688_v44  ;;  %v2816_v52 = vpack.c.bf16 %v2224_v46, %v2216_v45  ;;  %v1944_v53 = vcvt.s32.f32 %v920_v47  ;;  %v1048_v54 = vunpack.c.0.s8 %v264_v21  ;;  %v1056_v55 = vunpack.c.1.s8 %v264_v21  ;;  %v216_v44 = vld [vmem:[#allocation5 + $0x400] sm:$0xff] }
  0x4c   :  { %2979 = vmatpush.bf16.msrb.mxu1 %v2752_v48  ;;  %v2880_v57 = vpack.c.bf16 %v2352_v50, %v2344_v49  ;;  %v1952_v58 = vcvt.s32.f32 %v928_v51  ;;  %v1176_v59 = vunpack.c.0.s8 %v296_v26  ;;  %v1184_v60 = vunpack.c.1.s8 %v296_v26  ;;  %v248_v49 = vld [vmem:[#allocation5 + $0x500] sm:$0xff] }
  0x4d   :  { %2992 = vmatpush.bf16.msrb.mxu2 %v2816_v52  ;;  %v2072_v62 = vcvt.s32.f32 %v1048_v54  ;;  %v2080_v63 = vcvt.s32.f32 %v1056_v55  ;;  %v1304_v0 = vunpack.c.0.s8 %v328_v31  ;;  %v1312_v1 = vunpack.c.1.s8 %v328_v31 }
  0x4e   :  { %3005 = vmatpush.bf16.msrb.mxu3 %v2880_v57  ;;  %v2680_v3 = vpack.c.bf16 %v1952_v58, %v1944_v53  ;;  %v2200_v4 = vcvt.s32.f32 %v1176_v59  ;;  %v2208_v5 = vcvt.s32.f32 %v1184_v60  ;;  %v5284_v6 = vpack.c.bf16 %v82_v56, %v82_v56  ;;  %v280_v58 = vld [vmem:[#allocation5 + $0x600] sm:$0xff] }
  0x4f   :  { %v2744_v8 = vpack.c.bf16 %v2080_v63, %v2072_v62  ;;  %v2328_v9 = vcvt.s32.f32 %v1304_v0  ;;  %v2336_v10 = vcvt.s32.f32 %v1312_v1  ;;  %v904_v11 = vunpack.c.2.s8 %v5282_v61  ;;  %v312_v63 = vld [vmem:[#allocation5 + $0x700] sm:$0xff] }
  0x50   :  { %2967 = vmatpush.bf16.msrb.mxu0 %v2680_v3  ;;  %v2808_v13 = vpack.c.bf16 %v2208_v5, %v2200_v4  ;;  %2946 = vmatmul.bf16.vlgmr.msra.gmra.mxu2 %v5284_v6  ;;  %v912_v14 = vunpack.c.3.s8 %v5282_v61  ;;  %v1032_v15 = vunpack.c.2.s8 %v256_v2  ;;  %v1040_v16 = vunpack.c.3.s8 %v256_v2 }
  0x51   :  { %2980 = vmatpush.bf16.msrb.mxu1 %v2744_v8  ;;  %v2872_v18 = vpack.c.bf16 %v2336_v10, %v2328_v9  ;;  %v1928_v19 = vcvt.s32.f32 %v904_v11  ;;  %v1160_v20 = vunpack.c.2.s8 %v288_v7  ;;  %v1168_v21 = vunpack.c.3.s8 %v288_v7 }
  0x52   :  { %2993 = vmatpush.bf16.msrb.mxu2 %v2808_v13  ;;  %v1936_v23 = vcvt.s32.f32 %v912_v14  ;;  %v2056_v24 = vcvt.s32.f32 %v1032_v15  ;;  %v2064_v25 = vcvt.s32.f32 %v1040_v16  ;;  %v1288_v26 = vunpack.c.2.s8 %v5287_v12 }
  0x53   :  { %3006 = vmatpush.bf16.msrb.mxu3 %v2872_v18  ;;  %v2184_v28 = vcvt.s32.f32 %v1160_v20  ;;  %v2192_v29 = vcvt.s32.f32 %v1168_v21  ;;  %v1296_v30 = vunpack.c.3.s8 %v5287_v12  ;;  %v5293_v31 = vpack.c.bf16 %v80_v17, %v80_v17 }
  0x54   :  { %v2672_v32 = vpack.c.bf16 %v1936_v23, %v1928_v19  ;;  %v2736_v33 = vpack.c.bf16 %v2064_v25, %v2056_v24  ;;  %v2312_v34 = vcvt.s32.f32 %v1288_v26  ;;  %v5295_v35 = vpack.c.bf16 %v83_v22, %v83_v22  ;;  %v5306_v25 = vld [vmem:[#allocation5 + $0xc8] sm:$0xff] }
  0x55   :  { %v2800_v36 = vpack.c.bf16 %v2192_v29, %v2184_v28  ;;  %v2320_v37 = vcvt.s32.f32 %v1296_v30  ;;  %2920 = vmatmul.bf16.vlgmr.msra.gmra.mxu0 %v5293_v31  ;;  %v5298_v38 = vpack.c.bf16 %v81_v27, %v81_v27  ;;  %v888_v39 = vunpack.c.0.s8 %v5282_v61 }
  0x56   :  { %2968 = vmatpush.bf16.msrb.mxu0 %v2672_v32  ;;  %2981 = vmatpush.bf16.msrb.mxu1 %v2736_v33  ;;  %v896_v40 = vunpack.c.1.s8 %v5282_v61  ;;  %v1016_v41 = vunpack.c.0.s8 %v256_v2  ;;  %v1024_v42 = vunpack.c.1.s8 %v256_v2  ;;  %v1144_v43 = vunpack.c.0.s8 %v288_v7 }
  0x57   :  { %2994 = vmatpush.bf16.msrb.mxu2 %v2800_v36  ;;  %v2864_v45 = vpack.c.bf16 %v2320_v37, %v2312_v34  ;;  %2959 = vmatmul.bf16.vlgmr.msra.gmra.mxu3 %v5295_v35  ;;  %v1912_v46 = vcvt.s32.f32 %v888_v39  ;;  %v1152_v47 = vunpack.c.1.s8 %v288_v7  ;;  %v1272_v48 = vunpack.c.0.s8 %v5287_v12  ;;  %v145_v36 = vld [vmem:[#allocation5 + $0x1c8] sm:$0xff] }
  0x58   :  { %2933 = vmatmul.bf16.vlgmr.msra.gmra.mxu1 %v5298_v38  ;;  %v1920_v50 = vcvt.s32.f32 %v896_v40  ;;  %v2040_v51 = vcvt.s32.f32 %v1016_v41  ;;  %v2048_v52 = vcvt.s32.f32 %v1024_v42  ;;  %v2168_v53 = vcvt.s32.f32 %v1144_v43  ;;  %v177_v42 = vld [vmem:[#allocation5 + $0x2c8] sm:$0xff] }
  0x59   :  { %3007 = vmatpush.bf16.msrb.mxu3 %v2864_v45  ;;  %v2176_v54 = vcvt.s32.f32 %v1152_v47  ;;  %v1280_v55 = vunpack.c.1.s8 %v5287_v12  ;;  %v2296_v56 = vcvt.s32.f32 %v1272_v48  ;;  %v872_v57 = vunpack.c.2.s8 %v216_v44  ;;  %v209_v47 = vld [vmem:[#allocation5 + $0x3c8] sm:$0xff] }
  0x5a   :  { %v2664_v59 = vpack.c.bf16 %v1920_v50, %v1912_v46  ;;  %v2728_v60 = vpack.c.bf16 %v2048_v52, %v2040_v51  ;;  %v880_v61 = vunpack.c.3.s8 %v216_v44  ;;  %v1000_v62 = vunpack.c.2.s8 %v248_v49  ;;  %v86_v52 = vld [vmem:[#allocation2 + $0x30] sm:$0xff] }
  0x5b   :  { %v2792_v0 = vpack.c.bf16 %v2176_v54, %v2168_v53  ;;  %v2304_v1 = vcvt.s32.f32 %v1280_v55  ;;  %v1896_v2 = vcvt.s32.f32 %v872_v57  ;;  %v1008_v3 = vunpack.c.3.s8 %v248_v49  ;;  %v84_v57 = vld [vmem:[#allocation2 + $0x20] sm:$0xff] }
  0x5c   :  { %2969 = vmatpush.bf16.msrb.mxu0 %v2664_v59  ;;  %2982 = vmatpush.bf16.msrb.mxu1 %v2728_v60  ;;  %v1904_v4 = vcvt.s32.f32 %v880_v61  ;;  %v2024_v5 = vcvt.s32.f32 %v1000_v62  ;;  %v1128_v7 = vunpack.c.2.s8 %v280_v58  ;;  %v1136_v8 = vunpack.c.3.s8 %v280_v58  ;;  %v87_v62 = vld [vmem:[#allocation2 + $0x38] sm:$0xff] }
  0x5d   :  { %2995 = vmatpush.bf16.msrb.mxu2 %v2792_v0  ;;  %v2856_v9 = vpack.c.bf16 %v2304_v1, %v2296_v56  ;;  %v2032_v10 = vcvt.s32.f32 %v1008_v3  ;;  %v1256_v11 = vunpack.c.2.s8 %v312_v63  ;;  %v1264_v12 = vunpack.c.3.s8 %v312_v63 }
  0x5e   :  { %v2656_v13 = vpack.c.bf16 %v1904_v4, %v1896_v2  ;;  %v2152_v14 = vcvt.s32.f32 %v1128_v7  ;;  %v2160_v15 = vcvt.s32.f32 %v1136_v8  ;;  %v856_v16 = vunpack.c.0.s8 %v216_v44 }
  0x5f   :  { %3008 = vmatpush.bf16.msrb.mxu3 %v2856_v9  ;;  %v2720_v17 = vpack.c.bf16 %v2032_v10, %v2024_v5  ;;  %v2280_v18 = vcvt.s32.f32 %v1256_v11  ;;  %v2288_v19 = vcvt.s32.f32 %v1264_v12  ;;  %v864_v20 = vunpack.c.1.s8 %v216_v44 }
  0x60   :  { %2970 = vmatpush.bf16.msrb.mxu0 %v2656_v13  ;;  %v2784_v21 = vpack.c.bf16 %v2160_v15, %v2152_v14  ;;  %v1880_v22 = vcvt.s32.f32 %v856_v16  ;;  %v984_v23 = vunpack.c.0.s8 %v248_v49  ;;  %v992_v24 = vunpack.c.1.s8 %v248_v49  ;;  %v85_v16 = vld [vmem:[#allocation2 + $0x28] sm:$0xff] }
  0x61   :  { %2983 = vmatpush.bf16.msrb.mxu1 %v2720_v17  ;;  %v2848_v26 = vpack.c.bf16 %v2288_v19, %v2280_v18  ;;  %v1888_v27 = vcvt.s32.f32 %v864_v20  ;;  %v1112_v28 = vunpack.c.0.s8 %v280_v58  ;;  %v1120_v29 = vunpack.c.1.s8 %v280_v58 }
  0x62   :  { %2996 = vmatpush.bf16.msrb.mxu2 %v2784_v21  ;;  %v2008_v30 = vcvt.s32.f32 %v984_v23  ;;  %v2016_v32 = vcvt.s32.f32 %v992_v24  ;;  %v1240_v33 = vunpack.c.0.s8 %v312_v63  ;;  %v1248_v34 = vunpack.c.1.s8 %v312_v63  ;;  %v105_v21 = vld [vmem:[#allocation5 + $0x88] sm:$0xff] }
  0x63   :  { %3009 = vmatpush.bf16.msrb.mxu3 %v2848_v26  ;;  %v2648_v37 = vpack.c.bf16 %v1888_v27, %v1880_v22  ;;  %v2136_v39 = vcvt.s32.f32 %v1112_v28  ;;  %v2144_v40 = vcvt.s32.f32 %v1120_v29  ;;  %v457_v41 = vunpack.c.2.s8 %v5306_v25  ;;  %v137_v26 = vld [vmem:[#allocation5 + $0x188] sm:$0xff] }
  0x64   :  { %v2712_v43 = vpack.c.bf16 %v2016_v32, %v2008_v30  ;;  %v2264_v44 = vcvt.s32.f32 %v1240_v33  ;;  %v2272_v45 = vcvt.s32.f32 %v1248_v34  ;;  %v465_v46 = vunpack.c.3.s8 %v5306_v25  ;;  %v169_v27 = vld [vmem:[#allocation5 + $0x288] sm:$0xff] }
  0x65   :  { %2971 = vmatpush.bf16.msrb.mxu0 %v2648_v37  ;;  %v2776_v48 = vpack.c.bf16 %v2144_v40, %v2136_v39  ;;  %v1481_v49 = vcvt.s32.f32 %v457_v41  ;;  %v585_v50 = vunpack.c.2.s8 %v145_v36  ;;  %v593_v51 = vunpack.c.3.s8 %v145_v36  ;;  %v201_v39 = vld [vmem:[#allocation5 + $0x388] sm:$0xff] }
  0x66   :  { %2984 = vmatpush.bf16.msrb.mxu1 %v2712_v43  ;;  %v2840_v53 = vpack.c.bf16 %v2272_v45, %v2264_v44  ;;  %v1489_v54 = vcvt.s32.f32 %v465_v46  ;;  %v713_v55 = vunpack.c.2.s8 %v177_v42  ;;  %v721_v56 = vunpack.c.3.s8 %v177_v42 }
  0x67   :  { %2997 = vmatpush.bf16.msrb.mxu2 %v2776_v48  ;;  %v1609_v58 = vcvt.s32.f32 %v585_v50  ;;  %v1617_v59 = vcvt.s32.f32 %v593_v51  ;;  %v841_v60 = vunpack.c.2.s8 %v209_v47  ;;  %v849_v61 = vunpack.c.3.s8 %v209_v47 }
  0x68   :  { %3010 = vmatpush.bf16.msrb.mxu3 %v2840_v53  ;;  %v2449_v63 = vpack.c.bf16 %v1489_v54, %v1481_v49  ;;  %v1737_v0 = vcvt.s32.f32 %v713_v55  ;;  %v1745_v1 = vcvt.s32.f32 %v721_v56  ;;  %v5310_v2 = vpack.c.bf16 %v86_v52, %v86_v52 }
  0x69   :  { %v2513_v3 = vpack.c.bf16 %v1617_v59, %v1609_v58  ;;  %v1865_v4 = vcvt.s32.f32 %v841_v60  ;;  %v1873_v5 = vcvt.s32.f32 %v849_v61  ;;  %v5312_v7 = vpack.c.bf16 %v84_v57, %v84_v57 }
  0x6a   :  { %3016 = vmatpush.bf16.msra.mxu0 %v2449_v63  ;;  %v2577_v8 = vpack.c.bf16 %v1745_v1, %v1737_v0  ;;  %2998 = vmatmul.bf16.vlgmr.msrb.gmra.mxu2 %v5310_v2  ;;  %v5315_v9 = vpack.c.bf16 %v87_v62, %v87_v62  ;;  %v441_v10 = vunpack.c.0.s8 %v5306_v25  ;;  %v449_v11 = vunpack.c.1.s8 %v5306_v25  ;;  %v97_v0 = vld [vmem:[#allocation5 + $0x48] sm:$0xff] }
  0x6b   :  { %3029 = vmatpush.bf16.msra.mxu1 %v2513_v3  ;;  %v2641_v12 = vpack.c.bf16 %v1873_v5, %v1865_v4  ;;  %2972 = vmatmul.bf16.vlgmr.msrb.gmra.mxu0 %v5312_v7  ;;  %v569_v13 = vunpack.c.0.s8 %v145_v36  ;;  %v577_v14 = vunpack.c.1.s8 %v145_v36  ;;  %v697_v15 = vunpack.c.0.s8 %v177_v42 }
  0x6c   :  { %3042 = vmatpush.bf16.msra.mxu2 %v2577_v8  ;;  %3011 = vmatmul.bf16.vlgmr.msrb.gmra.mxu3 %v5315_v9  ;;  %v1465_v17 = vcvt.s32.f32 %v441_v10  ;;  %v1473_v18 = vcvt.s32.f32 %v449_v11  ;;  %v705_v19 = vunpack.c.1.s8 %v177_v42  ;;  %v825_v20 = vunpack.c.0.s8 %v209_v47 }
  0x6d   :  { %3055 = vmatpush.bf16.msra.mxu3 %v2641_v12  ;;  %v1593_v22 = vcvt.s32.f32 %v569_v13  ;;  %v1601_v23 = vcvt.s32.f32 %v577_v14  ;;  %v1721_v24 = vcvt.s32.f32 %v697_v15  ;;  %v833_v25 = vunpack.c.1.s8 %v209_v47  ;;  %v129_v13 = vld [vmem:[#allocation5 + $0x148] sm:$0xff] }
  0x6e   :  { %v2441_v28 = vpack.c.bf16 %v1473_v18, %v1465_v17  ;;  %v1729_v29 = vcvt.s32.f32 %v705_v19  ;;  %v1849_v30 = vcvt.s32.f32 %v825_v20  ;;  %v5321_v32 = vpack.c.bf16 %v85_v16, %v85_v16  ;;  %v161_v18 = vld [vmem:[#allocation5 + $0x248] sm:$0xff] }
  0x6f   :  { %v2505_v33 = vpack.c.bf16 %v1601_v23, %v1593_v22  ;;  %v1857_v34 = vcvt.s32.f32 %v833_v25  ;;  %v425_v36 = vunpack.c.2.s8 %v105_v21  ;;  %v433_v37 = vunpack.c.3.s8 %v105_v21  ;;  %v193_v23 = vld [vmem:[#allocation5 + $0x348] sm:$0xff] }
  0x70   :  { %3017 = vmatpush.bf16.msra.mxu0 %v2441_v28  ;;  %v2569_v40 = vpack.c.bf16 %v1729_v29, %v1721_v24  ;;  %2985 = vmatmul.bf16.vlgmr.msrb.gmra.mxu1 %v5321_v32  ;;  %v553_v41 = vunpack.c.2.s8 %v137_v26  ;;  %v561_v42 = vunpack.c.3.s8 %v137_v26  ;;  %v681_v43 = vunpack.c.2.s8 %v169_v27 }
  0x71   :  { %3030 = vmatpush.bf16.msra.mxu1 %v2505_v33  ;;  %v2633_v44 = vpack.c.bf16 %v1857_v34, %v1849_v30  ;;  %v1449_v45 = vcvt.s32.f32 %v425_v36  ;;  %v1457_v46 = vcvt.s32.f32 %v433_v37  ;;  %v689_v47 = vunpack.c.3.s8 %v169_v27 }
  0x72   :  { %3043 = vmatpush.bf16.msra.mxu2 %v2569_v40  ;;  %v1577_v48 = vcvt.s32.f32 %v553_v41  ;;  %v1585_v49 = vcvt.s32.f32 %v561_v42  ;;  %v1705_v50 = vcvt.s32.f32 %v681_v43  ;;  %v809_v51 = vunpack.c.2.s8 %v201_v39 }
  0x73   :  { %3056 = vmatpush.bf16.msra.mxu3 %v2633_v44  ;;  %v2433_v52 = vpack.c.bf16 %v1457_v46, %v1449_v45  ;;  %v1713_v53 = vcvt.s32.f32 %v689_v47  ;;  %v817_v54 = vunpack.c.3.s8 %v201_v39  ;;  %v409_v55 = vunpack.c.0.s8 %v105_v21 }
  0x74   :  { %v2497_v56 = vpack.c.bf16 %v1585_v49, %v1577_v48  ;;  %v1833_v57 = vcvt.s32.f32 %v809_v51  ;;  %v417_v58 = vunpack.c.1.s8 %v105_v21  ;;  %v537_v59 = vunpack.c.0.s8 %v137_v26 }
  0x75   :  { %3018 = vmatpush.bf16.msra.mxu0 %v2433_v52  ;;  %v2561_v60 = vpack.c.bf16 %v1713_v53, %v1705_v50  ;;  %v1841_v61 = vcvt.s32.f32 %v817_v54  ;;  %v1433_v62 = vcvt.s32.f32 %v409_v55  ;;  %v545_v63 = vunpack.c.1.s8 %v137_v26  ;;  %v89_v52 = vld [vmem:[#allocation5 + $0x8] sm:$0xff] }
  0x76   :  { %3031 = vmatpush.bf16.msra.mxu1 %v2497_v56  ;;  %v1441_v1 = vcvt.s32.f32 %v417_v58  ;;  %v1561_v3 = vcvt.s32.f32 %v537_v59  ;;  %v665_v4 = vunpack.c.0.s8 %v169_v27  ;;  %v673_v5 = vunpack.c.1.s8 %v169_v27 }
  0x77   :  { %3044 = vmatpush.bf16.msra.mxu2 %v2561_v60  ;;  %v2625_v8 = vpack.c.bf16 %v1841_v61, %v1833_v57  ;;  %v1569_v10 = vcvt.s32.f32 %v545_v63  ;;  %v793_v11 = vunpack.c.0.s8 %v201_v39  ;;  %v801_v12 = vunpack.c.1.s8 %v201_v39  ;;  %v121_v61 = vld [vmem:[#allocation5 + $0x108] sm:$0xff] }
  0x78   :  { %v2425_v14 = vpack.c.bf16 %v1441_v1, %v1433_v62  ;;  %v1689_v15 = vcvt.s32.f32 %v665_v4  ;;  %v1697_v16 = vcvt.s32.f32 %v673_v5  ;;  %v393_v17 = vunpack.c.2.s8 %v97_v0 }
  0x79   :  { %3057 = vmatpush.bf16.msra.mxu3 %v2625_v8  ;;  %v2489_v19 = vpack.c.bf16 %v1569_v10, %v1561_v3  ;;  %v1817_v20 = vcvt.s32.f32 %v793_v11  ;;  %v1825_v21 = vcvt.s32.f32 %v801_v12  ;;  %v401_v22 = vunpack.c.3.s8 %v97_v0  ;;  %v153_v3 = vld [vmem:[#allocation5 + $0x208] sm:$0xff] }
  0x7a   :  { %3019 = vmatpush.bf16.msra.mxu0 %v2425_v14  ;;  %v2553_v24 = vpack.c.bf16 %v1697_v16, %v1689_v15  ;;  %v1417_v25 = vcvt.s32.f32 %v393_v17  ;;  %v521_v26 = vunpack.c.2.s8 %v129_v13  ;;  %v529_v27 = vunpack.c.3.s8 %v129_v13  ;;  %v185_v11 = vld [vmem:[#allocation5 + $0x308] sm:$0xff] }
  0x7b   :  { %3032 = vmatpush.bf16.msra.mxu1 %v2489_v19  ;;  %v2617_v28 = vpack.c.bf16 %v1825_v21, %v1817_v20  ;;  %v1425_v29 = vcvt.s32.f32 %v401_v22  ;;  %v649_v30 = vunpack.c.2.s8 %v161_v18  ;;  %v657_v33 = vunpack.c.3.s8 %v161_v18 }
  0x7c   :  { %3045 = vmatpush.bf16.msra.mxu2 %v2553_v24  ;;  %v1545_v34 = vcvt.s32.f32 %v521_v26  ;;  %v1553_v36 = vcvt.s32.f32 %v529_v27  ;;  %v777_v37 = vunpack.c.2.s8 %v193_v23  ;;  %v785_v39 = vunpack.c.3.s8 %v193_v23 }
  0x7d   :  { %3058 = vmatpush.bf16.msra.mxu3 %v2617_v28  ;;  %v2417_v40 = vpack.c.bf16 %v1425_v29, %v1417_v25  ;;  %v1673_v41 = vcvt.s32.f32 %v649_v30  ;;  %v1681_v42 = vcvt.s32.f32 %v657_v33  ;;  %v377_v43 = vunpack.c.0.s8 %v97_v0 }
  0x7e   :  { %v2481_v44 = vpack.c.bf16 %v1553_v36, %v1545_v34  ;;  %v1801_v45 = vcvt.s32.f32 %v777_v37  ;;  %v1809_v46 = vcvt.s32.f32 %v785_v39  ;;  %v385_v47 = vunpack.c.1.s8 %v97_v0 }
  0x7f   :  { %3020 = vmatpush.bf16.msra.mxu0 %v2417_v40  ;;  %v2545_v48 = vpack.c.bf16 %v1681_v42, %v1673_v41  ;;  %v1401_v49 = vcvt.s32.f32 %v377_v43  ;;  %v505_v50 = vunpack.c.0.s8 %v129_v13  ;;  %v513_v51 = vunpack.c.1.s8 %v129_v13  ;;  %v241_v40 = vld [vmem:[#allocation5 + $0x4c8] sm:$0xff] }
  0x80   :  { %3033 = vmatpush.bf16.msra.mxu1 %v2481_v44  ;;  %v2609_v53 = vpack.c.bf16 %v1809_v46, %v1801_v45  ;;  %v1409_v54 = vcvt.s32.f32 %v385_v47  ;;  %v633_v55 = vunpack.c.0.s8 %v161_v18  ;;  %v641_v56 = vunpack.c.1.s8 %v161_v18 }
  0x81   :  { %3046 = vmatpush.bf16.msra.mxu2 %v2545_v48  ;;  %v1529_v57 = vcvt.s32.f32 %v505_v50  ;;  %v1537_v58 = vcvt.s32.f32 %v513_v51  ;;  %v761_v59 = vunpack.c.0.s8 %v193_v23  ;;  %v769_v60 = vunpack.c.1.s8 %v193_v23 }
  0x82   :  { %3059 = vmatpush.bf16.msra.mxu3 %v2609_v53  ;;  %v2409_v62 = vpack.c.bf16 %v1409_v54, %v1401_v49  ;;  %v1657_v63 = vcvt.s32.f32 %v633_v55  ;;  %v1665_v0 = vcvt.s32.f32 %v641_v56  ;;  %v361_v1 = vunpack.c.2.s8 %v89_v52  ;;  %v273_v49 = vld [vmem:[#allocation5 + $0x5c8] sm:$0xff] }
  0x83   :  { %v2473_v4 = vpack.c.bf16 %v1537_v58, %v1529_v57  ;;  %v1785_v5 = vcvt.s32.f32 %v761_v59  ;;  %v1793_v8 = vcvt.s32.f32 %v769_v60  ;;  %v369_v10 = vunpack.c.3.s8 %v89_v52  ;;  %v305_v54 = vld [vmem:[#allocation5 + $0x6c8] sm:$0xff] }
  0x84   :  { %3021 = vmatpush.bf16.msra.mxu0 %v2409_v62  ;;  %v2537_v12 = vpack.c.bf16 %v1665_v0, %v1657_v63  ;;  %v1385_v13 = vcvt.s32.f32 %v361_v1  ;;  %v489_v14 = vunpack.c.2.s8 %v121_v61  ;;  %v497_v15 = vunpack.c.3.s8 %v121_v61  ;;  %v337_v59 = vld [vmem:[#allocation5 + $0x7c8] sm:$0xff] }
  0x85   :  { %3034 = vmatpush.bf16.msra.mxu1 %v2473_v4  ;;  %v2601_v16 = vpack.c.bf16 %v1793_v8, %v1785_v5  ;;  %v1393_v17 = vcvt.s32.f32 %v369_v10  ;;  %v617_v18 = vunpack.c.2.s8 %v153_v3  ;;  %v625_v19 = vunpack.c.3.s8 %v153_v3 }
  0x86   :  { %3047 = vmatpush.bf16.msra.mxu2 %v2537_v12  ;;  %v1513_v20 = vcvt.s32.f32 %v489_v14  ;;  %v1521_v21 = vcvt.s32.f32 %v497_v15  ;;  %v745_v22 = vunpack.c.2.s8 %v185_v11  ;;  %v753_v23 = vunpack.c.3.s8 %v185_v11 }
  0x87   :  { %3060 = vmatpush.bf16.msra.mxu3 %v2601_v16  ;;  %v2401_v24 = vpack.c.bf16 %v1393_v17, %v1385_v13  ;;  %v1641_v25 = vcvt.s32.f32 %v617_v18  ;;  %v1649_v26 = vcvt.s32.f32 %v625_v19  ;;  %v345_v27 = vunpack.c.0.s8 %v89_v52 }
  0x88   :  { %v2465_v28 = vpack.c.bf16 %v1521_v21, %v1513_v20  ;;  %v1769_v29 = vcvt.s32.f32 %v745_v22  ;;  %v1777_v30 = vcvt.s32.f32 %v753_v23  ;;  %v353_v33 = vunpack.c.1.s8 %v89_v52 }
  0x89   :  { %3022 = vmatpush.bf16.msra.mxu0 %v2401_v24  ;;  %v2529_v34 = vpack.c.bf16 %v1649_v26, %v1641_v25  ;;  %v1369_v36 = vcvt.s32.f32 %v345_v27  ;;  %v473_v37 = vunpack.c.0.s8 %v121_v61  ;;  %v481_v39 = vunpack.c.1.s8 %v121_v61  ;;  %v233_v24 = vld [vmem:[#allocation5 + $0x488] sm:$0xff] }
  0x8a   :  { %3035 = vmatpush.bf16.msra.mxu1 %v2465_v28  ;;  %v2593_v41 = vpack.c.bf16 %v1777_v30, %v1769_v29  ;;  %v1377_v42 = vcvt.s32.f32 %v353_v33  ;;  %v601_v43 = vunpack.c.0.s8 %v153_v3  ;;  %v609_v44 = vunpack.c.1.s8 %v153_v3 }
  0x8b   :  { %3048 = vmatpush.bf16.msra.mxu2 %v2529_v34  ;;  %v1497_v45 = vcvt.s32.f32 %v473_v37  ;;  %v1505_v46 = vcvt.s32.f32 %v481_v39  ;;  %v729_v47 = vunpack.c.0.s8 %v185_v11  ;;  %v737_v48 = vunpack.c.1.s8 %v185_v11 }
  0x8c   :  { %3061 = vmatpush.bf16.msra.mxu3 %v2593_v41  ;;  %v2393_v50 = vpack.c.bf16 %v1377_v42, %v1369_v36  ;;  %v1625_v51 = vcvt.s32.f32 %v601_v43  ;;  %v1633_v52 = vcvt.s32.f32 %v609_v44  ;;  %v969_v53 = vunpack.c.2.s8 %v241_v40  ;;  %v265_v36 = vld [vmem:[#allocation5 + $0x588] sm:$0xff] }
  0x8d   :  { %v2457_v55 = vpack.c.bf16 %v1505_v46, %v1497_v45  ;;  %v1753_v56 = vcvt.s32.f32 %v729_v47  ;;  %v1761_v57 = vcvt.s32.f32 %v737_v48  ;;  %v977_v58 = vunpack.c.3.s8 %v241_v40  ;;  %v297_v42 = vld [vmem:[#allocation5 + $0x688] sm:$0xff] }
  0x8e   :  { %3023 = vmatpush.bf16.msra.mxu0 %v2393_v50  ;;  %v2521_v60 = vpack.c.bf16 %v1633_v52, %v1625_v51  ;;  %v1993_v61 = vcvt.s32.f32 %v969_v53  ;;  %v1097_v62 = vunpack.c.2.s8 %v273_v49  ;;  %v1105_v63 = vunpack.c.3.s8 %v273_v49  ;;  %v329_v47 = vld [vmem:[#allocation5 + $0x788] sm:$0xff] }
  0x8f   :  { %3036 = vmatpush.bf16.msra.mxu1 %v2457_v55  ;;  %v2585_v0 = vpack.c.bf16 %v1761_v57, %v1753_v56  ;;  %v2001_v1 = vcvt.s32.f32 %v977_v58  ;;  %v1225_v3 = vunpack.c.2.s8 %v305_v54  ;;  %v1233_v4 = vunpack.c.3.s8 %v305_v54 }
  0x90   :  { %3049 = vmatpush.bf16.msra.mxu2 %v2521_v60  ;;  %v2121_v5 = vcvt.s32.f32 %v1097_v62  ;;  %v2129_v8 = vcvt.s32.f32 %v1105_v63  ;;  %v1353_v10 = vunpack.c.2.s8 %v337_v59  ;;  %v1361_v11 = vunpack.c.3.s8 %v337_v59 }
  0x91   :  { %3062 = vmatpush.bf16.msra.mxu3 %v2585_v0  ;;  %v2705_v12 = vpack.c.bf16 %v2001_v1, %v1993_v61  ;;  %v2249_v13 = vcvt.s32.f32 %v1225_v3  ;;  %v2257_v14 = vcvt.s32.f32 %v1233_v4  ;;  %v953_v15 = vunpack.c.0.s8 %v241_v40  ;;  %3024 = vmatmul.bf16.vlgmr.msra.gmra.mxu0 %v5293_v31 }
  0x92   :  { %v2769_v16 = vpack.c.bf16 %v2129_v8, %v2121_v5  ;;  %v2377_v17 = vcvt.s32.f32 %v1353_v10  ;;  %v2385_v18 = vcvt.s32.f32 %v1361_v11  ;;  %v961_v19 = vunpack.c.1.s8 %v241_v40  ;;  %3037 = vmatmul.bf16.vlgmr.msra.gmra.mxu1 %v5298_v38 }
  0x93   :  { %3068 = vmatpush.bf16.msrb.mxu0 %v2705_v12  ;;  %v2833_v20 = vpack.c.bf16 %v2257_v14, %v2249_v13  ;;  %v1977_v21 = vcvt.s32.f32 %v953_v15  ;;  %v1081_v22 = vunpack.c.0.s8 %v273_v49  ;;  %v1089_v23 = vunpack.c.1.s8 %v273_v49  ;;  %3050 = vmatmul.bf16.vlgmr.msra.gmra.mxu2 %v5284_v6  ;;  %v225_v12 = vld [vmem:[#allocation5 + $0x448] sm:$0xff] }
  0x94   :  { %3081 = vmatpush.bf16.msrb.mxu1 %v2769_v16  ;;  %v2897_v25 = vpack.c.bf16 %v2385_v18, %v2377_v17  ;;  %v1985_v26 = vcvt.s32.f32 %v961_v19  ;;  %v1209_v27 = vunpack.c.0.s8 %v305_v54  ;;  %v1217_v28 = vunpack.c.1.s8 %v305_v54  ;;  %3063 = vmatmul.bf16.vlgmr.msra.gmra.mxu3 %v5295_v35 }
  0x95   :  { %3094 = vmatpush.bf16.msrb.mxu2 %v2833_v20  ;;  %v2105_v29 = vcvt.s32.f32 %v1081_v22  ;;  %v2113_v30 = vcvt.s32.f32 %v1089_v23  ;;  %v1337_v33 = vunpack.c.0.s8 %v337_v59  ;;  %v1345_v34 = vunpack.c.1.s8 %v337_v59 }
  0x96   :  { %3107 = vmatpush.bf16.msrb.mxu3 %v2897_v25  ;;  %v2697_v37 = vpack.c.bf16 %v1985_v26, %v1977_v21  ;;  %v2233_v39 = vcvt.s32.f32 %v1209_v27  ;;  %v2241_v40 = vcvt.s32.f32 %v1217_v28  ;;  %v937_v41 = vunpack.c.2.s8 %v233_v24  ;;  %v257_v21 = vld [vmem:[#allocation5 + $0x548] sm:$0xff] }
  0x97   :  { %v2761_v43 = vpack.c.bf16 %v2113_v30, %v2105_v29  ;;  %v2361_v44 = vcvt.s32.f32 %v1337_v33  ;;  %v2369_v45 = vcvt.s32.f32 %v1345_v34  ;;  %v945_v46 = vunpack.c.3.s8 %v233_v24  ;;  %v289_v26 = vld [vmem:[#allocation5 + $0x648] sm:$0xff] }
  0x98   :  { %3069 = vmatpush.bf16.msrb.mxu0 %v2697_v37  ;;  %v2825_v48 = vpack.c.bf16 %v2241_v40, %v2233_v39  ;;  %v1961_v49 = vcvt.s32.f32 %v937_v41  ;;  %v1065_v50 = vunpack.c.2.s8 %v265_v36  ;;  %v1073_v51 = vunpack.c.3.s8 %v265_v36  ;;  %v321_v33 = vld [vmem:[#allocation5 + $0x748] sm:$0xff] }
  0x99   :  { %3082 = vmatpush.bf16.msrb.mxu1 %v2761_v43  ;;  %v2889_v52 = vpack.c.bf16 %v2369_v45, %v2361_v44  ;;  %v1969_v53 = vcvt.s32.f32 %v945_v46  ;;  %v1193_v54 = vunpack.c.2.s8 %v297_v42  ;;  %v1201_v55 = vunpack.c.3.s8 %v297_v42 }
  0x9a   :  { %3095 = vmatpush.bf16.msrb.mxu2 %v2825_v48  ;;  %v2089_v56 = vcvt.s32.f32 %v1065_v50  ;;  %v2097_v57 = vcvt.s32.f32 %v1073_v51  ;;  %v1321_v58 = vunpack.c.2.s8 %v329_v47  ;;  %v1329_v59 = vunpack.c.3.s8 %v329_v47 }
  0x9b   :  { %3108 = vmatpush.bf16.msrb.mxu3 %v2889_v52  ;;  %v2689_v60 = vpack.c.bf16 %v1969_v53, %v1961_v49  ;;  %v2217_v61 = vcvt.s32.f32 %v1193_v54  ;;  %v2225_v62 = vcvt.s32.f32 %v1201_v55  ;;  %v921_v63 = vunpack.c.0.s8 %v233_v24 }
  0x9c   :  { %v2753_v0 = vpack.c.bf16 %v2097_v57, %v2089_v56  ;;  %v2345_v1 = vcvt.s32.f32 %v1321_v58  ;;  %v2353_v3 = vcvt.s32.f32 %v1329_v59  ;;  %v929_v4 = vunpack.c.1.s8 %v233_v24 }
  0x9d   :  { %3070 = vmatpush.bf16.msrb.mxu0 %v2689_v60  ;;  %v2817_v5 = vpack.c.bf16 %v2225_v62, %v2217_v61  ;;  %v1945_v8 = vcvt.s32.f32 %v921_v63  ;;  %v1049_v10 = vunpack.c.0.s8 %v265_v36  ;;  %v1057_v11 = vunpack.c.1.s8 %v265_v36  ;;  %v217_v60 = vld [vmem:[#allocation5 + $0x408] sm:$0xff] }
  0x9e   :  { %3083 = vmatpush.bf16.msrb.mxu1 %v2753_v0  ;;  %v2881_v13 = vpack.c.bf16 %v2353_v3, %v2345_v1  ;;  %v1953_v14 = vcvt.s32.f32 %v929_v4  ;;  %v1177_v15 = vunpack.c.0.s8 %v297_v42  ;;  %v1185_v16 = vunpack.c.1.s8 %v297_v42 }
  0x9f   :  { %3096 = vmatpush.bf16.msrb.mxu2 %v2817_v5  ;;  %v2073_v17 = vcvt.s32.f32 %v1049_v10  ;;  %v2081_v18 = vcvt.s32.f32 %v1057_v11  ;;  %v1305_v19 = vunpack.c.0.s8 %v329_v47  ;;  %v1313_v20 = vunpack.c.1.s8 %v329_v47 }
  0xa0   :  { %3109 = vmatpush.bf16.msrb.mxu3 %v2881_v13  ;;  %v2681_v22 = vpack.c.bf16 %v1953_v14, %v1945_v8  ;;  %v2201_v23 = vcvt.s32.f32 %v1177_v15  ;;  %v2209_v24 = vcvt.s32.f32 %v1185_v16  ;;  %v905_v25 = vunpack.c.2.s8 %v225_v12  ;;  %v249_v8 = vld [vmem:[#allocation5 + $0x508] sm:$0xff] }
  0xa1   :  { %v2745_v27 = vpack.c.bf16 %v2081_v18, %v2073_v17  ;;  %v2329_v28 = vcvt.s32.f32 %v1305_v19  ;;  %v2337_v29 = vcvt.s32.f32 %v1313_v20  ;;  %v913_v30 = vunpack.c.3.s8 %v225_v12  ;;  %v281_v14 = vld [vmem:[#allocation5 + $0x608] sm:$0xff] }
  0xa2   :  { %3071 = vmatpush.bf16.msrb.mxu0 %v2681_v22  ;;  %v2809_v34 = vpack.c.bf16 %v2209_v24, %v2201_v23  ;;  %v1929_v36 = vcvt.s32.f32 %v905_v25  ;;  %v1033_v37 = vunpack.c.2.s8 %v257_v21  ;;  %v1041_v39 = vunpack.c.3.s8 %v257_v21  ;;  %v313_v19 = vld [vmem:[#allocation5 + $0x708] sm:$0xff] }
  0xa3   :  { %3084 = vmatpush.bf16.msrb.mxu1 %v2745_v27  ;;  %v2873_v40 = vpack.c.bf16 %v2337_v29, %v2329_v28  ;;  %v1937_v41 = vcvt.s32.f32 %v913_v30  ;;  %v1161_v42 = vunpack.c.2.s8 %v289_v26  ;;  %v1169_v43 = vunpack.c.3.s8 %v289_v26 }
  0xa4   :  { %3097 = vmatpush.bf16.msrb.mxu2 %v2809_v34  ;;  %v2057_v44 = vcvt.s32.f32 %v1033_v37  ;;  %v2065_v45 = vcvt.s32.f32 %v1041_v39  ;;  %v1289_v46 = vunpack.c.2.s8 %v321_v33  ;;  %v1297_v47 = vunpack.c.3.s8 %v321_v33 }
  0xa5   :  { %3110 = vmatpush.bf16.msrb.mxu3 %v2873_v40  ;;  %v2673_v48 = vpack.c.bf16 %v1937_v41, %v1929_v36  ;;  %v2185_v49 = vcvt.s32.f32 %v1161_v42  ;;  %v2193_v50 = vcvt.s32.f32 %v1169_v43  ;;  %v889_v51 = vunpack.c.0.s8 %v225_v12 }
  0xa6   :  { %v2737_v52 = vpack.c.bf16 %v2065_v45, %v2057_v44  ;;  %v2313_v53 = vcvt.s32.f32 %v1289_v46  ;;  %v2321_v54 = vcvt.s32.f32 %v1297_v47  ;;  %v897_v55 = vunpack.c.1.s8 %v225_v12 }
  0xa7   :  { %3072 = vmatpush.bf16.msrb.mxu0 %v2673_v48  ;;  %v2801_v56 = vpack.c.bf16 %v2193_v50, %v2185_v49  ;;  %v1913_v57 = vcvt.s32.f32 %v889_v51  ;;  %v1017_v58 = vunpack.c.0.s8 %v257_v21  ;;  %v1025_v59 = vunpack.c.1.s8 %v257_v21  ;;  %v114_v48 = vld [vmem:[#allocation5 + $0xd0] sm:$0xff] }
  0xa8   :  { %3085 = vmatpush.bf16.msrb.mxu1 %v2737_v52  ;;  %v2865_v61 = vpack.c.bf16 %v2321_v54, %v2313_v53  ;;  %v1921_v62 = vcvt.s32.f32 %v897_v55  ;;  %v1145_v63 = vunpack.c.0.s8 %v289_v26  ;;  %v1153_v0 = vunpack.c.1.s8 %v289_v26 }
  0xa9   :  { %3098 = vmatpush.bf16.msrb.mxu2 %v2801_v56  ;;  %v2041_v1 = vcvt.s32.f32 %v1017_v58  ;;  %v2049_v3 = vcvt.s32.f32 %v1025_v59  ;;  %v1273_v4 = vunpack.c.0.s8 %v321_v33  ;;  %v1281_v5 = vunpack.c.1.s8 %v321_v33 }
  0xaa   :  { %3111 = vmatpush.bf16.msrb.mxu3 %v2865_v61  ;;  %v2665_v10 = vpack.c.bf16 %v1921_v62, %v1913_v57  ;;  %v2169_v11 = vcvt.s32.f32 %v1145_v63  ;;  %v2177_v12 = vcvt.s32.f32 %v1153_v0  ;;  %v873_v13 = vunpack.c.2.s8 %v217_v60  ;;  %v146_v57 = vld [vmem:[#allocation5 + $0x1d0] sm:$0xff] }
  0xab   :  { %v2729_v15 = vpack.c.bf16 %v2049_v3, %v2041_v1  ;;  %v2297_v16 = vcvt.s32.f32 %v1273_v4  ;;  %v2305_v17 = vcvt.s32.f32 %v1281_v5  ;;  %v881_v18 = vunpack.c.3.s8 %v217_v60  ;;  %v178_v62 = vld [vmem:[#allocation5 + $0x2d0] sm:$0xff] }
  0xac   :  { %3073 = vmatpush.bf16.msrb.mxu0 %v2665_v10  ;;  %v2793_v20 = vpack.c.bf16 %v2177_v12, %v2169_v11  ;;  %v1897_v21 = vcvt.s32.f32 %v873_v13  ;;  %v1001_v22 = vunpack.c.2.s8 %v249_v8  ;;  %v1009_v23 = vunpack.c.3.s8 %v249_v8  ;;  %v210_v4 = vld [vmem:[#allocation5 + $0x3d0] sm:$0xff] }
  0xad   :  { %3086 = vmatpush.bf16.msrb.mxu1 %v2729_v15  ;;  %v2857_v24 = vpack.c.bf16 %v2305_v17, %v2297_v16  ;;  %v1905_v25 = vcvt.s32.f32 %v881_v18  ;;  %v1129_v26 = vunpack.c.2.s8 %v281_v14  ;;  %v1137_v27 = vunpack.c.3.s8 %v281_v14 }
  0xae   :  { %3099 = vmatpush.bf16.msrb.mxu2 %v2793_v20  ;;  %v2025_v28 = vcvt.s32.f32 %v1001_v22  ;;  %v2033_v29 = vcvt.s32.f32 %v1009_v23  ;;  %v1257_v30 = vunpack.c.2.s8 %v313_v19  ;;  %v1265_v33 = vunpack.c.3.s8 %v313_v19 }
  0xaf   :  { %3112 = vmatpush.bf16.msrb.mxu3 %v2857_v24  ;;  %v2657_v34 = vpack.c.bf16 %v1905_v25, %v1897_v21  ;;  %v2153_v36 = vcvt.s32.f32 %v1129_v26  ;;  %v2161_v37 = vcvt.s32.f32 %v1137_v27  ;;  %v857_v39 = vunpack.c.0.s8 %v217_v60 }
  0xb0   :  { %v2721_v40 = vpack.c.bf16 %v2033_v29, %v2025_v28  ;;  %v2281_v41 = vcvt.s32.f32 %v1257_v30  ;;  %v2289_v42 = vcvt.s32.f32 %v1265_v33  ;;  %v865_v43 = vunpack.c.1.s8 %v217_v60 }
  0xb1   :  { %3074 = vmatpush.bf16.msrb.mxu0 %v2657_v34  ;;  %v2785_v44 = vpack.c.bf16 %v2161_v37, %v2153_v36  ;;  %v1881_v45 = vcvt.s32.f32 %v857_v39  ;;  %v985_v46 = vunpack.c.0.s8 %v249_v8  ;;  %v993_v47 = vunpack.c.1.s8 %v249_v8  ;;  %v106_v34 = vld [vmem:[#allocation5 + $0x90] sm:$0xff] }
  0xb2   :  { %3087 = vmatpush.bf16.msrb.mxu1 %v2721_v40  ;;  %v2849_v49 = vpack.c.bf16 %v2289_v42, %v2281_v41  ;;  %v1889_v50 = vcvt.s32.f32 %v865_v43  ;;  %v1113_v51 = vunpack.c.0.s8 %v281_v14  ;;  %v1121_v52 = vunpack.c.1.s8 %v281_v14 }
  0xb3   :  { %3100 = vmatpush.bf16.msrb.mxu2 %v2785_v44  ;;  %v2009_v53 = vcvt.s32.f32 %v985_v46  ;;  %v2017_v54 = vcvt.s32.f32 %v993_v47  ;;  %v1241_v55 = vunpack.c.0.s8 %v313_v19  ;;  %v1249_v56 = vunpack.c.1.s8 %v313_v19 }
  0xb4   :  { %3113 = vmatpush.bf16.msrb.mxu3 %v2849_v49  ;;  %v2649_v58 = vpack.c.bf16 %v1889_v50, %v1881_v45  ;;  %v2137_v59 = vcvt.s32.f32 %v1113_v51  ;;  %v2145_v60 = vcvt.s32.f32 %v1121_v52  ;;  %v458_v61 = vunpack.c.2.s8 %v114_v48  ;;  %v138_v45 = vld [vmem:[#allocation5 + $0x190] sm:$0xff] }
  0xb5   :  { %v2713_v63 = vpack.c.bf16 %v2017_v54, %v2009_v53  ;;  %v2265_v0 = vcvt.s32.f32 %v1241_v55  ;;  %v2273_v1 = vcvt.s32.f32 %v1249_v56  ;;  %v466_v3 = vunpack.c.3.s8 %v114_v48  ;;  %v170_v50 = vld [vmem:[#allocation5 + $0x290] sm:$0xff] }
  0xb6   :  { %3075 = vmatpush.bf16.msrb.mxu0 %v2649_v58  ;;  %v2777_v5 = vpack.c.bf16 %v2145_v60, %v2137_v59  ;;  %v1482_v8 = vcvt.s32.f32 %v458_v61  ;;  %v586_v10 = vunpack.c.2.s8 %v146_v57  ;;  %v594_v11 = vunpack.c.3.s8 %v146_v57  ;;  %v202_v55 = vld [vmem:[#allocation5 + $0x390] sm:$0xff] }
  0xb7   :  { %3088 = vmatpush.bf16.msrb.mxu1 %v2713_v63  ;;  %v2841_v12 = vpack.c.bf16 %v2273_v1, %v2265_v0  ;;  %v1490_v13 = vcvt.s32.f32 %v466_v3  ;;  %v714_v14 = vunpack.c.2.s8 %v178_v62  ;;  %v722_v15 = vunpack.c.3.s8 %v178_v62 }
  0xb8   :  { %3101 = vmatpush.bf16.msrb.mxu2 %v2777_v5  ;;  %v1610_v16 = vcvt.s32.f32 %v586_v10  ;;  %v1618_v17 = vcvt.s32.f32 %v594_v11  ;;  %v842_v18 = vunpack.c.2.s8 %v210_v4  ;;  %v850_v19 = vunpack.c.3.s8 %v210_v4 }
  0xb9   :  { %3114 = vmatpush.bf16.msrb.mxu3 %v2841_v12  ;;  %v2450_v20 = vpack.c.bf16 %v1490_v13, %v1482_v8  ;;  %v1738_v21 = vcvt.s32.f32 %v714_v14  ;;  %v1746_v22 = vcvt.s32.f32 %v722_v15  ;;  %3076 = vmatmul.bf16.vlgmr.msrb.gmra.mxu0 %v5312_v7  ;;  %v442_v23 = vunpack.c.0.s8 %v114_v48 }
  0xba   :  { %v2514_v24 = vpack.c.bf16 %v1618_v17, %v1610_v16  ;;  %v1866_v25 = vcvt.s32.f32 %v842_v18  ;;  %v1874_v26 = vcvt.s32.f32 %v850_v19  ;;  %v450_v27 = vunpack.c.1.s8 %v114_v48  ;;  %3089 = vmatmul.bf16.vlgmr.msrb.gmra.mxu1 %v5321_v32 }
  0xbb   :  { %3120 = vmatpush.bf16.msra.mxu0 %v2450_v20  ;;  %v2578_v28 = vpack.c.bf16 %v1746_v22, %v1738_v21  ;;  %3102 = vmatmul.bf16.vlgmr.msrb.gmra.mxu2 %v5310_v2  ;;  %v1466_v29 = vcvt.s32.f32 %v442_v23  ;;  %v570_v30 = vunpack.c.0.s8 %v146_v57  ;;  %v578_v33 = vunpack.c.1.s8 %v146_v57  ;;  %v98_v20 = vld [vmem:[#allocation5 + $0x50] sm:$0xff] }
  0xbc   :  { %3133 = vmatpush.bf16.msra.mxu1 %v2514_v24  ;;  %v2642_v36 = vpack.c.bf16 %v1874_v26, %v1866_v25  ;;  %3115 = vmatmul.bf16.vlgmr.msrb.gmra.mxu3 %v5315_v9  ;;  %v1474_v37 = vcvt.s32.f32 %v450_v27  ;;  %v698_v39 = vunpack.c.0.s8 %v178_v62  ;;  %v706_v40 = vunpack.c.1.s8 %v178_v62 }
  0xbd   :  { %3146 = vmatpush.bf16.msra.mxu2 %v2578_v28  ;;  %v1594_v41 = vcvt.s32.f32 %v570_v30  ;;  %v1602_v42 = vcvt.s32.f32 %v578_v33  ;;  %v826_v43 = vunpack.c.0.s8 %v210_v4  ;;  %v834_v44 = vunpack.c.1.s8 %v210_v4 }
  0xbe   :  { %3159 = vmatpush.bf16.msra.mxu3 %v2642_v36  ;;  %v2442_v46 = vpack.c.bf16 %v1474_v37, %v1466_v29  ;;  %v1722_v47 = vcvt.s32.f32 %v698_v39  ;;  %v1730_v48 = vcvt.s32.f32 %v706_v40  ;;  %v426_v49 = vunpack.c.2.s8 %v106_v34  ;;  %v130_v29 = vld [vmem:[#allocation5 + $0x150] sm:$0xff] }
  0xbf   :  { %v2506_v51 = vpack.c.bf16 %v1602_v42, %v1594_v41  ;;  %v1850_v52 = vcvt.s32.f32 %v826_v43  ;;  %v1858_v53 = vcvt.s32.f32 %v834_v44  ;;  %v434_v54 = vunpack.c.3.s8 %v106_v34  ;;  %v162_v37 = vld [vmem:[#allocation5 + $0x250] sm:$0xff] }
  0xc0   :  { %3121 = vmatpush.bf16.msra.mxu0 %v2442_v46  ;;  %v2570_v56 = vpack.c.bf16 %v1730_v48, %v1722_v47  ;;  %v1450_v57 = vcvt.s32.f32 %v426_v49  ;;  %v554_v58 = vunpack.c.2.s8 %v138_v45  ;;  %v562_v59 = vunpack.c.3.s8 %v138_v45  ;;  %v194_v43 = vld [vmem:[#allocation5 + $0x350] sm:$0xff] }
  0xc1   :  { %3134 = vmatpush.bf16.msra.mxu1 %v2506_v51  ;;  %v2634_v60 = vpack.c.bf16 %v1858_v53, %v1850_v52  ;;  %v1458_v61 = vcvt.s32.f32 %v434_v54  ;;  %v682_v62 = vunpack.c.2.s8 %v170_v50  ;;  %v690_v63 = vunpack.c.3.s8 %v170_v50 }
  0xc2   :  { %3147 = vmatpush.bf16.msra.mxu2 %v2570_v56  ;;  %v1578_v0 = vcvt.s32.f32 %v554_v58  ;;  %v1586_v1 = vcvt.s32.f32 %v562_v59  ;;  %v810_v3 = vunpack.c.2.s8 %v202_v55  ;;  %v818_v4 = vunpack.c.3.s8 %v202_v55 }
  0xc3   :  { %3160 = vmatpush.bf16.msra.mxu3 %v2634_v60  ;;  %v2434_v5 = vpack.c.bf16 %v1458_v61, %v1450_v57  ;;  %v1706_v8 = vcvt.s32.f32 %v682_v62  ;;  %v1714_v10 = vcvt.s32.f32 %v690_v63  ;;  %v410_v11 = vunpack.c.0.s8 %v106_v34 }
  0xc4   :  { %v2498_v12 = vpack.c.bf16 %v1586_v1, %v1578_v0  ;;  %v1834_v13 = vcvt.s32.f32 %v810_v3  ;;  %v1842_v14 = vcvt.s32.f32 %v818_v4  ;;  %v418_v15 = vunpack.c.1.s8 %v106_v34 }
  0xc5   :  { %3122 = vmatpush.bf16.msra.mxu0 %v2434_v5  ;;  %v2562_v16 = vpack.c.bf16 %v1714_v10, %v1706_v8  ;;  %v1434_v17 = vcvt.s32.f32 %v410_v11  ;;  %v538_v18 = vunpack.c.0.s8 %v138_v45  ;;  %v546_v19 = vunpack.c.1.s8 %v138_v45  ;;  %v90_v5 = vld [vmem:[#allocation5 + $0x10] sm:$0xff] }
  0xc6   :  { %3135 = vmatpush.bf16.msra.mxu1 %v2498_v12  ;;  %v2626_v21 = vpack.c.bf16 %v1842_v14, %v1834_v13  ;;  %v1442_v22 = vcvt.s32.f32 %v418_v15  ;;  %v666_v23 = vunpack.c.0.s8 %v170_v50  ;;  %v674_v24 = vunpack.c.1.s8 %v170_v50 }
  0xc7   :  { %3148 = vmatpush.bf16.msra.mxu2 %v2562_v16  ;;  %v1562_v25 = vcvt.s32.f32 %v538_v18  ;;  %v1570_v26 = vcvt.s32.f32 %v546_v19  ;;  %v794_v27 = vunpack.c.0.s8 %v202_v55  ;;  %v802_v28 = vunpack.c.1.s8 %v202_v55 }
  0xc8   :  { %3161 = vmatpush.bf16.msra.mxu3 %v2626_v21  ;;  %v2426_v30 = vpack.c.bf16 %v1442_v22, %v1434_v17  ;;  %v1690_v33 = vcvt.s32.f32 %v666_v23  ;;  %v1698_v34 = vcvt.s32.f32 %v674_v24  ;;  %v394_v36 = vunpack.c.2.s8 %v98_v20  ;;  %v122_v17 = vld [vmem:[#allocation5 + $0x110] sm:$0xff] }
  0xc9   :  { %v2490_v39 = vpack.c.bf16 %v1570_v26, %v1562_v25  ;;  %v1818_v40 = vcvt.s32.f32 %v794_v27  ;;  %v1826_v41 = vcvt.s32.f32 %v802_v28  ;;  %v402_v42 = vunpack.c.3.s8 %v98_v20  ;;  %v154_v22 = vld [vmem:[#allocation5 + $0x210] sm:$0xff] }
  0xca   :  { %3123 = vmatpush.bf16.msra.mxu0 %v2426_v30  ;;  %v2554_v44 = vpack.c.bf16 %v1698_v34, %v1690_v33  ;;  %v1418_v45 = vcvt.s32.f32 %v394_v36  ;;  %v522_v46 = vunpack.c.2.s8 %v130_v29  ;;  %v530_v47 = vunpack.c.3.s8 %v130_v29  ;;  %v186_v27 = vld [vmem:[#allocation5 + $0x310] sm:$0xff] }
  0xcb   :  { %3136 = vmatpush.bf16.msra.mxu1 %v2490_v39  ;;  %v2618_v48 = vpack.c.bf16 %v1826_v41, %v1818_v40  ;;  %v1426_v49 = vcvt.s32.f32 %v402_v42  ;;  %v650_v50 = vunpack.c.2.s8 %v162_v37  ;;  %v658_v51 = vunpack.c.3.s8 %v162_v37 }
  0xcc   :  { %3149 = vmatpush.bf16.msra.mxu2 %v2554_v44  ;;  %v1546_v52 = vcvt.s32.f32 %v522_v46  ;;  %v1554_v53 = vcvt.s32.f32 %v530_v47  ;;  %v778_v54 = vunpack.c.2.s8 %v194_v43  ;;  %v786_v55 = vunpack.c.3.s8 %v194_v43 }
  0xcd   :  { %3162 = vmatpush.bf16.msra.mxu3 %v2618_v48  ;;  %v2418_v56 = vpack.c.bf16 %v1426_v49, %v1418_v45  ;;  %v1674_v57 = vcvt.s32.f32 %v650_v50  ;;  %v1682_v58 = vcvt.s32.f32 %v658_v51  ;;  %v378_v59 = vunpack.c.0.s8 %v98_v20 }
  0xce   :  { %v2482_v60 = vpack.c.bf16 %v1554_v53, %v1546_v52  ;;  %v1802_v61 = vcvt.s32.f32 %v778_v54  ;;  %v1810_v62 = vcvt.s32.f32 %v786_v55  ;;  %v386_v63 = vunpack.c.1.s8 %v98_v20 }
  0xcf   :  { %3124 = vmatpush.bf16.msra.mxu0 %v2418_v56  ;;  %v2546_v0 = vpack.c.bf16 %v1682_v58, %v1674_v57  ;;  %v1402_v1 = vcvt.s32.f32 %v378_v59  ;;  %v506_v3 = vunpack.c.0.s8 %v130_v29  ;;  %v514_v4 = vunpack.c.1.s8 %v130_v29  ;;  %v242_v56 = vld [vmem:[#allocation5 + $0x4d0] sm:$0xff] }
  0xd0   :  { %3137 = vmatpush.bf16.msra.mxu1 %v2482_v60  ;;  %v2610_v8 = vpack.c.bf16 %v1810_v62, %v1802_v61  ;;  %v1410_v10 = vcvt.s32.f32 %v386_v63  ;;  %v634_v11 = vunpack.c.0.s8 %v162_v37  ;;  %v642_v12 = vunpack.c.1.s8 %v162_v37 }
  0xd1   :  { %3150 = vmatpush.bf16.msra.mxu2 %v2546_v0  ;;  %v1530_v13 = vcvt.s32.f32 %v506_v3  ;;  %v1538_v14 = vcvt.s32.f32 %v514_v4  ;;  %v762_v15 = vunpack.c.0.s8 %v194_v43  ;;  %v770_v16 = vunpack.c.1.s8 %v194_v43 }
  0xd2   :  { %3163 = vmatpush.bf16.msra.mxu3 %v2610_v8  ;;  %v2410_v18 = vpack.c.bf16 %v1410_v10, %v1402_v1  ;;  %v1658_v19 = vcvt.s32.f32 %v634_v11  ;;  %v1666_v20 = vcvt.s32.f32 %v642_v12  ;;  %v362_v21 = vunpack.c.2.s8 %v90_v5  ;;  %v274_v1 = vld [vmem:[#allocation5 + $0x5d0] sm:$0xff] }
  0xd3   :  { %v2474_v23 = vpack.c.bf16 %v1538_v14, %v1530_v13  ;;  %v1786_v24 = vcvt.s32.f32 %v762_v15  ;;  %v1794_v25 = vcvt.s32.f32 %v770_v16  ;;  %v370_v26 = vunpack.c.3.s8 %v90_v5  ;;  %v306_v10 = vld [vmem:[#allocation5 + $0x6d0] sm:$0xff] }
  0xd4   :  { %3125 = vmatpush.bf16.msra.mxu0 %v2410_v18  ;;  %v2538_v28 = vpack.c.bf16 %v1666_v20, %v1658_v19  ;;  %v1386_v29 = vcvt.s32.f32 %v362_v21  ;;  %v490_v30 = vunpack.c.2.s8 %v122_v17  ;;  %v498_v33 = vunpack.c.3.s8 %v122_v17  ;;  %v338_v15 = vld [vmem:[#allocation5 + $0x7d0] sm:$0xff] }
  0xd5   :  { %3138 = vmatpush.bf16.msra.mxu1 %v2474_v23  ;;  %v2602_v34 = vpack.c.bf16 %v1794_v25, %v1786_v24  ;;  %v1394_v36 = vcvt.s32.f32 %v370_v26  ;;  %v618_v37 = vunpack.c.2.s8 %v154_v22  ;;  %v626_v39 = vunpack.c.3.s8 %v154_v22 }
  0xd6   :  { %3151 = vmatpush.bf16.msra.mxu2 %v2538_v28  ;;  %v1514_v40 = vcvt.s32.f32 %v490_v30  ;;  %v1522_v41 = vcvt.s32.f32 %v498_v33  ;;  %v746_v42 = vunpack.c.2.s8 %v186_v27  ;;  %v754_v43 = vunpack.c.3.s8 %v186_v27 }
  0xd7   :  { %3164 = vmatpush.bf16.msra.mxu3 %v2602_v34  ;;  %v2402_v44 = vpack.c.bf16 %v1394_v36, %v1386_v29  ;;  %v1642_v45 = vcvt.s32.f32 %v618_v37  ;;  %v1650_v46 = vcvt.s32.f32 %v626_v39  ;;  %v346_v47 = vunpack.c.0.s8 %v90_v5 }
  0xd8   :  { %v2466_v48 = vpack.c.bf16 %v1522_v41, %v1514_v40  ;;  %v1770_v49 = vcvt.s32.f32 %v746_v42  ;;  %v1778_v50 = vcvt.s32.f32 %v754_v43  ;;  %v354_v51 = vunpack.c.1.s8 %v90_v5 }
  0xd9   :  { %3126 = vmatpush.bf16.msra.mxu0 %v2402_v44  ;;  %v2530_v52 = vpack.c.bf16 %v1650_v46, %v1642_v45  ;;  %v1370_v53 = vcvt.s32.f32 %v346_v47  ;;  %v474_v54 = vunpack.c.0.s8 %v122_v17  ;;  %v482_v55 = vunpack.c.1.s8 %v122_v17  ;;  %v234_v44 = vld [vmem:[#allocation5 + $0x490] sm:$0xff] }
  0xda   :  { %3139 = vmatpush.bf16.msra.mxu1 %v2466_v48  ;;  %v2594_v57 = vpack.c.bf16 %v1778_v50, %v1770_v49  ;;  %v1378_v58 = vcvt.s32.f32 %v354_v51  ;;  %v602_v59 = vunpack.c.0.s8 %v154_v22  ;;  %v610_v60 = vunpack.c.1.s8 %v154_v22  ;;  %v5336_v49 = vpop.f32.mrf.mxu0  ;;  %v5338_v50 = vpop.f32.mrf.mxu1 }
  0xdb   :  { %3152 = vmatpush.bf16.msra.mxu2 %v2530_v52  ;;  %v1498_v61 = vcvt.s32.f32 %v474_v54  ;;  %v1506_v62 = vcvt.s32.f32 %v482_v55  ;;  %v730_v63 = vunpack.c.0.s8 %v186_v27  ;;  %v738_v0 = vunpack.c.1.s8 %v186_v27  ;;  %v266_v55 = vld [vmem:[#allocation5 + $0x590] sm:$0xff] }
  0xdc   :  { %3165 = vmatpush.bf16.msra.mxu3 %v2594_v57  ;;  %v2394_v3 = vpack.c.bf16 %v1378_v58, %v1370_v53  ;;  %v1626_v4 = vcvt.s32.f32 %v602_v59  ;;  %v1634_v5 = vcvt.s32.f32 %v610_v60  ;;  %v970_v8 = vunpack.c.2.s8 %v242_v56  ;;  %v298_v60 = vld [vmem:[#allocation5 + $0x690] sm:$0xff] }
  0xdd   :  { %v2458_v11 = vpack.c.bf16 %v1506_v62, %v1498_v61  ;;  %v1754_v12 = vcvt.s32.f32 %v730_v63  ;;  %v1762_v13 = vcvt.s32.f32 %v738_v0  ;;  %v978_v14 = vunpack.c.3.s8 %v242_v56 }
  0xde   :  { %3127 = vmatpush.bf16.msra.mxu0 %v2394_v3  ;;  %v2522_v16 = vpack.c.bf16 %v1634_v5, %v1626_v4  ;;  %v1994_v17 = vcvt.s32.f32 %v970_v8  ;;  %v1098_v18 = vunpack.c.2.s8 %v274_v1  ;;  %v1106_v19 = vunpack.c.3.s8 %v274_v1 }
  0xdf   :  { %3140 = vmatpush.bf16.msra.mxu1 %v2458_v11  ;;  %v2586_v20 = vpack.c.bf16 %v1762_v13, %v1754_v12  ;;  %v2002_v21 = vcvt.s32.f32 %v978_v14  ;;  %v1226_v22 = vunpack.c.2.s8 %v306_v10  ;;  %v1234_v23 = vunpack.c.3.s8 %v306_v10 }
  0xe0   :  { %3153 = vmatpush.bf16.msra.mxu2 %v2522_v16  ;;  %v2122_v24 = vcvt.s32.f32 %v1098_v18  ;;  %v2130_v25 = vcvt.s32.f32 %v1106_v19  ;;  %v1354_v26 = vunpack.c.2.s8 %v338_v15  ;;  %v1362_v27 = vunpack.c.3.s8 %v338_v15 }
  0xe1   :  { %3166 = vmatpush.bf16.msra.mxu3 %v2586_v20  ;;  %v2706_v28 = vpack.c.bf16 %v2002_v21, %v1994_v17  ;;  %v2250_v29 = vcvt.s32.f32 %v1226_v22  ;;  %v2258_v30 = vcvt.s32.f32 %v1234_v23  ;;  %v954_v33 = vunpack.c.0.s8 %v242_v56  ;;  %3128 = vmatmul.bf16.vlgmr.msra.gmra.mxu0 %v5293_v31 }
  0xe2   :  { %v2770_v34 = vpack.c.bf16 %v2130_v25, %v2122_v24  ;;  %v2378_v36 = vcvt.s32.f32 %v1354_v26  ;;  %v2386_v37 = vcvt.s32.f32 %v1362_v27  ;;  %v962_v39 = vunpack.c.1.s8 %v242_v56  ;;  %3141 = vmatmul.bf16.vlgmr.msra.gmra.mxu1 %v5298_v38  ;;  %v2923_v26 = vpop.f32.mrf.mxu0  ;;  %v2936_v27 = vpop.f32.mrf.mxu1 }
  0xe3   :  { %3172 = vmatpush.bf16.msrb.mxu0 %v2706_v28  ;;  %v2834_v40 = vpack.c.bf16 %v2258_v30, %v2250_v29  ;;  %v1978_v41 = vcvt.s32.f32 %v954_v33  ;;  %v1082_v42 = vunpack.c.0.s8 %v274_v1  ;;  %v1090_v43 = vunpack.c.1.s8 %v274_v1  ;;  %3154 = vmatmul.bf16.vlgmr.msra.gmra.mxu2 %v5284_v6  ;;  %v330_v1 = vld [vmem:[#allocation5 + $0x790] sm:$0xff] }
  0xe4   :  { %3185 = vmatpush.bf16.msrb.mxu1 %v2770_v34  ;;  %v2898_v45 = vpack.c.bf16 %v2386_v37, %v2378_v36  ;;  %v1986_v46 = vcvt.s32.f32 %v962_v39  ;;  %v1210_v47 = vunpack.c.0.s8 %v306_v10  ;;  %v1218_v48 = vunpack.c.1.s8 %v306_v10  ;;  %3167 = vmatmul.bf16.vlgmr.msra.gmra.mxu3 %v5295_v35  ;;  %v226_v34 = vld [vmem:[#allocation5 + $0x450] sm:$0xff] }
  0xe5   :  { %3198 = vmatpush.bf16.msrb.mxu2 %v2834_v40  ;;  %v2106_v51 = vcvt.s32.f32 %v1082_v42  ;;  %v2114_v52 = vcvt.s32.f32 %v1090_v43  ;;  %v1338_v53 = vunpack.c.0.s8 %v338_v15  ;;  %v1346_v54 = vunpack.c.1.s8 %v338_v15  ;;  %v5342_v42 = vpop.f32.mrf.mxu3  ;;  %v218_v26 = vld [vmem:[#allocation5 + $0x410] sm:$0xff] }
  0xe6   :  { %3211 = vmatpush.bf16.msrb.mxu3 %v2898_v45  ;;  %v2698_v56 = vpack.c.bf16 %v1986_v46, %v1978_v41  ;;  %v2234_v57 = vcvt.s32.f32 %v1210_v47  ;;  %v2242_v58 = vcvt.s32.f32 %v1218_v48  ;;  %v938_v59 = vunpack.c.2.s8 %v234_v44  ;;  %v5340_v41 = vpop.f32.mrf.mxu2  ;;  %v258_v47 = vld [vmem:[#allocation5 + $0x550] sm:$0xff] }
  0xe7   :  { %v2762_v61 = vpack.c.bf16 %v2114_v52, %v2106_v51  ;;  %v2362_v62 = vcvt.s32.f32 %v1338_v53  ;;  %v2370_v63 = vcvt.s32.f32 %v1346_v54  ;;  %v946_v0 = vunpack.c.3.s8 %v234_v44  ;;  %v290_v54 = vld [vmem:[#allocation5 + $0x650] sm:$0xff] }
  0xe8   :  { %3173 = vmatpush.bf16.msrb.mxu0 %v2698_v56  ;;  %v2826_v3 = vpack.c.bf16 %v2242_v58, %v2234_v57  ;;  %v1962_v4 = vcvt.s32.f32 %v938_v59  ;;  %v1066_v5 = vunpack.c.2.s8 %v266_v55  ;;  %v1074_v8 = vunpack.c.3.s8 %v266_v55  ;;  %v322_v59 = vld [vmem:[#allocation5 + $0x750] sm:$0xff] }
  0xe9   :  { %3186 = vmatpush.bf16.msrb.mxu1 %v2762_v61  ;;  %v2890_v10 = vpack.c.bf16 %v2370_v63, %v2362_v62  ;;  %v1970_v11 = vcvt.s32.f32 %v946_v0  ;;  %v1194_v12 = vunpack.c.2.s8 %v298_v60  ;;  %v1202_v13 = vunpack.c.3.s8 %v298_v60 }
  0xea   :  { %3199 = vmatpush.bf16.msrb.mxu2 %v2826_v3  ;;  %v2090_v14 = vcvt.s32.f32 %v1066_v5  ;;  %v2098_v15 = vcvt.s32.f32 %v1074_v8  ;;  %v1322_v16 = vunpack.c.2.s8 %v330_v1  ;;  %v1330_v17 = vunpack.c.3.s8 %v330_v1 }
  0xeb   :  { %3212 = vmatpush.bf16.msrb.mxu3 %v2890_v10  ;;  %v2690_v18 = vpack.c.bf16 %v1970_v11, %v1962_v4  ;;  %v2218_v19 = vcvt.s32.f32 %v1194_v12  ;;  %v2226_v20 = vcvt.s32.f32 %v1202_v13  ;;  %v922_v21 = vunpack.c.0.s8 %v234_v44 }
  0xec   :  { %v2754_v22 = vpack.c.bf16 %v2098_v15, %v2090_v14  ;;  %v2346_v23 = vcvt.s32.f32 %v1322_v16  ;;  %v2354_v24 = vcvt.s32.f32 %v1330_v17  ;;  %v930_v25 = vunpack.c.1.s8 %v234_v44 }
  0xed   :  { %3174 = vmatpush.bf16.msrb.mxu0 %v2690_v18  ;;  %v2818_v28 = vpack.c.bf16 %v2226_v20, %v2218_v19  ;;  %v1946_v29 = vcvt.s32.f32 %v922_v21  ;;  %v1050_v30 = vunpack.c.0.s8 %v266_v55  ;;  %v1058_v33 = vunpack.c.1.s8 %v266_v55  ;;  %v2962_v21 = vpop.f32.mrf.mxu3 }
  0xee   :  { %3187 = vmatpush.bf16.msrb.mxu1 %v2754_v22  ;;  %v2882_v36 = vpack.c.bf16 %v2354_v24, %v2346_v23  ;;  %v1954_v37 = vcvt.s32.f32 %v930_v25  ;;  %v1178_v39 = vunpack.c.0.s8 %v298_v60  ;;  %v1186_v40 = vunpack.c.1.s8 %v298_v60  ;;  %v2949_v20 = vpop.f32.mrf.mxu2 }
  0xef   :  { %3200 = vmatpush.bf16.msrb.mxu2 %v2818_v28  ;;  %v2074_v43 = vcvt.s32.f32 %v1050_v30  ;;  %v2082_v44 = vcvt.s32.f32 %v1058_v33  ;;  %v1306_v45 = vunpack.c.0.s8 %v330_v1  ;;  %v1314_v46 = vunpack.c.1.s8 %v330_v1  ;;  %v5350_v20 = vld [vmem:[#allocation5 + $0xd8] sm:$0xff] }
  0xf0   :  { %3213 = vmatpush.bf16.msrb.mxu3 %v2882_v36  ;;  %v2682_v48 = vpack.c.bf16 %v1954_v37, %v1946_v29  ;;  %v2202_v51 = vcvt.s32.f32 %v1178_v39  ;;  %v2210_v52 = vcvt.s32.f32 %v1186_v40  ;;  %v906_v53 = vunpack.c.2.s8 %v226_v34  ;;  %v250_v40 = vld [vmem:[#allocation5 + $0x510] sm:$0xff] }
  0xf1   :  { %v2746_v55 = vpack.c.bf16 %v2082_v44, %v2074_v43  ;;  %v2330_v56 = vcvt.s32.f32 %v1306_v45  ;;  %v2338_v57 = vcvt.s32.f32 %v1314_v46  ;;  %v914_v58 = vunpack.c.3.s8 %v226_v34  ;;  %v282_v46 = vld [vmem:[#allocation5 + $0x610] sm:$0xff] }
  0xf2   :  { %3175 = vmatpush.bf16.msrb.mxu0 %v2682_v48  ;;  %v2810_v60 = vpack.c.bf16 %v2210_v52, %v2202_v51  ;;  %v1930_v61 = vcvt.s32.f32 %v906_v53  ;;  %v1034_v62 = vunpack.c.2.s8 %v258_v47  ;;  %v1042_v63 = vunpack.c.3.s8 %v258_v47  ;;  %v314_v53 = vld [vmem:[#allocation5 + $0x710] sm:$0xff] }
  0xf3   :  { %3188 = vmatpush.bf16.msrb.mxu1 %v2746_v55  ;;  %v2874_v0 = vpack.c.bf16 %v2338_v57, %v2330_v56  ;;  %v1938_v1 = vcvt.s32.f32 %v914_v58  ;;  %v1162_v3 = vunpack.c.2.s8 %v290_v54  ;;  %v1170_v4 = vunpack.c.3.s8 %v290_v54 }
  0xf4   :  { %3201 = vmatpush.bf16.msrb.mxu2 %v2810_v60  ;;  %v2058_v5 = vcvt.s32.f32 %v1034_v62  ;;  %v2066_v8 = vcvt.s32.f32 %v1042_v63  ;;  %v1290_v10 = vunpack.c.2.s8 %v322_v59  ;;  %v1298_v11 = vunpack.c.3.s8 %v322_v59 }
  0xf5   :  { %3214 = vmatpush.bf16.msrb.mxu3 %v2874_v0  ;;  %v2674_v12 = vpack.c.bf16 %v1938_v1, %v1930_v61  ;;  %v2186_v13 = vcvt.s32.f32 %v1162_v3  ;;  %v2194_v14 = vcvt.s32.f32 %v1170_v4  ;;  %v890_v15 = vunpack.c.0.s8 %v226_v34  ;;  %v5344_v3 = vpop.f32.mrf.mxu0  ;;  %v5346_v4 = vpop.f32.mrf.mxu1 }
  0xf6   :  { %v2738_v16 = vpack.c.bf16 %v2066_v8, %v2058_v5  ;;  %v2314_v17 = vcvt.s32.f32 %v1290_v10  ;;  %v2322_v18 = vcvt.s32.f32 %v1298_v11  ;;  %v898_v19 = vunpack.c.1.s8 %v226_v34 }
  0xf7   :  { %3176 = vmatpush.bf16.msrb.mxu0 %v2674_v12  ;;  %v2802_v22 = vpack.c.bf16 %v2194_v14, %v2186_v13  ;;  %v1914_v23 = vcvt.s32.f32 %v890_v15  ;;  %v1018_v24 = vunpack.c.0.s8 %v258_v47  ;;  %v1026_v25 = vunpack.c.1.s8 %v258_v47 }
  0xf8   :  { %3189 = vmatpush.bf16.msrb.mxu1 %v2738_v16  ;;  %v2866_v27 = vpack.c.bf16 %v2322_v18, %v2314_v17  ;;  %v1922_v28 = vcvt.s32.f32 %v898_v19  ;;  %v1146_v29 = vunpack.c.0.s8 %v290_v54  ;;  %v1154_v30 = vunpack.c.1.s8 %v290_v54 }
  0xf9   :  { %3202 = vmatpush.bf16.msrb.mxu2 %v2802_v22  ;;  %v2042_v33 = vcvt.s32.f32 %v1018_v24  ;;  %v2050_v36 = vcvt.s32.f32 %v1026_v25  ;;  %v1274_v37 = vunpack.c.0.s8 %v322_v59  ;;  %v1282_v39 = vunpack.c.1.s8 %v322_v59 }
  0xfa   :  { %3215 = vmatpush.bf16.msrb.mxu3 %v2866_v27  ;;  %v2666_v34 = vpack.c.bf16 %v1922_v28, %v1914_v23  ;;  %v2170_v43 = vcvt.s32.f32 %v1146_v29  ;;  %v2178_v44 = vcvt.s32.f32 %v1154_v30  ;;  %v874_v45 = vunpack.c.2.s8 %v218_v26  ;;  %v147_v28 = vld [vmem:[#allocation5 + $0x1d8] sm:$0xff]  ;;  %v5352_v29 = vpop.f32.mrf.mxu2  ;;  %v5354_v30 = vpop.f32.mrf.mxu3 }
  0xfb   :  { %v2730_v48 = vpack.c.bf16 %v2050_v36, %v2042_v33  ;;  %v2298_v47 = vcvt.s32.f32 %v1274_v37  ;;  %v2306_v51 = vcvt.s32.f32 %v1282_v39  ;;  %v882_v52 = vunpack.c.3.s8 %v218_v26  ;;  %v179_v39 = vld [vmem:[#allocation5 + $0x2d8] sm:$0xff] }
  0xfc   :  { %3177 = vmatpush.bf16.msrb.mxu0 %v2666_v34  ;;  %v2794_v55 = vpack.c.bf16 %v2178_v44, %v2170_v43  ;;  %v1898_v54 = vcvt.s32.f32 %v874_v45  ;;  %v1002_v56 = vunpack.c.2.s8 %v250_v40  ;;  %v1010_v57 = vunpack.c.3.s8 %v250_v40  ;;  %v5358_v45 = vld [vmem:[#allocation5 + $0x3d8] sm:$0xff] }
  0xfd   :  { %3190 = vmatpush.bf16.msrb.mxu1 %v2730_v48  ;;  %v2858_v58 = vpack.c.bf16 %v2306_v51, %v2298_v47  ;;  %v1906_v59 = vcvt.s32.f32 %v882_v52  ;;  %v1130_v60 = vunpack.c.2.s8 %v282_v46  ;;  %v1138_v61 = vunpack.c.3.s8 %v282_v46  ;;  %v2975_v52 = vpop.f32.mrf.mxu0 }
  0xfe   :  { %3203 = vmatpush.bf16.msrb.mxu2 %v2794_v55  ;;  %v2026_v62 = vcvt.s32.f32 %v1002_v56  ;;  %v2034_v63 = vcvt.s32.f32 %v1010_v57  ;;  %v1258_v0 = vunpack.c.2.s8 %v314_v53  ;;  %v1266_v1 = vunpack.c.3.s8 %v314_v53  ;;  %v2988_v55 = vpop.f32.mrf.mxu1 }
  0xff   :  { %3216 = vmatpush.bf16.msrb.mxu3 %v2858_v58  ;;  %v2658_v5 = vpack.c.bf16 %v1906_v59, %v1898_v54  ;;  %v2154_v8 = vcvt.s32.f32 %v1130_v60  ;;  %v2162_v10 = vcvt.s32.f32 %v1138_v61  ;;  %v2935_v11 = vadd.f32 %v5338_v50, %v5336_v49 }
 0x100   :  { %v2722_v12 = vpack.c.bf16 %v2034_v63, %v2026_v62  ;;  %v2282_v13 = vcvt.s32.f32 %v1258_v0  ;;  %v2290_v14 = vcvt.s32.f32 %v1266_v1  ;;  %v858_v15 = vunpack.c.0.s8 %v218_v26 }
 0x101   :  { %3178 = vmatpush.bf16.msrb.mxu0 %v2658_v5  ;;  %v2786_v16 = vpack.c.bf16 %v2162_v10, %v2154_v8  ;;  %v866_v17 = vunpack.c.1.s8 %v218_v26  ;;  %v986_v18 = vunpack.c.0.s8 %v250_v40  ;;  %v994_v19 = vunpack.c.1.s8 %v250_v40 }
 0x102   :  { %3191 = vmatpush.bf16.msrb.mxu1 %v2722_v12  ;;  %v2850_v21 = vpack.c.bf16 %v2290_v14, %v2282_v13  ;;  %v1882_v22 = vcvt.s32.f32 %v858_v15  ;;  %v1114_v23 = vunpack.c.0.s8 %v282_v46  ;;  %v1122_v24 = vunpack.c.1.s8 %v282_v46 }
 0x103   :  { %3204 = vmatpush.bf16.msrb.mxu2 %v2786_v16  ;;  %v1890_v25 = vcvt.s32.f32 %v866_v17  ;;  %v2010_v27 = vcvt.s32.f32 %v986_v18  ;;  %v2018_v49 = vcvt.s32.f32 %v994_v19  ;;  %v1242_v50 = vunpack.c.0.s8 %v314_v53  ;;  %v5367_v17 = vld [vmem:[#allocation5 + $0x98] sm:$0xff]  ;;  %v3001_v18 = vpop.f32.mrf.mxu2  ;;  %v3014_v19 = vpop.f32.mrf.mxu3 }
 0x104   :  { %3217 = vmatpush.bf16.msrb.mxu3 %v2850_v21  ;;  %v2138_v26 = vcvt.s32.f32 %v1114_v23  ;;  %v2146_v33 = vcvt.s32.f32 %v1122_v24  ;;  %v1250_v36 = vunpack.c.1.s8 %v314_v53  ;;  %v459_v37 = vunpack.c.2.s8 %v5350_v20 }
 0x105   :  { %v2650_v40 = vpack.c.bf16 %v1890_v25, %v1882_v22  ;;  %v2714_v34 = vpack.c.bf16 %v2018_v49, %v2010_v27  ;;  %v2266_v43 = vcvt.s32.f32 %v1242_v50  ;;  %v467_v44 = vunpack.c.3.s8 %v5350_v20 }
 0x106   :  { %v2778_v46 = vpack.c.bf16 %v2146_v33, %v2138_v26  ;;  %v2274_v48 = vcvt.s32.f32 %v1250_v36  ;;  %v1483_v47 = vcvt.s32.f32 %v459_v37  ;;  %v587_v51 = vunpack.c.2.s8 %v147_v28 }
 0x107   :  { %3179 = vmatpush.bf16.msrb.mxu0 %v2650_v40  ;;  %3192 = vmatpush.bf16.msrb.mxu1 %v2714_v34  ;;  %v1491_v54 = vcvt.s32.f32 %v467_v44  ;;  %v595_v53 = vunpack.c.3.s8 %v147_v28  ;;  %v715_v56 = vunpack.c.2.s8 %v179_v39  ;;  %v723_v57 = vunpack.c.3.s8 %v179_v39  ;;  %v171_v40 = vld [vmem:[#allocation5 + $0x298] sm:$0xff] }
 0x108   :  { %3205 = vmatpush.bf16.msrb.mxu2 %v2778_v46  ;;  %v2842_v58 = vpack.c.bf16 %v2274_v48, %v2266_v43  ;;  %v1611_v59 = vcvt.s32.f32 %v587_v51  ;;  %v843_v60 = vunpack.c.2.s8 %v5358_v45  ;;  %v851_v61 = vunpack.c.3.s8 %v5358_v45  ;;  %v203_v34 = vld [vmem:[#allocation5 + $0x398] sm:$0xff] }
 0x109   :  { %v2451_v62 = vpack.c.bf16 %v1491_v54, %v1483_v47  ;;  %v1619_v63 = vcvt.s32.f32 %v595_v53  ;;  %v1739_v0 = vcvt.s32.f32 %v715_v56  ;;  %v1747_v1 = vcvt.s32.f32 %v723_v57 }
 0x10a   :  { %3218 = vmatpush.bf16.msrb.mxu3 %v2842_v58  ;;  %v1867_v5 = vcvt.s32.f32 %v843_v60  ;;  %v1875_v8 = vcvt.s32.f32 %v851_v61  ;;  %v2948_v10 = vadd.f32 %v5340_v41, %v2935_v11  ;;  %3180 = vmatmul.bf16.vlgmr.msrb.gmra.mxu0 %v5312_v7  ;;  %v443_v12 = vunpack.c.0.s8 %v5350_v20 }
 0x10b   :  { %3224 = vmatpush.bf16.msra.mxu0 %v2451_v62  ;;  %v2515_v13 = vpack.c.bf16 %v1619_v63, %v1611_v59  ;;  %v2579_v14 = vpack.c.bf16 %v1747_v1, %v1739_v0  ;;  %3206 = vmatmul.bf16.vlgmr.msrb.gmra.mxu2 %v5310_v2  ;;  %v451_v15 = vunpack.c.1.s8 %v5350_v20  ;;  %v571_v16 = vunpack.c.0.s8 %v147_v28 }
 0x10c   :  { %v2643_v21 = vpack.c.bf16 %v1875_v8, %v1867_v5  ;;  %v5370_v22 = vadd.f32 %v5342_v42, %v2948_v10  ;;  %v1467_v41 = vcvt.s32.f32 %v443_v12  ;;  %v579_v11 = vunpack.c.1.s8 %v147_v28  ;;  %3193 = vmatmul.bf16.vlgmr.msrb.gmra.mxu1 %v5321_v32  ;;  %v139_v42 = vld [vmem:[#allocation5 + $0x198] sm:$0xff] }
 0x10d   :  { %3237 = vmatpush.bf16.msra.mxu1 %v2515_v13  ;;  %3250 = vmatpush.bf16.msra.mxu2 %v2579_v14  ;;  %v1475_v23 = vcvt.s32.f32 %v451_v15  ;;  %v1595_v24 = vcvt.s32.f32 %v571_v16  ;;  %v699_v25 = vunpack.c.0.s8 %v179_v39  ;;  %v707_v27 = vunpack.c.1.s8 %v179_v39  ;;  %v99_v15 = vld [vmem:[#allocation5 + $0x58] sm:$0xff] }
 0x10e   :  { %3263 = vmatpush.bf16.msra.mxu3 %v2643_v21  ;;  %v1603_v20 = vcvt.s32.f32 %v579_v11  ;;  %v827_v49 = vunpack.c.0.s8 %v5358_v45  ;;  %v835_v50 = vunpack.c.1.s8 %v5358_v45  ;;  %v427_v26 = vunpack.c.2.s8 %v5367_v17 }
 0x10f   :  { %3219 = vmatmul.bf16.vlgmr.msrb.gmra.mxu3 %v5315_v9  ;;  %v2443_v28 = vpack.c.bf16 %v1475_v23, %v1467_v41  ;;  %v1723_v33 = vcvt.s32.f32 %v699_v25  ;;  %v1731_v36 = vcvt.s32.f32 %v707_v27  ;;  %v435_v37 = vunpack.c.3.s8 %v5367_v17  ;;  %v131_v25 = vld [vmem:[#allocation5 + $0x158] sm:$0xff] }
 0x110   :  { %v2507_v43 = vpack.c.bf16 %v1603_v20, %v1595_v24  ;;  %v1851_v39 = vcvt.s32.f32 %v827_v49  ;;  %v1859_v44 = vcvt.s32.f32 %v835_v50  ;;  %v1451_v46 = vcvt.s32.f32 %v427_v26  ;;  %v163_v50 = vld [vmem:[#allocation5 + $0x258] sm:$0xff] }
 0x111   :  { %3225 = vmatpush.bf16.msra.mxu0 %v2443_v28  ;;  %v2571_v48 = vpack.c.bf16 %v1731_v36, %v1723_v33  ;;  %v1459_v47 = vcvt.s32.f32 %v435_v37  ;;  %v555_v45 = vunpack.c.2.s8 %v139_v42  ;;  %v563_v51 = vunpack.c.3.s8 %v139_v42  ;;  %v195_v36 = vld [vmem:[#allocation5 + $0x358] sm:$0xff] }
 0x112   :  { %3238 = vmatpush.bf16.msra.mxu1 %v2507_v43  ;;  %v2635_v52 = vpack.c.bf16 %v1859_v44, %v1851_v39  ;;  %v683_v55 = vunpack.c.2.s8 %v171_v40  ;;  %v691_v54 = vunpack.c.3.s8 %v171_v40  ;;  %v811_v53 = vunpack.c.2.s8 %v203_v34 }
 0x113   :  { %3251 = vmatpush.bf16.msra.mxu2 %v2571_v48  ;;  %v2435_v56 = vpack.c.bf16 %v1459_v47, %v1451_v46  ;;  %v1579_v57 = vcvt.s32.f32 %v555_v45  ;;  %v1587_v58 = vcvt.s32.f32 %v563_v51  ;;  %v819_v59 = vunpack.c.3.s8 %v203_v34 }
 0x114   :  { %3264 = vmatpush.bf16.msra.mxu3 %v2635_v52  ;;  %v1707_v60 = vcvt.s32.f32 %v683_v55  ;;  %v1715_v61 = vcvt.s32.f32 %v691_v54  ;;  %v1835_v62 = vcvt.s32.f32 %v811_v53  ;;  %v411_v63 = vunpack.c.0.s8 %v5367_v17 }
 0x115   :  { %3226 = vmatpush.bf16.msra.mxu0 %v2435_v56  ;;  %v2499_v0 = vpack.c.bf16 %v1587_v58, %v1579_v57  ;;  %v1843_v1 = vcvt.s32.f32 %v819_v59  ;;  %v419_v5 = vunpack.c.1.s8 %v5367_v17  ;;  %v539_v8 = vunpack.c.0.s8 %v139_v42 }
 0x116   :  { %v2563_v10 = vpack.c.bf16 %v1715_v61, %v1707_v60  ;;  %v1435_v12 = vcvt.s32.f32 %v411_v63  ;;  %v547_v13 = vunpack.c.1.s8 %v139_v42  ;;  %v667_v14 = vunpack.c.0.s8 %v171_v40 }
 0x117   :  { %3239 = vmatpush.bf16.msra.mxu1 %v2499_v0  ;;  %v2627_v16 = vpack.c.bf16 %v1843_v1, %v1835_v62  ;;  %v1443_v18 = vcvt.s32.f32 %v419_v5  ;;  %v1563_v19 = vcvt.s32.f32 %v539_v8  ;;  %v675_v21 = vunpack.c.1.s8 %v171_v40 }
 0x118   :  { %3252 = vmatpush.bf16.msra.mxu2 %v2563_v10  ;;  %v1571_v41 = vcvt.s32.f32 %v547_v13  ;;  %v1691_v11 = vcvt.s32.f32 %v667_v14  ;;  %v795_v23 = vunpack.c.0.s8 %v203_v34  ;;  %v803_v24 = vunpack.c.1.s8 %v203_v34 }
 0x119   :  { %3265 = vmatpush.bf16.msra.mxu3 %v2627_v16  ;;  %v2427_v27 = vpack.c.bf16 %v1443_v18, %v1435_v12  ;;  %v1699_v17 = vcvt.s32.f32 %v675_v21  ;;  %v2974_v20 = vadd.f32 %v5344_v3, %v5370_v22  ;;  %v395_v49 = vunpack.c.2.s8 %v99_v15 }
 0x11a   :  { %v2491_v26 = vpack.c.bf16 %v1571_v41, %v1563_v19  ;;  %v1819_v42 = vcvt.s32.f32 %v795_v23  ;;  %v1827_v28 = vcvt.s32.f32 %v803_v24  ;;  %v403_v33 = vunpack.c.3.s8 %v99_v15  ;;  %v91_v19 = vld [vmem:[#allocation5 + $0x18] sm:$0xff] }
 0x11b   :  { %3227 = vmatpush.bf16.msra.mxu0 %v2427_v27  ;;  %v2555_v37 = vpack.c.bf16 %v1699_v17, %v1691_v11  ;;  %v2987_v40 = vadd.f32 %v5346_v4, %v2974_v20  ;;  %v1419_v43 = vcvt.s32.f32 %v395_v49  ;;  %v523_v34 = vunpack.c.2.s8 %v131_v25  ;;  %v155_v27 = vld [vmem:[#allocation5 + $0x218] sm:$0xff] }
 0x11c   :  { %3240 = vmatpush.bf16.msra.mxu1 %v2491_v26  ;;  %v2619_v39 = vpack.c.bf16 %v1827_v28, %v1819_v42  ;;  %v1427_v44 = vcvt.s32.f32 %v403_v33  ;;  %v531_v46 = vunpack.c.3.s8 %v131_v25  ;;  %v651_v48 = vunpack.c.2.s8 %v163_v50  ;;  %v187_v42 = vld [vmem:[#allocation5 + $0x318] sm:$0xff] }
 0x11d   :  { %3253 = vmatpush.bf16.msra.mxu2 %v2555_v37  ;;  %v1547_v3 = vcvt.s32.f32 %v523_v34  ;;  %v659_v22 = vunpack.c.3.s8 %v163_v50  ;;  %v779_v47 = vunpack.c.2.s8 %v195_v36  ;;  %v787_v45 = vunpack.c.3.s8 %v195_v36 }
 0x11e   :  { %3266 = vmatpush.bf16.msra.mxu3 %v2619_v39  ;;  %v2419_v51 = vpack.c.bf16 %v1427_v44, %v1419_v43  ;;  %v1555_v52 = vcvt.s32.f32 %v531_v46  ;;  %v1675_v55 = vcvt.s32.f32 %v651_v48  ;;  %v3000_v54 = vadd.f32 %v5352_v29, %v2987_v40 }
 0x11f   :  { %v1683_v53 = vcvt.s32.f32 %v659_v22  ;;  %v1803_v4 = vcvt.s32.f32 %v779_v47  ;;  %v1811_v56 = vcvt.s32.f32 %v787_v45  ;;  %v379_v59 = vunpack.c.0.s8 %v99_v15 }
 0x120   :  { %3228 = vmatpush.bf16.msra.mxu0 %v2419_v51  ;;  %v2483_v57 = vpack.c.bf16 %v1555_v52, %v1547_v3  ;;  %v5385_v58 = vadd.f32 %v5354_v30, %v3000_v54  ;;  %v387_v62 = vunpack.c.1.s8 %v99_v15  ;;  %v507_v63 = vunpack.c.0.s8 %v131_v25  ;;  %v123_v15 = vld [vmem:[#allocation5 + $0x118] sm:$0xff] }
 0x121   :  { %v2547_v60 = vpack.c.bf16 %v1683_v53, %v1675_v55  ;;  %v2611_v61 = vpack.c.bf16 %v1811_v56, %v1803_v4  ;;  %v1403_v0 = vcvt.s32.f32 %v379_v59  ;;  %v515_v1 = vunpack.c.1.s8 %v131_v25  ;;  %v243_v4 = vld [vmem:[#allocation5 + $0x4d8] sm:$0xff] }
 0x122   :  { %3241 = vmatpush.bf16.msra.mxu1 %v2483_v57  ;;  %v1411_v5 = vcvt.s32.f32 %v387_v62  ;;  %v1531_v29 = vcvt.s32.f32 %v507_v63  ;;  %v635_v8 = vunpack.c.0.s8 %v163_v50  ;;  %v643_v10 = vunpack.c.1.s8 %v163_v50 }
 0x123   :  { %3254 = vmatpush.bf16.msra.mxu2 %v2547_v60  ;;  %3267 = vmatpush.bf16.msra.mxu3 %v2611_v61  ;;  %v1539_v12 = vcvt.s32.f32 %v515_v1  ;;  %v763_v13 = vunpack.c.0.s8 %v195_v36  ;;  %v771_v18 = vunpack.c.1.s8 %v195_v36  ;;  %v363_v24 = vunpack.c.2.s8 %v91_v19 }
 0x124   :  { %v2411_v14 = vpack.c.bf16 %v1411_v5, %v1403_v0  ;;  %v1659_v16 = vcvt.s32.f32 %v635_v8  ;;  %v1667_v30 = vcvt.s32.f32 %v643_v10  ;;  %v371_v25 = vunpack.c.3.s8 %v91_v19  ;;  %v275_v0 = vld [vmem:[#allocation5 + $0x5d8] sm:$0xff] }
 0x125   :  { %v2475_v21 = vpack.c.bf16 %v1539_v12, %v1531_v29  ;;  %v1787_v41 = vcvt.s32.f32 %v763_v13  ;;  %v1795_v23 = vcvt.s32.f32 %v771_v18  ;;  %v491_v20 = vunpack.c.2.s8 %v123_v15  ;;  %v307_v8 = vld [vmem:[#allocation5 + $0x6d8] sm:$0xff] }
 0x126   :  { %3229 = vmatpush.bf16.msra.mxu0 %v2411_v14  ;;  %v2539_v11 = vpack.c.bf16 %v1667_v30, %v1659_v16  ;;  %v499_v49 = vunpack.c.3.s8 %v123_v15  ;;  %v1387_v50 = vcvt.s32.f32 %v363_v24  ;;  %v1395_v26 = vcvt.s32.f32 %v371_v25  ;;  %v339_v16 = vld [vmem:[#allocation5 + $0x7d8] sm:$0xff] }
 0x127   :  { %3242 = vmatpush.bf16.msra.mxu1 %v2475_v21  ;;  %v2603_v17 = vpack.c.bf16 %v1795_v23, %v1787_v41  ;;  %v1515_v28 = vcvt.s32.f32 %v491_v20  ;;  %v619_v36 = vunpack.c.2.s8 %v155_v27  ;;  %v627_v40 = vunpack.c.3.s8 %v155_v27 }
 0x128   :  { %3255 = vmatpush.bf16.msra.mxu2 %v2539_v11  ;;  %v1523_v33 = vcvt.s32.f32 %v499_v49  ;;  %v2403_v37 = vpack.c.bf16 %v1395_v26, %v1387_v50  ;;  %v747_v39 = vunpack.c.2.s8 %v187_v42  ;;  %v755_v46 = vunpack.c.3.s8 %v187_v42 }
 0x129   :  { %3268 = vmatpush.bf16.msra.mxu3 %v2603_v17  ;;  %v1643_v34 = vcvt.s32.f32 %v619_v36  ;;  %v1651_v44 = vcvt.s32.f32 %v627_v40  ;;  %v347_v48 = vunpack.c.0.s8 %v91_v19  ;;  %v355_v22 = vunpack.c.1.s8 %v91_v19 }
 0x12a   :  { %v2467_v43 = vpack.c.bf16 %v1523_v33, %v1515_v28  ;;  %3230 = vmatpush.bf16.msra.mxu0 %v2403_v37  ;;  %v1771_v3 = vcvt.s32.f32 %v747_v39  ;;  %v475_v47 = vunpack.c.0.s8 %v123_v15  ;;  %v1779_v51 = vcvt.s32.f32 %v755_v46  ;;  %v235_v39 = vld [vmem:[#allocation5 + $0x498] sm:$0xff] }
 0x12b   :  { %v2531_v45 = vpack.c.bf16 %v1651_v44, %v1643_v34  ;;  %v1371_v52 = vcvt.s32.f32 %v347_v48  ;;  %v1379_v55 = vcvt.s32.f32 %v355_v22  ;;  %v483_v54 = vunpack.c.1.s8 %v123_v15  ;;  %v5391_v22 = vld [vmem:[#allocation5 + $0x598] sm:$0xff] }
 0x12c   :  { %3243 = vmatpush.bf16.msra.mxu1 %v2467_v43  ;;  %v1499_v53 = vcvt.s32.f32 %v475_v47  ;;  %v2595_v56 = vpack.c.bf16 %v1779_v51, %v1771_v3  ;;  %v603_v57 = vunpack.c.0.s8 %v155_v27  ;;  %v611_v59 = vunpack.c.1.s8 %v155_v27 }
 0x12d   :  { %3256 = vmatpush.bf16.msra.mxu2 %v2531_v45  ;;  %v2395_v60 = vpack.c.bf16 %v1379_v55, %v1371_v52  ;;  %v1507_v61 = vcvt.s32.f32 %v483_v54  ;;  %v731_v62 = vunpack.c.0.s8 %v187_v42  ;;  %v739_v63 = vunpack.c.1.s8 %v187_v42 }
 0x12e   :  { %3269 = vmatpush.bf16.msra.mxu3 %v2595_v56  ;;  %v1627_v1 = vcvt.s32.f32 %v603_v57  ;;  %v1635_v5 = vcvt.s32.f32 %v611_v59  ;;  %v971_v29 = vunpack.c.2.s8 %v243_v4  ;;  %v979_v14 = vunpack.c.3.s8 %v243_v4  ;;  %v5393_v56 = vpop.f32.mrf.mxu0  ;;  %v5395_v57 = vpop.f32.mrf.mxu1 }
 0x12f   :  { %3231 = vmatpush.bf16.msra.mxu0 %v2395_v60  ;;  %v2459_v10 = vpack.c.bf16 %v1507_v61, %v1499_v53  ;;  %v1755_v12 = vcvt.s32.f32 %v731_v62  ;;  %v1763_v13 = vcvt.s32.f32 %v739_v63  ;;  %v1099_v19 = vunpack.c.2.s8 %v275_v0  ;;  %v299_v63 = vld [vmem:[#allocation5 + $0x698] sm:$0xff] }
 0x130   :  { %v2523_v30 = vpack.c.bf16 %v1635_v5, %v1627_v1  ;;  %v1995_v18 = vcvt.s32.f32 %v971_v29  ;;  %v2003_v41 = vcvt.s32.f32 %v979_v14  ;;  %v1107_v15 = vunpack.c.3.s8 %v275_v0  ;;  %v331_v5 = vld [vmem:[#allocation5 + $0x798] sm:$0xff] }
 0x131   :  { %3244 = vmatpush.bf16.msra.mxu1 %v2459_v10  ;;  %v2587_v21 = vpack.c.bf16 %v1763_v13, %v1755_v12  ;;  %v1227_v11 = vunpack.c.2.s8 %v307_v8  ;;  %v2123_v23 = vcvt.s32.f32 %v1099_v19  ;;  %v1235_v24 = vunpack.c.3.s8 %v307_v8 }
 0x132   :  { %3257 = vmatpush.bf16.msra.mxu2 %v2523_v30  ;;  %v1355_v25 = vunpack.c.2.s8 %v339_v16  ;;  %3232 = vmatmul.bf16.vlgmr.msra.gmra.mxu0 %v5293_v31  ;;  %v2707_v27 = vpack.c.bf16 %v2003_v41, %v1995_v18  ;;  %v2131_v17 = vcvt.s32.f32 %v1107_v15  ;;  %v1363_v49 = vunpack.c.3.s8 %v339_v16 }
 0x133   :  { %3270 = vmatpush.bf16.msra.mxu3 %v2587_v21  ;;  %v2251_v20 = vcvt.s32.f32 %v1227_v11  ;;  %v2259_v50 = vcvt.s32.f32 %v1235_v24  ;;  %v955_v33 = vunpack.c.0.s8 %v243_v4  ;;  %v963_v36 = vunpack.c.1.s8 %v243_v4 }
 0x134   :  { %v2379_v26 = vcvt.s32.f32 %v1355_v25  ;;  %3245 = vmatmul.bf16.vlgmr.msra.gmra.mxu1 %v5298_v38  ;;  %3276 = vmatpush.bf16.msrb.mxu0 %v2707_v27  ;;  %v2771_v42 = vpack.c.bf16 %v2131_v17, %v2123_v23  ;;  %v2387_v28 = vcvt.s32.f32 %v1363_v49  ;;  %v1083_v40 = vunpack.c.0.s8 %v275_v0 }
 0x135   :  { %3258 = vmatmul.bf16.vlgmr.msra.gmra.mxu2 %v5284_v6  ;;  %v2835_v37 = vpack.c.bf16 %v2259_v50, %v2251_v20  ;;  %v1091_v43 = vunpack.c.1.s8 %v275_v0  ;;  %v1211_v34 = vunpack.c.0.s8 %v307_v8  ;;  %v1979_v46 = vcvt.s32.f32 %v955_v33 }
 0x136   :  { %3271 = vmatmul.bf16.vlgmr.msra.gmra.mxu3 %v5295_v35  ;;  %3289 = vmatpush.bf16.msrb.mxu1 %v2771_v42  ;;  %v2899_v44 = vpack.c.bf16 %v2387_v28, %v2379_v26  ;;  %v1987_v48 = vcvt.s32.f32 %v963_v36  ;;  %v1219_v3 = vunpack.c.1.s8 %v307_v8  ;;  %v2107_v47 = vcvt.s32.f32 %v1083_v40  ;;  %v3027_v50 = vpop.f32.mrf.mxu0  ;;  %v3040_v26 = vpop.f32.mrf.mxu1 }
 0x137   :  { %3302 = vmatpush.bf16.msrb.mxu2 %v2835_v37  ;;  %v2115_v45 = vcvt.s32.f32 %v1091_v43  ;;  %v2235_v51 = vcvt.s32.f32 %v1211_v34  ;;  %v1339_v52 = vunpack.c.0.s8 %v339_v16  ;;  %v1347_v53 = vunpack.c.1.s8 %v339_v16  ;;  %v227_v37 = vld [vmem:[#allocation5 + $0x458] sm:$0xff] }
 0x138   :  { %3315 = vmatpush.bf16.msrb.mxu3 %v2899_v44  ;;  %v2699_v55 = vpack.c.bf16 %v1987_v48, %v1979_v46  ;;  %v2243_v54 = vcvt.s32.f32 %v1219_v3  ;;  %v939_v4 = vunpack.c.2.s8 %v235_v39  ;;  %v947_v61 = vunpack.c.3.s8 %v235_v39  ;;  %v259_v44 = vld [vmem:[#allocation5 + $0x558] sm:$0xff]  ;;  %v5401_v46 = vpop.f32.mrf.mxu2 }
 0x139   :  { %v2763_v59 = vpack.c.bf16 %v2115_v45, %v2107_v47  ;;  %v2363_v60 = vcvt.s32.f32 %v1339_v52  ;;  %v1067_v62 = vunpack.c.2.s8 %v5391_v22  ;;  %v2371_v1 = vcvt.s32.f32 %v1347_v53 }
 0x13a   :  { %3277 = vmatpush.bf16.msrb.mxu0 %v2699_v55  ;;  %v2827_v0 = vpack.c.bf16 %v2243_v54, %v2235_v51  ;;  %v1963_v29 = vcvt.s32.f32 %v939_v4  ;;  %v1971_v8 = vcvt.s32.f32 %v947_v61  ;;  %v1075_v10 = vunpack.c.3.s8 %v5391_v22  ;;  %v291_v51 = vld [vmem:[#allocation5 + $0x658] sm:$0xff] }
 0x13b   :  { %3290 = vmatpush.bf16.msrb.mxu1 %v2763_v59  ;;  %v2091_v12 = vcvt.s32.f32 %v1067_v62  ;;  %v2891_v13 = vpack.c.bf16 %v2371_v1, %v2363_v60  ;;  %v1195_v14 = vunpack.c.2.s8 %v299_v63  ;;  %v1203_v16 = vunpack.c.3.s8 %v299_v63  ;;  %v323_v60 = vld [vmem:[#allocation5 + $0x758] sm:$0xff] }
 0x13c   :  { %3303 = vmatpush.bf16.msrb.mxu2 %v2827_v0  ;;  %v2691_v30 = vpack.c.bf16 %v1971_v8, %v1963_v29  ;;  %v2099_v18 = vcvt.s32.f32 %v1075_v10  ;;  %v1323_v19 = vunpack.c.2.s8 %v331_v5  ;;  %v1331_v21 = vunpack.c.3.s8 %v331_v5 }
 0x13d   :  { %3316 = vmatpush.bf16.msrb.mxu3 %v2891_v13  ;;  %v2219_v41 = vcvt.s32.f32 %v1195_v14  ;;  %v2227_v15 = vcvt.s32.f32 %v1203_v16  ;;  %v923_v11 = vunpack.c.0.s8 %v235_v39  ;;  %v931_v27 = vunpack.c.1.s8 %v235_v39  ;;  %v5403_v39 = vpop.f32.mrf.mxu3 }
 0x13e   :  { %3278 = vmatpush.bf16.msrb.mxu0 %v2691_v30  ;;  %v2755_v23 = vpack.c.bf16 %v2099_v18, %v2091_v12  ;;  %v2347_v24 = vcvt.s32.f32 %v1323_v19  ;;  %v2355_v25 = vcvt.s32.f32 %v1331_v21  ;;  %v1051_v49 = vunpack.c.0.s8 %v5391_v22 }
 0x13f   :  { %v2819_v17 = vpack.c.bf16 %v2227_v15, %v2219_v41  ;;  %v1947_v20 = vcvt.s32.f32 %v923_v11  ;;  %v1955_v28 = vcvt.s32.f32 %v931_v27  ;;  %v1059_v33 = vunpack.c.1.s8 %v5391_v22 }
 0x140   :  { %3291 = vmatpush.bf16.msrb.mxu1 %v2755_v23  ;;  %v2883_v42 = vpack.c.bf16 %v2355_v25, %v2347_v24  ;;  %v1179_v36 = vunpack.c.0.s8 %v299_v63  ;;  %v2075_v40 = vcvt.s32.f32 %v1051_v49  ;;  %v1187_v43 = vunpack.c.1.s8 %v299_v63  ;;  %v3053_v23 = vpop.f32.mrf.mxu2  ;;  %v219_v49 = vld [vmem:[#allocation5 + $0x418] sm:$0xff] }
 0x141   :  { %3304 = vmatpush.bf16.msrb.mxu2 %v2819_v17  ;;  %v1307_v34 = vunpack.c.0.s8 %v331_v5  ;;  %v2683_v48 = vpack.c.bf16 %v1955_v28, %v1947_v20  ;;  %v2083_v3 = vcvt.s32.f32 %v1059_v33  ;;  %v1315_v45 = vunpack.c.1.s8 %v331_v5  ;;  %v251_v33 = vld [vmem:[#allocation5 + $0x518] sm:$0xff] }
 0x142   :  { %3317 = vmatpush.bf16.msrb.mxu3 %v2883_v42  ;;  %v2203_v47 = vcvt.s32.f32 %v1179_v36  ;;  %v2211_v52 = vcvt.s32.f32 %v1187_v43  ;;  %v907_v22 = vunpack.c.2.s8 %v227_v37  ;;  %v915_v4 = vunpack.c.3.s8 %v227_v37 }
 0x143   :  { %v2331_v55 = vcvt.s32.f32 %v1307_v34  ;;  %3279 = vmatpush.bf16.msrb.mxu0 %v2683_v48  ;;  %v2747_v54 = vpack.c.bf16 %v2083_v3, %v2075_v40  ;;  %v2339_v53 = vcvt.s32.f32 %v1315_v45  ;;  %v1035_v59 = vunpack.c.2.s8 %v259_v44  ;;  %v283_v45 = vld [vmem:[#allocation5 + $0x618] sm:$0xff] }
 0x144   :  { %v2811_v61 = vpack.c.bf16 %v2211_v52, %v2203_v47  ;;  %v1931_v62 = vcvt.s32.f32 %v907_v22  ;;  %v1043_v63 = vunpack.c.3.s8 %v259_v44  ;;  %v1163_v0 = vunpack.c.2.s8 %v291_v51 }
 0x145   :  { %3292 = vmatpush.bf16.msrb.mxu1 %v2747_v54  ;;  %v2875_v1 = vpack.c.bf16 %v2339_v53, %v2331_v55  ;;  %v1939_v29 = vcvt.s32.f32 %v915_v4  ;;  %v2059_v8 = vcvt.s32.f32 %v1035_v59  ;;  %v1171_v10 = vunpack.c.3.s8 %v291_v51  ;;  %v3066_v24 = vpop.f32.mrf.mxu3  ;;  %v315_v54 = vld [vmem:[#allocation5 + $0x718] sm:$0xff] }
 0x146   :  { %3305 = vmatpush.bf16.msrb.mxu2 %v2811_v61  ;;  %v2067_v5 = vcvt.s32.f32 %v1043_v63  ;;  %v2187_v12 = vcvt.s32.f32 %v1163_v0  ;;  %v1291_v13 = vunpack.c.2.s8 %v323_v60  ;;  %v1299_v14 = vunpack.c.3.s8 %v323_v60  ;;  %v5411_v24 = vld [vmem:[#allocation5 + $0xe0] sm:$0xff] }
 0x147   :  { %3318 = vmatpush.bf16.msrb.mxu3 %v2875_v1  ;;  %v2675_v16 = vpack.c.bf16 %v1939_v29, %v1931_v62  ;;  %v2195_v30 = vcvt.s32.f32 %v1171_v10  ;;  %v891_v18 = vunpack.c.0.s8 %v227_v37  ;;  %v899_v19 = vunpack.c.1.s8 %v227_v37  ;;  %v5405_v10 = vpop.f32.mrf.mxu0 }
 0x148   :  { %v2739_v21 = vpack.c.bf16 %v2067_v5, %v2059_v8  ;;  %v2315_v41 = vcvt.s32.f32 %v1291_v13  ;;  %v2323_v15 = vcvt.s32.f32 %v1299_v14  ;;  %v1019_v11 = vunpack.c.0.s8 %v259_v44  ;;  %v5407_v5 = vpop.f32.mrf.mxu1 }
 0x149   :  { %3280 = vmatpush.bf16.msrb.mxu0 %v2675_v16  ;;  %v2803_v25 = vpack.c.bf16 %v2195_v30, %v2187_v12  ;;  %v1915_v27 = vcvt.s32.f32 %v891_v18  ;;  %v1923_v17 = vcvt.s32.f32 %v899_v19  ;;  %v1027_v20 = vunpack.c.1.s8 %v259_v44 }
 0x14a   :  { %3293 = vmatpush.bf16.msrb.mxu1 %v2739_v21  ;;  %v2867_v50 = vpack.c.bf16 %v2323_v15, %v2315_v41  ;;  %v2043_v26 = vcvt.s32.f32 %v1019_v11  ;;  %v1147_v42 = vunpack.c.0.s8 %v291_v51  ;;  %v1155_v28 = vunpack.c.1.s8 %v291_v51 }
 0x14b   :  { %3306 = vmatpush.bf16.msrb.mxu2 %v2803_v25  ;;  %v2667_v36 = vpack.c.bf16 %v1923_v17, %v1915_v27  ;;  %v2051_v37 = vcvt.s32.f32 %v1027_v20  ;;  %v1275_v40 = vunpack.c.0.s8 %v323_v60  ;;  %v1283_v43 = vunpack.c.1.s8 %v323_v60 }
 0x14c   :  { %3319 = vmatpush.bf16.msrb.mxu3 %v2867_v50  ;;  %v2171_v34 = vcvt.s32.f32 %v1147_v42  ;;  %v2179_v48 = vcvt.s32.f32 %v1155_v28  ;;  %v875_v3 = vunpack.c.2.s8 %v219_v49  ;;  %v883_v47 = vunpack.c.3.s8 %v219_v49  ;;  %v5413_v42 = vld [vmem:[#allocation5 + $0x1e0] sm:$0xff]  ;;  %v5415_v28 = vpop.f32.mrf.mxu2 }
 0x14d   :  { %3281 = vmatpush.bf16.msrb.mxu0 %v2667_v36  ;;  %v2731_v44 = vpack.c.bf16 %v2051_v37, %v2043_v26  ;;  %v2299_v52 = vcvt.s32.f32 %v1275_v40  ;;  %v2307_v55 = vcvt.s32.f32 %v1283_v43  ;;  %v1003_v22 = vunpack.c.2.s8 %v251_v33  ;;  %v180_v43 = vld [vmem:[#allocation5 + $0x2e0] sm:$0xff] }
 0x14e   :  { %v2795_v53 = vpack.c.bf16 %v2179_v48, %v2171_v34  ;;  %v1899_v51 = vcvt.s32.f32 %v875_v3  ;;  %v1907_v4 = vcvt.s32.f32 %v883_v47  ;;  %v1011_v59 = vunpack.c.3.s8 %v251_v33 }
 0x14f   :  { %3294 = vmatpush.bf16.msrb.mxu1 %v2731_v44  ;;  %v2859_v61 = vpack.c.bf16 %v2307_v55, %v2299_v52  ;;  %v2027_v62 = vcvt.s32.f32 %v1003_v22  ;;  %v1131_v60 = vunpack.c.2.s8 %v283_v45  ;;  %v1139_v63 = vunpack.c.3.s8 %v283_v45 }
 0x150   :  { %3307 = vmatpush.bf16.msrb.mxu2 %v2795_v53  ;;  %v2659_v0 = vpack.c.bf16 %v1907_v4, %v1899_v51  ;;  %v2035_v1 = vcvt.s32.f32 %v1011_v59  ;;  %v1259_v29 = vunpack.c.2.s8 %v315_v54  ;;  %v1267_v8 = vunpack.c.3.s8 %v315_v54  ;;  %v3092_v53 = vpop.f32.mrf.mxu1 }
 0x151   :  { %3320 = vmatpush.bf16.msrb.mxu3 %v2859_v61  ;;  %v2155_v12 = vcvt.s32.f32 %v1131_v60  ;;  %v2163_v13 = vcvt.s32.f32 %v1139_v63  ;;  %v3039_v14 = vadd.f32 %v5395_v57, %v5393_v56  ;;  %v859_v16 = vunpack.c.0.s8 %v219_v49 }
 0x152   :  { %3282 = vmatpush.bf16.msrb.mxu0 %v2659_v0  ;;  %v2723_v30 = vpack.c.bf16 %v2035_v1, %v2027_v62  ;;  %v2283_v18 = vcvt.s32.f32 %v1259_v29  ;;  %v2291_v19 = vcvt.s32.f32 %v1267_v8  ;;  %v867_v21 = vunpack.c.1.s8 %v219_v49  ;;  %v5417_v49 = vpop.f32.mrf.mxu3 }
 0x153   :  { %v2787_v41 = vpack.c.bf16 %v2163_v13, %v2155_v12  ;;  %v1883_v15 = vcvt.s32.f32 %v859_v16  ;;  %v987_v11 = vunpack.c.0.s8 %v251_v33  ;;  %v995_v23 = vunpack.c.1.s8 %v251_v33 }
 0x154   :  { %3295 = vmatpush.bf16.msrb.mxu1 %v2723_v30  ;;  %v2851_v25 = vpack.c.bf16 %v2291_v19, %v2283_v18  ;;  %v1891_v27 = vcvt.s32.f32 %v867_v21  ;;  %v1115_v17 = vunpack.c.0.s8 %v283_v45  ;;  %v1123_v20 = vunpack.c.1.s8 %v283_v45  ;;  %v212_v45 = vld [vmem:[#allocation5 + $0x3e0] sm:$0xff] }
 0x155   :  { %3308 = vmatpush.bf16.msrb.mxu2 %v2787_v41  ;;  %v2011_v50 = vcvt.s32.f32 %v987_v11  ;;  %v2019_v56 = vcvt.s32.f32 %v995_v23  ;;  %v1243_v57 = vunpack.c.0.s8 %v315_v54  ;;  %v1251_v26 = vunpack.c.1.s8 %v315_v54  ;;  %v3079_v54 = vpop.f32.mrf.mxu0 }
 0x156   :  { %3321 = vmatpush.bf16.msrb.mxu3 %v2851_v25  ;;  %v2651_v33 = vpack.c.bf16 %v1891_v27, %v1883_v15  ;;  %v2139_v36 = vcvt.s32.f32 %v1115_v17  ;;  %v2147_v37 = vcvt.s32.f32 %v1123_v20  ;;  %v460_v40 = vunpack.c.2.s8 %v5411_v24  ;;  %v3105_v15 = vpop.f32.mrf.mxu2 }
 0x157   :  { %v2715_v34 = vpack.c.bf16 %v2019_v56, %v2011_v50  ;;  %v2267_v48 = vcvt.s32.f32 %v1243_v57  ;;  %v2275_v3 = vcvt.s32.f32 %v1251_v26  ;;  %v468_v47 = vunpack.c.3.s8 %v5411_v24  ;;  %v140_v57 = vld [vmem:[#allocation5 + $0x1a0] sm:$0xff] }
 0x158   :  { %3283 = vmatpush.bf16.msrb.mxu0 %v2651_v33  ;;  %v2779_v44 = vpack.c.bf16 %v2147_v37, %v2139_v36  ;;  %v1484_v52 = vcvt.s32.f32 %v460_v40  ;;  %v588_v55 = vunpack.c.2.s8 %v5413_v42  ;;  %v596_v22 = vunpack.c.3.s8 %v5413_v42  ;;  %v172_v37 = vld [vmem:[#allocation5 + $0x2a0] sm:$0xff] }
 0x159   :  { %3296 = vmatpush.bf16.msrb.mxu1 %v2715_v34  ;;  %v2843_v51 = vpack.c.bf16 %v2275_v3, %v2267_v48  ;;  %v1492_v4 = vcvt.s32.f32 %v468_v47  ;;  %v716_v59 = vunpack.c.2.s8 %v180_v43  ;;  %v724_v61 = vunpack.c.3.s8 %v180_v43  ;;  %v204_v47 = vld [vmem:[#allocation5 + $0x3a0] sm:$0xff] }
 0x15a   :  { %3309 = vmatpush.bf16.msrb.mxu2 %v2779_v44  ;;  %v1612_v62 = vcvt.s32.f32 %v588_v55  ;;  %v1620_v60 = vcvt.s32.f32 %v596_v22  ;;  %v844_v63 = vunpack.c.2.s8 %v212_v45  ;;  %v852_v0 = vunpack.c.3.s8 %v212_v45  ;;  %v3118_v11 = vpop.f32.mrf.mxu3  ;;  %v100_v15 = vld [vmem:[#allocation5 + $0x60] sm:$0xff] }
 0x15b   :  { %3322 = vmatpush.bf16.msrb.mxu3 %v2843_v51  ;;  %v2452_v1 = vpack.c.bf16 %v1492_v4, %v1484_v52  ;;  %v1740_v29 = vcvt.s32.f32 %v716_v59  ;;  %v1748_v8 = vcvt.s32.f32 %v724_v61  ;;  %v3052_v12 = vadd.f32 %v5401_v46, %v3039_v14  ;;  %3284 = vmatmul.bf16.vlgmr.msrb.gmra.mxu0 %v5312_v7  ;;  %v108_v14 = vld [vmem:[#allocation5 + $0xa0] sm:$0xff] }
 0x15c   :  { %v2516_v13 = vpack.c.bf16 %v1620_v60, %v1612_v62  ;;  %v1868_v16 = vcvt.s32.f32 %v844_v63  ;;  %v1876_v30 = vcvt.s32.f32 %v852_v0  ;;  %v444_v18 = vunpack.c.0.s8 %v5411_v24  ;;  %3297 = vmatmul.bf16.vlgmr.msrb.gmra.mxu1 %v5321_v32 }
 0x15d   :  { %3328 = vmatpush.bf16.msra.mxu0 %v2452_v1  ;;  %v2580_v19 = vpack.c.bf16 %v1748_v8, %v1740_v29  ;;  %3310 = vmatmul.bf16.vlgmr.msrb.gmra.mxu2 %v5310_v2  ;;  %v5429_v21 = vadd.f32 %v5403_v39, %v3052_v12  ;;  %v452_v41 = vunpack.c.1.s8 %v5411_v24  ;;  %v572_v46 = vunpack.c.0.s8 %v5413_v42 }
 0x15e   :  { %3341 = vmatpush.bf16.msra.mxu1 %v2516_v13  ;;  %v2644_v23 = vpack.c.bf16 %v1876_v30, %v1868_v16  ;;  %3323 = vmatmul.bf16.vlgmr.msrb.gmra.mxu3 %v5315_v9  ;;  %v1468_v25 = vcvt.s32.f32 %v444_v18  ;;  %v580_v27 = vunpack.c.1.s8 %v5413_v42  ;;  %v700_v17 = vunpack.c.0.s8 %v180_v43 }
 0x15f   :  { %3354 = vmatpush.bf16.msra.mxu2 %v2580_v19  ;;  %v1476_v20 = vcvt.s32.f32 %v452_v41  ;;  %v1596_v50 = vcvt.s32.f32 %v572_v46  ;;  %v708_v39 = vunpack.c.1.s8 %v180_v43  ;;  %v828_v56 = vunpack.c.0.s8 %v212_v45 }
 0x160   :  { %3367 = vmatpush.bf16.msra.mxu3 %v2644_v23  ;;  %v1604_v24 = vcvt.s32.f32 %v580_v27  ;;  %v1724_v26 = vcvt.s32.f32 %v700_v17  ;;  %v836_v33 = vunpack.c.1.s8 %v212_v45  ;;  %v428_v36 = vunpack.c.2.s8 %v108_v14  ;;  %v132_v17 = vld [vmem:[#allocation5 + $0x160] sm:$0xff] }
 0x161   :  { %v2444_v40 = vpack.c.bf16 %v1476_v20, %v1468_v25  ;;  %v1732_v34 = vcvt.s32.f32 %v708_v39  ;;  %v1852_v48 = vcvt.s32.f32 %v828_v56  ;;  %v436_v3 = vunpack.c.3.s8 %v108_v14 }
 0x162   :  { %v2508_v44 = vpack.c.bf16 %v1604_v24, %v1596_v50  ;;  %v1860_v42 = vcvt.s32.f32 %v836_v33  ;;  %v1452_v52 = vcvt.s32.f32 %v428_v36  ;;  %v556_v55 = vunpack.c.2.s8 %v140_v57  ;;  %v164_v33 = vld [vmem:[#allocation5 + $0x260] sm:$0xff] }
 0x163   :  { %3329 = vmatpush.bf16.msra.mxu0 %v2444_v40  ;;  %v2572_v22 = vpack.c.bf16 %v1732_v34, %v1724_v26  ;;  %v1460_v43 = vcvt.s32.f32 %v436_v3  ;;  %v564_v54 = vunpack.c.3.s8 %v140_v57  ;;  %v684_v53 = vunpack.c.2.s8 %v172_v37 }
 0x164   :  { %3342 = vmatpush.bf16.msra.mxu1 %v2508_v44  ;;  %v2636_v51 = vpack.c.bf16 %v1860_v42, %v1852_v48  ;;  %v1580_v4 = vcvt.s32.f32 %v556_v55  ;;  %v692_v45 = vunpack.c.3.s8 %v172_v37  ;;  %v812_v59 = vunpack.c.2.s8 %v204_v47 }
 0x165   :  { %3355 = vmatpush.bf16.msra.mxu2 %v2572_v22  ;;  %v2436_v61 = vpack.c.bf16 %v1460_v43, %v1452_v52  ;;  %v1588_v62 = vcvt.s32.f32 %v564_v54  ;;  %v1708_v60 = vcvt.s32.f32 %v684_v53  ;;  %v820_v63 = vunpack.c.3.s8 %v204_v47 }
 0x166   :  { %3368 = vmatpush.bf16.msra.mxu3 %v2636_v51  ;;  %v1716_v0 = vcvt.s32.f32 %v692_v45  ;;  %v1836_v1 = vcvt.s32.f32 %v812_v59  ;;  %v412_v29 = vunpack.c.0.s8 %v108_v14  ;;  %v420_v8 = vunpack.c.1.s8 %v108_v14 }
 0x167   :  { %3330 = vmatpush.bf16.msra.mxu0 %v2436_v61  ;;  %v2500_v12 = vpack.c.bf16 %v1588_v62, %v1580_v4  ;;  %v1844_v13 = vcvt.s32.f32 %v820_v63  ;;  %v540_v16 = vunpack.c.0.s8 %v140_v57  ;;  %v548_v30 = vunpack.c.1.s8 %v140_v57 }
 0x168   :  { %v2564_v18 = vpack.c.bf16 %v1716_v0, %v1708_v60  ;;  %v1436_v19 = vcvt.s32.f32 %v412_v29  ;;  %v1444_v41 = vcvt.s32.f32 %v420_v8  ;;  %v668_v46 = vunpack.c.0.s8 %v172_v37 }
 0x169   :  { %3343 = vmatpush.bf16.msra.mxu1 %v2500_v12  ;;  %v2628_v11 = vpack.c.bf16 %v1844_v13, %v1836_v1  ;;  %v1564_v23 = vcvt.s32.f32 %v540_v16  ;;  %v1572_v25 = vcvt.s32.f32 %v548_v30  ;;  %v676_v27 = vunpack.c.1.s8 %v172_v37  ;;  %v196_v37 = vld [vmem:[#allocation5 + $0x360] sm:$0xff] }
 0x16a   :  { %3356 = vmatpush.bf16.msra.mxu2 %v2564_v18  ;;  %v2428_v20 = vpack.c.bf16 %v1444_v41, %v1436_v19  ;;  %v1692_v50 = vcvt.s32.f32 %v668_v46  ;;  %v796_v14 = vunpack.c.0.s8 %v204_v47  ;;  %v804_v39 = vunpack.c.1.s8 %v204_v47 }
 0x16b   :  { %3369 = vmatpush.bf16.msra.mxu3 %v2628_v11  ;;  %v2492_v56 = vpack.c.bf16 %v1572_v25, %v1564_v23  ;;  %v1700_v24 = vcvt.s32.f32 %v676_v27  ;;  %v3078_v57 = vadd.f32 %v5405_v10, %v5429_v21  ;;  %v396_v26 = vunpack.c.2.s8 %v100_v15  ;;  %v124_v25 = vld [vmem:[#allocation5 + $0x120] sm:$0xff] }
 0x16c   :  { %3331 = vmatpush.bf16.msra.mxu0 %v2428_v20  ;;  %v1820_v36 = vcvt.s32.f32 %v796_v14  ;;  %v1828_v40 = vcvt.s32.f32 %v804_v39  ;;  %v404_v34 = vunpack.c.3.s8 %v100_v15  ;;  %v524_v48 = vunpack.c.2.s8 %v132_v17  ;;  %v156_v39 = vld [vmem:[#allocation5 + $0x220] sm:$0xff] }
 0x16d   :  { %3344 = vmatpush.bf16.msra.mxu1 %v2492_v56  ;;  %v2556_v3 = vpack.c.bf16 %v1700_v24, %v1692_v50  ;;  %v3091_v44 = vadd.f32 %v5407_v5, %v3078_v57  ;;  %v1420_v42 = vcvt.s32.f32 %v396_v26  ;;  %v532_v47 = vunpack.c.3.s8 %v132_v17 }
 0x16e   :  { %v2620_v52 = vpack.c.bf16 %v1828_v40, %v1820_v36  ;;  %v1428_v55 = vcvt.s32.f32 %v404_v34  ;;  %v1548_v22 = vcvt.s32.f32 %v524_v48  ;;  %v652_v43 = vunpack.c.2.s8 %v164_v33  ;;  %v188_v36 = vld [vmem:[#allocation5 + $0x320] sm:$0xff] }
 0x16f   :  { %3357 = vmatpush.bf16.msra.mxu2 %v2556_v3  ;;  %v1556_v10 = vcvt.s32.f32 %v532_v47  ;;  %v660_v21 = vunpack.c.3.s8 %v164_v33  ;;  %v780_v54 = vunpack.c.2.s8 %v196_v37  ;;  %v788_v53 = vunpack.c.3.s8 %v196_v37 }
 0x170   :  { %3370 = vmatpush.bf16.msra.mxu3 %v2620_v52  ;;  %v2420_v51 = vpack.c.bf16 %v1428_v55, %v1420_v42  ;;  %v1676_v4 = vcvt.s32.f32 %v652_v43  ;;  %v3104_v45 = vadd.f32 %v5415_v28, %v3091_v44  ;;  %v380_v59 = vunpack.c.0.s8 %v100_v15  ;;  %v92_v28 = vld [vmem:[#allocation5 + $0x20] sm:$0xff] }
 0x171   :  { %v2484_v61 = vpack.c.bf16 %v1556_v10, %v1548_v22  ;;  %v1684_v62 = vcvt.s32.f32 %v660_v21  ;;  %v1804_v5 = vcvt.s32.f32 %v780_v54  ;;  %v1812_v60 = vcvt.s32.f32 %v788_v53 }
 0x172   :  { %3332 = vmatpush.bf16.msra.mxu0 %v2420_v51  ;;  %v5440_v63 = vadd.f32 %v5417_v49, %v3104_v45  ;;  %v388_v0 = vunpack.c.1.s8 %v100_v15  ;;  %v1404_v1 = vcvt.s32.f32 %v380_v59  ;;  %v508_v29 = vunpack.c.0.s8 %v132_v17 }
 0x173   :  { %3345 = vmatpush.bf16.msra.mxu1 %v2484_v61  ;;  %v2548_v8 = vpack.c.bf16 %v1684_v62, %v1676_v4  ;;  %v2612_v12 = vpack.c.bf16 %v1812_v60, %v1804_v5  ;;  %v516_v13 = vunpack.c.1.s8 %v132_v17  ;;  %v636_v16 = vunpack.c.0.s8 %v164_v33  ;;  %v244_v60 = vld [vmem:[#allocation5 + $0x4e0] sm:$0xff] }
 0x174   :  { %v1412_v30 = vcvt.s32.f32 %v388_v0  ;;  %v1532_v18 = vcvt.s32.f32 %v508_v29  ;;  %v644_v41 = vunpack.c.1.s8 %v164_v33  ;;  %v764_v11 = vunpack.c.0.s8 %v196_v37  ;;  %v276_v29 = vld [vmem:[#allocation5 + $0x5e0] sm:$0xff] }
 0x175   :  { %3358 = vmatpush.bf16.msra.mxu2 %v2548_v8  ;;  %3371 = vmatpush.bf16.msra.mxu3 %v2612_v12  ;;  %v1540_v19 = vcvt.s32.f32 %v516_v13  ;;  %v1660_v46 = vcvt.s32.f32 %v636_v16  ;;  %v772_v49 = vunpack.c.1.s8 %v196_v37  ;;  %v364_v50 = vunpack.c.2.s8 %v92_v28 }
 0x176   :  { %v2412_v23 = vpack.c.bf16 %v1412_v30, %v1404_v1  ;;  %v1668_v27 = vcvt.s32.f32 %v644_v41  ;;  %v1788_v20 = vcvt.s32.f32 %v764_v11  ;;  %v372_v17 = vunpack.c.3.s8 %v92_v28 }
 0x177   :  { %v2476_v15 = vpack.c.bf16 %v1540_v19, %v1532_v18  ;;  %v1796_v14 = vcvt.s32.f32 %v772_v49  ;;  %v1388_v24 = vcvt.s32.f32 %v364_v50  ;;  %v492_v57 = vunpack.c.2.s8 %v124_v25  ;;  %v308_v19 = vld [vmem:[#allocation5 + $0x6e0] sm:$0xff] }
 0x178   :  { %3333 = vmatpush.bf16.msra.mxu0 %v2412_v23  ;;  %v2540_v56 = vpack.c.bf16 %v1668_v27, %v1660_v46  ;;  %v500_v26 = vunpack.c.3.s8 %v124_v25  ;;  %v1396_v40 = vcvt.s32.f32 %v372_v17  ;;  %v620_v37 = vunpack.c.2.s8 %v156_v39  ;;  %v340_v49 = vld [vmem:[#allocation5 + $0x7e0] sm:$0xff] }
 0x179   :  { %3346 = vmatpush.bf16.msra.mxu1 %v2476_v15  ;;  %v2604_v33 = vpack.c.bf16 %v1796_v14, %v1788_v20  ;;  %v1516_v34 = vcvt.s32.f32 %v492_v57  ;;  %v628_v3 = vunpack.c.3.s8 %v156_v39  ;;  %v748_v42 = vunpack.c.2.s8 %v188_v36 }
 0x17a   :  { %3359 = vmatpush.bf16.msra.mxu2 %v2540_v56  ;;  %v1524_v48 = vcvt.s32.f32 %v500_v26  ;;  %v2404_v44 = vpack.c.bf16 %v1396_v40, %v1388_v24  ;;  %v1644_v52 = vcvt.s32.f32 %v620_v37  ;;  %v756_v22 = vunpack.c.3.s8 %v188_v36 }
 0x17b   :  { %3372 = vmatpush.bf16.msra.mxu3 %v2604_v33  ;;  %v1652_v55 = vcvt.s32.f32 %v628_v3  ;;  %v1772_v43 = vcvt.s32.f32 %v748_v42  ;;  %v348_v10 = vunpack.c.0.s8 %v92_v28  ;;  %v356_v53 = vunpack.c.1.s8 %v92_v28 }
 0x17c   :  { %v2468_v47 = vpack.c.bf16 %v1524_v48, %v1516_v34  ;;  %3334 = vmatpush.bf16.msra.mxu0 %v2404_v44  ;;  %v1780_v54 = vcvt.s32.f32 %v756_v22  ;;  %v476_v51 = vunpack.c.0.s8 %v124_v25  ;;  %v484_v45 = vunpack.c.1.s8 %v124_v25  ;;  %v236_v22 = vld [vmem:[#allocation5 + $0x4a0] sm:$0xff] }
 0x17d   :  { %v2532_v21 = vpack.c.bf16 %v1652_v55, %v1644_v52  ;;  %v1372_v4 = vcvt.s32.f32 %v348_v10  ;;  %v1380_v61 = vcvt.s32.f32 %v356_v53  ;;  %v604_v5 = vunpack.c.0.s8 %v156_v39  ;;  %v268_v53 = vld [vmem:[#allocation5 + $0x5a0] sm:$0xff] }
 0x17e   :  { %3347 = vmatpush.bf16.msra.mxu1 %v2468_v47  ;;  %v2596_v59 = vpack.c.bf16 %v1780_v54, %v1772_v43  ;;  %v1500_v62 = vcvt.s32.f32 %v476_v51  ;;  %v1508_v0 = vcvt.s32.f32 %v484_v45  ;;  %v612_v1 = vunpack.c.1.s8 %v156_v39 }
 0x17f   :  { %3360 = vmatpush.bf16.msra.mxu2 %v2532_v21  ;;  %v2396_v8 = vpack.c.bf16 %v1380_v61, %v1372_v4  ;;  %v1628_v12 = vcvt.s32.f32 %v604_v5  ;;  %v732_v13 = vunpack.c.0.s8 %v188_v36  ;;  %v740_v16 = vunpack.c.1.s8 %v188_v36 }
 0x180   :  { %3373 = vmatpush.bf16.msra.mxu3 %v2596_v59  ;;  %v2460_v30 = vpack.c.bf16 %v1508_v0, %v1500_v62  ;;  %v1636_v18 = vcvt.s32.f32 %v612_v1  ;;  %v972_v28 = vunpack.c.2.s8 %v244_v60  ;;  %v980_v11 = vunpack.c.3.s8 %v244_v60  ;;  %v5446_v0 = vpop.f32.mrf.mxu0  ;;  %v5448_v1 = vpop.f32.mrf.mxu1 }
 0x181   :  { %3335 = vmatpush.bf16.msra.mxu0 %v2396_v8  ;;  %v1756_v41 = vcvt.s32.f32 %v732_v13  ;;  %v1764_v46 = vcvt.s32.f32 %v740_v16  ;;  %v1100_v23 = vunpack.c.2.s8 %v276_v29  ;;  %v1108_v27 = vunpack.c.3.s8 %v276_v29  ;;  %v300_v16 = vld [vmem:[#allocation5 + $0x6a0] sm:$0xff] }
 0x182   :  { %3348 = vmatpush.bf16.msra.mxu1 %v2460_v30  ;;  %v2524_v25 = vpack.c.bf16 %v1636_v18, %v1628_v12  ;;  %v1996_v15 = vcvt.s32.f32 %v972_v28  ;;  %v2004_v50 = vcvt.s32.f32 %v980_v11  ;;  %v1228_v17 = vunpack.c.2.s8 %v308_v19  ;;  %v332_v30 = vld [vmem:[#allocation5 + $0x7a0] sm:$0xff] }
 0x183   :  { %v2588_v20 = vpack.c.bf16 %v1764_v46, %v1756_v41  ;;  %v2124_v14 = vcvt.s32.f32 %v1100_v23  ;;  %v2132_v39 = vcvt.s32.f32 %v1108_v27  ;;  %v1236_v56 = vunpack.c.3.s8 %v308_v19 }
 0x184   :  { %3361 = vmatpush.bf16.msra.mxu2 %v2524_v25  ;;  %v1356_v24 = vunpack.c.2.s8 %v340_v49  ;;  %3336 = vmatmul.bf16.vlgmr.msra.gmra.mxu0 %v5293_v31  ;;  %v2708_v57 = vpack.c.bf16 %v2004_v50, %v1996_v15  ;;  %v2252_v26 = vcvt.s32.f32 %v1228_v17  ;;  %v1364_v36 = vunpack.c.3.s8 %v340_v49 }
 0x185   :  { %3374 = vmatpush.bf16.msra.mxu3 %v2588_v20  ;;  %v956_v33 = vunpack.c.0.s8 %v244_v60  ;;  %3349 = vmatmul.bf16.vlgmr.msra.gmra.mxu1 %v5298_v38  ;;  %v2772_v40 = vpack.c.bf16 %v2132_v39, %v2124_v14  ;;  %v2260_v34 = vcvt.s32.f32 %v1236_v56  ;;  %v964_v3 = vunpack.c.1.s8 %v244_v60 }
 0x186   :  { %3380 = vmatpush.bf16.msrb.mxu0 %v2708_v57  ;;  %v2380_v48 = vcvt.s32.f32 %v1356_v24  ;;  %v2388_v37 = vcvt.s32.f32 %v1364_v36  ;;  %v1084_v47 = vunpack.c.0.s8 %v276_v29  ;;  %v1092_v52 = vunpack.c.1.s8 %v276_v29 }
 0x187   :  { %v1980_v44 = vcvt.s32.f32 %v956_v33  ;;  %3362 = vmatmul.bf16.vlgmr.msra.gmra.mxu2 %v5284_v6  ;;  %3393 = vmatpush.bf16.msrb.mxu1 %v2772_v40  ;;  %v2836_v42 = vpack.c.bf16 %v2260_v34, %v2252_v26  ;;  %v1212_v55 = vunpack.c.0.s8 %v308_v19  ;;  %v1988_v10 = vcvt.s32.f32 %v964_v3 }
 0x188   :  { %3375 = vmatmul.bf16.vlgmr.msra.gmra.mxu3 %v5295_v35  ;;  %v2900_v43 = vpack.c.bf16 %v2388_v37, %v2380_v48  ;;  %v1220_v21 = vunpack.c.1.s8 %v308_v19  ;;  %v1340_v54 = vunpack.c.0.s8 %v340_v49  ;;  %v2108_v51 = vcvt.s32.f32 %v1084_v47  ;;  %v3131_v34 = vpop.f32.mrf.mxu0  ;;  %v3144_v48 = vpop.f32.mrf.mxu1  ;;  %v228_v47 = vld [vmem:[#allocation5 + $0x460] sm:$0xff] }
 0x189   :  { %3406 = vmatpush.bf16.msrb.mxu2 %v2836_v42  ;;  %v2116_v4 = vcvt.s32.f32 %v1092_v52  ;;  %v2236_v45 = vcvt.s32.f32 %v1212_v55  ;;  %v1348_v59 = vunpack.c.1.s8 %v340_v49  ;;  %v2700_v61 = vpack.c.bf16 %v1988_v10, %v1980_v44  ;;  %v5450_v10 = vpop.f32.mrf.mxu2 }
 0x18a   :  { %3419 = vmatpush.bf16.msrb.mxu3 %v2900_v43  ;;  %v2244_v62 = vcvt.s32.f32 %v1220_v21  ;;  %v2364_v5 = vcvt.s32.f32 %v1340_v54  ;;  %v940_v60 = vunpack.c.2.s8 %v236_v22  ;;  %v948_v12 = vunpack.c.3.s8 %v236_v22  ;;  %v5452_v21 = vpop.f32.mrf.mxu3 }
 0x18b   :  { %v2764_v29 = vpack.c.bf16 %v2116_v4, %v2108_v51  ;;  %v2372_v8 = vcvt.s32.f32 %v1348_v59  ;;  %v1068_v13 = vunpack.c.2.s8 %v268_v53  ;;  %3381 = vmatpush.bf16.msrb.mxu0 %v2700_v61  ;;  %v1076_v46 = vunpack.c.3.s8 %v268_v53  ;;  %v260_v4 = vld [vmem:[#allocation5 + $0x560] sm:$0xff] }
 0x18c   :  { %v2828_v18 = vpack.c.bf16 %v2244_v62, %v2236_v45  ;;  %v1964_v28 = vcvt.s32.f32 %v940_v60  ;;  %v1972_v41 = vcvt.s32.f32 %v948_v12  ;;  %v1196_v23 = vunpack.c.2.s8 %v300_v16  ;;  %v292_v45 = vld [vmem:[#allocation5 + $0x660] sm:$0xff] }
 0x18d   :  { %3394 = vmatpush.bf16.msrb.mxu1 %v2764_v29  ;;  %v2892_v19 = vpack.c.bf16 %v2372_v8, %v2364_v5  ;;  %v2092_v11 = vcvt.s32.f32 %v1068_v13  ;;  %v1204_v49 = vunpack.c.3.s8 %v300_v16  ;;  %v1324_v25 = vunpack.c.2.s8 %v332_v30  ;;  %v324_v5 = vld [vmem:[#allocation5 + $0x760] sm:$0xff] }
 0x18e   :  { %3407 = vmatpush.bf16.msrb.mxu2 %v2828_v18  ;;  %v2692_v15 = vpack.c.bf16 %v1972_v41, %v1964_v28  ;;  %v2100_v27 = vcvt.s32.f32 %v1076_v46  ;;  %v1332_v20 = vunpack.c.3.s8 %v332_v30  ;;  %v924_v50 = vunpack.c.0.s8 %v236_v22 }
 0x18f   :  { %3420 = vmatpush.bf16.msrb.mxu3 %v2892_v19  ;;  %v2220_v14 = vcvt.s32.f32 %v1196_v23  ;;  %v2228_v17 = vcvt.s32.f32 %v1204_v49  ;;  %v2348_v39 = vcvt.s32.f32 %v1324_v25  ;;  %v932_v57 = vunpack.c.1.s8 %v236_v22 }
 0x190   :  { %3382 = vmatpush.bf16.msrb.mxu0 %v2692_v15  ;;  %v2756_v56 = vpack.c.bf16 %v2100_v27, %v2092_v11  ;;  %v2356_v24 = vcvt.s32.f32 %v1332_v20  ;;  %v1948_v26 = vcvt.s32.f32 %v924_v50  ;;  %v1052_v33 = vunpack.c.0.s8 %v268_v53 }
 0x191   :  { %v2820_v36 = vpack.c.bf16 %v2228_v17, %v2220_v14  ;;  %v1060_v40 = vunpack.c.1.s8 %v268_v53  ;;  %v1956_v3 = vcvt.s32.f32 %v932_v57  ;;  %v1180_v44 = vunpack.c.0.s8 %v300_v16 }
 0x192   :  { %3395 = vmatpush.bf16.msrb.mxu1 %v2756_v56  ;;  %v2884_v37 = vpack.c.bf16 %v2356_v24, %v2348_v39  ;;  %v1188_v42 = vunpack.c.1.s8 %v300_v16  ;;  %v2076_v52 = vcvt.s32.f32 %v1052_v33  ;;  %v1308_v43 = vunpack.c.0.s8 %v332_v30  ;;  %v3157_v56 = vpop.f32.mrf.mxu2  ;;  %v3170_v24 = vpop.f32.mrf.mxu3 }
 0x193   :  { %3408 = vmatpush.bf16.msrb.mxu2 %v2820_v36  ;;  %v2084_v55 = vcvt.s32.f32 %v1060_v40  ;;  %v2684_v22 = vpack.c.bf16 %v1956_v3, %v1948_v26  ;;  %v2204_v54 = vcvt.s32.f32 %v1180_v44  ;;  %v1316_v51 = vunpack.c.1.s8 %v332_v30  ;;  %v220_v40 = vld [vmem:[#allocation5 + $0x420] sm:$0xff] }
 0x194   :  { %3421 = vmatpush.bf16.msrb.mxu3 %v2884_v37  ;;  %v2212_v53 = vcvt.s32.f32 %v1188_v42  ;;  %v2332_v61 = vcvt.s32.f32 %v1308_v43  ;;  %v908_v62 = vunpack.c.2.s8 %v228_v47  ;;  %v916_v8 = vunpack.c.3.s8 %v228_v47  ;;  %v252_v44 = vld [vmem:[#allocation5 + $0x520] sm:$0xff] }
 0x195   :  { %v2748_v59 = vpack.c.bf16 %v2084_v55, %v2076_v52  ;;  %3383 = vmatpush.bf16.msrb.mxu0 %v2684_v22  ;;  %v2340_v29 = vcvt.s32.f32 %v1316_v51  ;;  %v1036_v13 = vunpack.c.2.s8 %v260_v4  ;;  %v1044_v16 = vunpack.c.3.s8 %v260_v4  ;;  %v284_v51 = vld [vmem:[#allocation5 + $0x620] sm:$0xff] }
 0x196   :  { %v2812_v60 = vpack.c.bf16 %v2212_v53, %v2204_v54  ;;  %v1932_v12 = vcvt.s32.f32 %v908_v62  ;;  %v1164_v18 = vunpack.c.2.s8 %v292_v45  ;;  %v1940_v19 = vcvt.s32.f32 %v916_v8 }
 0x197   :  { %3396 = vmatpush.bf16.msrb.mxu1 %v2748_v59  ;;  %v2876_v28 = vpack.c.bf16 %v2340_v29, %v2332_v61  ;;  %v1172_v41 = vunpack.c.3.s8 %v292_v45  ;;  %v1292_v30 = vunpack.c.2.s8 %v324_v5  ;;  %v2060_v46 = vcvt.s32.f32 %v1036_v13 }
 0x198   :  { %3409 = vmatpush.bf16.msrb.mxu2 %v2812_v60  ;;  %v2068_v11 = vcvt.s32.f32 %v1044_v16  ;;  %v2188_v23 = vcvt.s32.f32 %v1164_v18  ;;  %v1300_v49 = vunpack.c.3.s8 %v324_v5  ;;  %v2676_v25 = vpack.c.bf16 %v1940_v19, %v1932_v12  ;;  %v316_v60 = vld [vmem:[#allocation5 + $0x720] sm:$0xff] }
 0x199   :  { %3422 = vmatpush.bf16.msrb.mxu3 %v2876_v28  ;;  %v2196_v15 = vcvt.s32.f32 %v1172_v41  ;;  %v2316_v27 = vcvt.s32.f32 %v1292_v30  ;;  %v892_v20 = vunpack.c.0.s8 %v228_v47  ;;  %v900_v17 = vunpack.c.1.s8 %v228_v47 }
 0x19a   :  { %v2740_v50 = vpack.c.bf16 %v2068_v11, %v2060_v46  ;;  %v2324_v14 = vcvt.s32.f32 %v1300_v49  ;;  %v1020_v39 = vunpack.c.0.s8 %v260_v4  ;;  %3384 = vmatpush.bf16.msrb.mxu0 %v2676_v25  ;;  %v1028_v36 = vunpack.c.1.s8 %v260_v4  ;;  %v5454_v46 = vpop.f32.mrf.mxu0  ;;  %v5456_v11 = vpop.f32.mrf.mxu1 }
 0x19b   :  { %v2804_v57 = vpack.c.bf16 %v2196_v15, %v2188_v23  ;;  %v1916_v26 = vcvt.s32.f32 %v892_v20  ;;  %v1148_v33 = vunpack.c.0.s8 %v292_v45  ;;  %v1924_v48 = vcvt.s32.f32 %v900_v17 }
 0x19c   :  { %3397 = vmatpush.bf16.msrb.mxu1 %v2740_v50  ;;  %v2868_v34 = vpack.c.bf16 %v2324_v14, %v2316_v27  ;;  %v2044_v37 = vcvt.s32.f32 %v1020_v39  ;;  %v1156_v3 = vunpack.c.1.s8 %v292_v45  ;;  %v2052_v42 = vcvt.s32.f32 %v1028_v36 }
 0x19d   :  { %3410 = vmatpush.bf16.msrb.mxu2 %v2804_v57  ;;  %v2172_v52 = vcvt.s32.f32 %v1148_v33  ;;  %v1276_v55 = vunpack.c.0.s8 %v324_v5  ;;  %v1284_v47 = vunpack.c.1.s8 %v324_v5  ;;  %v2668_v43 = vpack.c.bf16 %v1924_v48, %v1916_v26  ;;  %v5460_v57 = vld [vmem:[#allocation5 + $0xe8] sm:$0xff] }
 0x19e   :  { %3423 = vmatpush.bf16.msrb.mxu3 %v2868_v34  ;;  %v2180_v22 = vcvt.s32.f32 %v1156_v3  ;;  %v876_v54 = vunpack.c.2.s8 %v220_v40  ;;  %v884_v53 = vunpack.c.3.s8 %v220_v40  ;;  %v2732_v4 = vpack.c.bf16 %v2052_v42, %v2044_v37  ;;  %v5462_v3 = vld [vmem:[#allocation5 + $0x1e8] sm:$0xff]  ;;  %v5464_v42 = vpop.f32.mrf.mxu2 }
 0x19f   :  { %v2300_v59 = vcvt.s32.f32 %v1276_v55  ;;  %v2308_v61 = vcvt.s32.f32 %v1284_v47  ;;  %v1004_v62 = vunpack.c.2.s8 %v252_v44  ;;  %3385 = vmatpush.bf16.msrb.mxu0 %v2668_v43  ;;  %v1012_v12 = vunpack.c.3.s8 %v252_v44  ;;  %v181_v43 = vld [vmem:[#allocation5 + $0x2e8] sm:$0xff] }
 0x1a0   :  { %v2796_v29 = vpack.c.bf16 %v2180_v22, %v2172_v52  ;;  %v1900_v45 = vcvt.s32.f32 %v876_v54  ;;  %v1908_v8 = vcvt.s32.f32 %v884_v53  ;;  %3398 = vmatpush.bf16.msrb.mxu1 %v2732_v4  ;;  %v1132_v5 = vunpack.c.2.s8 %v284_v51  ;;  %v213_v4 = vld [vmem:[#allocation5 + $0x3e8] sm:$0xff] }
 0x1a1   :  { %v2860_v13 = vpack.c.bf16 %v2308_v61, %v2300_v59  ;;  %v2028_v16 = vcvt.s32.f32 %v1004_v62  ;;  %v1140_v18 = vunpack.c.3.s8 %v284_v51  ;;  %v2036_v19 = vcvt.s32.f32 %v1012_v12 }
 0x1a2   :  { %3411 = vmatpush.bf16.msrb.mxu2 %v2796_v29  ;;  %v2660_v28 = vpack.c.bf16 %v1908_v8, %v1900_v45  ;;  %v1260_v41 = vunpack.c.2.s8 %v316_v60  ;;  %v1268_v30 = vunpack.c.3.s8 %v316_v60  ;;  %v2156_v23 = vcvt.s32.f32 %v1132_v5  ;;  %v3183_v29 = vpop.f32.mrf.mxu0  ;;  %v3196_v45 = vpop.f32.mrf.mxu1 }
 0x1a3   :  { %3424 = vmatpush.bf16.msrb.mxu3 %v2860_v13  ;;  %v2164_v49 = vcvt.s32.f32 %v1140_v18  ;;  %v3143_v25 = vadd.f32 %v5448_v1, %v5446_v0  ;;  %v860_v15 = vunpack.c.0.s8 %v220_v40  ;;  %v2724_v27 = vpack.c.bf16 %v2036_v19, %v2028_v16 }
 0x1a4   :  { %3386 = vmatpush.bf16.msrb.mxu0 %v2660_v28  ;;  %v2284_v20 = vcvt.s32.f32 %v1260_v41  ;;  %v2292_v50 = vcvt.s32.f32 %v1268_v30  ;;  %v868_v14 = vunpack.c.1.s8 %v220_v40  ;;  %v988_v56 = vunpack.c.0.s8 %v252_v44  ;;  %v5466_v40 = vpop.f32.mrf.mxu3 }
 0x1a5   :  { %v2788_v17 = vpack.c.bf16 %v2164_v49, %v2156_v23  ;;  %v1884_v39 = vcvt.s32.f32 %v860_v15  ;;  %v996_v24 = vunpack.c.1.s8 %v252_v44  ;;  %3399 = vmatpush.bf16.msrb.mxu1 %v2724_v27  ;;  %v1116_v33 = vunpack.c.0.s8 %v284_v51 }
 0x1a6   :  { %v2852_v26 = vpack.c.bf16 %v2292_v50, %v2284_v20  ;;  %v1892_v36 = vcvt.s32.f32 %v868_v14  ;;  %v1124_v34 = vunpack.c.1.s8 %v284_v51  ;;  %v2012_v48 = vcvt.s32.f32 %v988_v56  ;;  %v3209_v56 = vpop.f32.mrf.mxu2 }
 0x1a7   :  { %3412 = vmatpush.bf16.msrb.mxu2 %v2788_v17  ;;  %v2020_v0 = vcvt.s32.f32 %v996_v24  ;;  %v1244_v1 = vunpack.c.0.s8 %v316_v60  ;;  %v1252_v37 = vunpack.c.1.s8 %v316_v60  ;;  %v2140_v52 = vcvt.s32.f32 %v1116_v33 }
 0x1a8   :  { %3425 = vmatpush.bf16.msrb.mxu3 %v2852_v26  ;;  %v2652_v44 = vpack.c.bf16 %v1892_v36, %v1884_v39  ;;  %v2148_v55 = vcvt.s32.f32 %v1124_v34  ;;  %v461_v47 = vunpack.c.2.s8 %v5460_v57  ;;  %v469_v51 = vunpack.c.3.s8 %v5460_v57 }
 0x1a9   :  { %v2716_v22 = vpack.c.bf16 %v2020_v0, %v2012_v48  ;;  %v2268_v54 = vcvt.s32.f32 %v1244_v1  ;;  %v2276_v53 = vcvt.s32.f32 %v1252_v37  ;;  %v589_v62 = vunpack.c.2.s8 %v5462_v3  ;;  %v141_v37 = vld [vmem:[#allocation5 + $0x1a8] sm:$0xff] }
 0x1aa   :  { %3387 = vmatpush.bf16.msrb.mxu0 %v2652_v44  ;;  %v2780_v59 = vpack.c.bf16 %v2148_v55, %v2140_v52  ;;  %v1485_v61 = vcvt.s32.f32 %v461_v47  ;;  %v597_v60 = vunpack.c.3.s8 %v5462_v3  ;;  %v1493_v12 = vcvt.s32.f32 %v469_v51  ;;  %v173_v47 = vld [vmem:[#allocation5 + $0x2a8] sm:$0xff] }
 0x1ab   :  { %3400 = vmatpush.bf16.msrb.mxu1 %v2716_v22  ;;  %v2844_v8 = vpack.c.bf16 %v2276_v53, %v2268_v54  ;;  %v717_v13 = vunpack.c.2.s8 %v181_v43  ;;  %v725_v16 = vunpack.c.3.s8 %v181_v43  ;;  %v1613_v5 = vcvt.s32.f32 %v589_v62 }
 0x1ac   :  { %3413 = vmatpush.bf16.msrb.mxu2 %v2780_v59  ;;  %v1621_v18 = vcvt.s32.f32 %v597_v60  ;;  %v845_v28 = vunpack.c.2.s8 %v213_v4  ;;  %v853_v19 = vunpack.c.3.s8 %v213_v4  ;;  %v2453_v41 = vpack.c.bf16 %v1493_v12, %v1485_v61  ;;  %v3222_v24 = vpop.f32.mrf.mxu3  ;;  %v205_v59 = vld [vmem:[#allocation5 + $0x3a8] sm:$0xff] }
 0x1ad   :  { %3426 = vmatpush.bf16.msrb.mxu3 %v2844_v8  ;;  %v1741_v30 = vcvt.s32.f32 %v717_v13  ;;  %v1749_v23 = vcvt.s32.f32 %v725_v16  ;;  %v3156_v49 = vadd.f32 %v5450_v10, %v3143_v25  ;;  %3388 = vmatmul.bf16.vlgmr.msrb.gmra.mxu0 %v5312_v7  ;;  %v445_v50 = vunpack.c.0.s8 %v5460_v57  ;;  %v109_v25 = vld [vmem:[#allocation5 + $0xa8] sm:$0xff] }
 0x1ae   :  { %v2517_v15 = vpack.c.bf16 %v1621_v18, %v1613_v5  ;;  %v1869_v27 = vcvt.s32.f32 %v845_v28  ;;  %v1877_v20 = vcvt.s32.f32 %v853_v19  ;;  %3401 = vmatmul.bf16.vlgmr.msrb.gmra.mxu1 %v5321_v32  ;;  %3432 = vmatpush.bf16.msra.mxu0 %v2453_v41  ;;  %v453_v39 = vunpack.c.1.s8 %v5460_v57  ;;  %v101_v24 = vld [vmem:[#allocation5 + $0x68] sm:$0xff] }
 0x1af   :  { %v2581_v14 = vpack.c.bf16 %v1749_v23, %v1741_v30  ;;  %3414 = vmatmul.bf16.vlgmr.msrb.gmra.mxu2 %v5310_v2  ;;  %v5478_v17 = vadd.f32 %v5452_v21, %v3156_v49  ;;  %v573_v10 = vunpack.c.0.s8 %v5462_v3  ;;  %v1469_v36 = vcvt.s32.f32 %v445_v50 }
 0x1b0   :  { %3445 = vmatpush.bf16.msra.mxu1 %v2517_v15  ;;  %v2645_v26 = vpack.c.bf16 %v1877_v20, %v1869_v27  ;;  %3427 = vmatmul.bf16.vlgmr.msrb.gmra.mxu3 %v5315_v9  ;;  %v581_v33 = vunpack.c.1.s8 %v5462_v3  ;;  %v701_v34 = vunpack.c.0.s8 %v181_v43  ;;  %v1477_v48 = vcvt.s32.f32 %v453_v39 }
 0x1b1   :  { %3458 = vmatpush.bf16.msra.mxu2 %v2581_v14  ;;  %v1597_v0 = vcvt.s32.f32 %v573_v10  ;;  %v709_v21 = vunpack.c.1.s8 %v181_v43  ;;  %v829_v1 = vunpack.c.0.s8 %v213_v4  ;;  %v837_v52 = vunpack.c.1.s8 %v213_v4 }
 0x1b2   :  { %3471 = vmatpush.bf16.msra.mxu3 %v2645_v26  ;;  %v1605_v57 = vcvt.s32.f32 %v581_v33  ;;  %v1725_v44 = vcvt.s32.f32 %v701_v34  ;;  %v429_v55 = vunpack.c.2.s8 %v109_v25  ;;  %v2445_v22 = vpack.c.bf16 %v1477_v48, %v1469_v36  ;;  %v133_v48 = vld [vmem:[#allocation5 + $0x168] sm:$0xff] }
 0x1b3   :  { %v1733_v54 = vcvt.s32.f32 %v709_v21  ;;  %v1853_v53 = vcvt.s32.f32 %v829_v1  ;;  %v437_v51 = vunpack.c.3.s8 %v109_v25  ;;  %v1861_v3 = vcvt.s32.f32 %v837_v52 }
 0x1b4   :  { %v2509_v61 = vpack.c.bf16 %v1605_v57, %v1597_v0  ;;  %v1453_v62 = vcvt.s32.f32 %v429_v55  ;;  %v557_v60 = vunpack.c.2.s8 %v141_v37  ;;  %3433 = vmatpush.bf16.msra.mxu0 %v2445_v22  ;;  %v565_v45 = vunpack.c.3.s8 %v141_v37  ;;  %v165_v55 = vld [vmem:[#allocation5 + $0x268] sm:$0xff] }
 0x1b5   :  { %v2573_v29 = vpack.c.bf16 %v1733_v54, %v1725_v44  ;;  %v1461_v43 = vcvt.s32.f32 %v437_v51  ;;  %v685_v8 = vunpack.c.2.s8 %v173_v47  ;;  %v2637_v12 = vpack.c.bf16 %v1861_v3, %v1853_v53 }
 0x1b6   :  { %3446 = vmatpush.bf16.msra.mxu1 %v2509_v61  ;;  %v1581_v13 = vcvt.s32.f32 %v557_v60  ;;  %v693_v4 = vunpack.c.3.s8 %v173_v47  ;;  %v813_v16 = vunpack.c.2.s8 %v205_v59  ;;  %v1589_v18 = vcvt.s32.f32 %v565_v45 }
 0x1b7   :  { %3459 = vmatpush.bf16.msra.mxu2 %v2573_v29  ;;  %v2437_v5 = vpack.c.bf16 %v1461_v43, %v1453_v62  ;;  %v1709_v28 = vcvt.s32.f32 %v685_v8  ;;  %v821_v19 = vunpack.c.3.s8 %v205_v59  ;;  %3472 = vmatpush.bf16.msra.mxu3 %v2637_v12  ;;  %v413_v23 = vunpack.c.0.s8 %v109_v25 }
 0x1b8   :  { %v1717_v41 = vcvt.s32.f32 %v693_v4  ;;  %v1837_v30 = vcvt.s32.f32 %v813_v16  ;;  %v421_v49 = vunpack.c.1.s8 %v109_v25  ;;  %v2501_v15 = vpack.c.bf16 %v1589_v18, %v1581_v13 }
 0x1b9   :  { %3434 = vmatpush.bf16.msra.mxu0 %v2437_v5  ;;  %v1845_v27 = vcvt.s32.f32 %v821_v19  ;;  %v541_v20 = vunpack.c.0.s8 %v141_v37  ;;  %v549_v50 = vunpack.c.1.s8 %v141_v37  ;;  %v1437_v39 = vcvt.s32.f32 %v413_v23 }
 0x1ba   :  { %v2565_v14 = vpack.c.bf16 %v1717_v41, %v1709_v28  ;;  %v1445_v10 = vcvt.s32.f32 %v421_v49  ;;  %v669_v56 = vunpack.c.0.s8 %v173_v47  ;;  %3447 = vmatpush.bf16.msra.mxu1 %v2501_v15  ;;  %v677_v34 = vunpack.c.1.s8 %v173_v47  ;;  %v197_v47 = vld [vmem:[#allocation5 + $0x368] sm:$0xff] }
 0x1bb   :  { %v2629_v26 = vpack.c.bf16 %v1845_v27, %v1837_v30  ;;  %v1565_v36 = vcvt.s32.f32 %v541_v20  ;;  %v1573_v33 = vcvt.s32.f32 %v549_v50  ;;  %v797_v25 = vunpack.c.0.s8 %v205_v59 }
 0x1bc   :  { %3460 = vmatpush.bf16.msra.mxu2 %v2565_v14  ;;  %v2429_v0 = vpack.c.bf16 %v1445_v10, %v1437_v39  ;;  %v1693_v21 = vcvt.s32.f32 %v669_v56  ;;  %v805_v1 = vunpack.c.1.s8 %v205_v59  ;;  %v1701_v44 = vcvt.s32.f32 %v677_v34  ;;  %v125_v34 = vld [vmem:[#allocation5 + $0x128] sm:$0xff] }
 0x1bd   :  { %3473 = vmatpush.bf16.msra.mxu3 %v2629_v26  ;;  %v2493_v57 = vpack.c.bf16 %v1573_v33, %v1565_v36  ;;  %v3182_v37 = vadd.f32 %v5454_v46, %v5478_v17  ;;  %v397_v52 = vunpack.c.2.s8 %v101_v24  ;;  %v1821_v22 = vcvt.s32.f32 %v797_v25 }
 0x1be   :  { %3435 = vmatpush.bf16.msra.mxu0 %v2429_v0  ;;  %v1829_v54 = vcvt.s32.f32 %v805_v1  ;;  %v405_v53 = vunpack.c.3.s8 %v101_v24  ;;  %v525_v51 = vunpack.c.2.s8 %v133_v48  ;;  %v2557_v61 = vpack.c.bf16 %v1701_v44, %v1693_v21 }
 0x1bf   :  { %3448 = vmatpush.bf16.msra.mxu1 %v2493_v57  ;;  %v3195_v3 = vadd.f32 %v5456_v11, %v3182_v37  ;;  %v1421_v62 = vcvt.s32.f32 %v397_v52  ;;  %v533_v59 = vunpack.c.3.s8 %v133_v48  ;;  %v653_v45 = vunpack.c.2.s8 %v165_v55  ;;  %v157_v57 = vld [vmem:[#allocation5 + $0x228] sm:$0xff] }
 0x1c0   :  { %v2621_v60 = vpack.c.bf16 %v1829_v54, %v1821_v22  ;;  %v1429_v29 = vcvt.s32.f32 %v405_v53  ;;  %v1549_v43 = vcvt.s32.f32 %v525_v51  ;;  %3461 = vmatpush.bf16.msra.mxu2 %v2557_v61  ;;  %v661_v17 = vunpack.c.3.s8 %v165_v55  ;;  %v189_v54 = vld [vmem:[#allocation5 + $0x328] sm:$0xff] }
 0x1c1   :  { %v1557_v46 = vcvt.s32.f32 %v533_v59  ;;  %v781_v8 = vunpack.c.2.s8 %v197_v47  ;;  %v789_v12 = vunpack.c.3.s8 %v197_v47  ;;  %v1677_v4 = vcvt.s32.f32 %v653_v45 }
 0x1c2   :  { %3474 = vmatpush.bf16.msra.mxu3 %v2621_v60  ;;  %v2421_v13 = vpack.c.bf16 %v1429_v29, %v1421_v62  ;;  %v3208_v16 = vadd.f32 %v5464_v42, %v3195_v3  ;;  %v381_v5 = vunpack.c.0.s8 %v101_v24  ;;  %v1685_v28 = vcvt.s32.f32 %v661_v17  ;;  %v93_v42 = vld [vmem:[#allocation5 + $0x28] sm:$0xff] }
 0x1c3   :  { %v2485_v18 = vpack.c.bf16 %v1557_v46, %v1549_v43  ;;  %v1805_v11 = vcvt.s32.f32 %v781_v8  ;;  %v1813_v19 = vcvt.s32.f32 %v789_v12  ;;  %v389_v30 = vunpack.c.1.s8 %v101_v24 }
 0x1c4   :  { %3436 = vmatpush.bf16.msra.mxu0 %v2421_v13  ;;  %v5489_v41 = vadd.f32 %v5466_v40, %v3208_v16  ;;  %v1405_v23 = vcvt.s32.f32 %v381_v5  ;;  %v509_v49 = vunpack.c.0.s8 %v133_v48  ;;  %v2549_v15 = vpack.c.bf16 %v1685_v28, %v1677_v4 }
 0x1c5   :  { %3449 = vmatpush.bf16.msra.mxu1 %v2485_v18  ;;  %v2613_v27 = vpack.c.bf16 %v1813_v19, %v1805_v11  ;;  %v517_v20 = vunpack.c.1.s8 %v133_v48  ;;  %v637_v50 = vunpack.c.0.s8 %v165_v55  ;;  %v1413_v14 = vcvt.s32.f32 %v389_v30 }
 0x1c6   :  { %v1533_v39 = vcvt.s32.f32 %v509_v49  ;;  %3462 = vmatpush.bf16.msra.mxu2 %v2549_v15  ;;  %v645_v56 = vunpack.c.1.s8 %v165_v55  ;;  %v765_v36 = vunpack.c.0.s8 %v197_v47  ;;  %v773_v40 = vunpack.c.1.s8 %v197_v47  ;;  %v245_v49 = vld [vmem:[#allocation5 + $0x4e8] sm:$0xff] }
 0x1c7   :  { %3475 = vmatpush.bf16.msra.mxu3 %v2613_v27  ;;  %v1541_v10 = vcvt.s32.f32 %v517_v20  ;;  %v1661_v26 = vcvt.s32.f32 %v637_v50  ;;  %v2413_v33 = vpack.c.bf16 %v1413_v14, %v1405_v23  ;;  %v365_v25 = vunpack.c.2.s8 %v93_v42  ;;  %v5494_v50 = vld [vmem:[#allocation5 + $0x5e8] sm:$0xff] }
 0x1c8   :  { %v1669_v0 = vcvt.s32.f32 %v645_v56  ;;  %v1789_v21 = vcvt.s32.f32 %v765_v36  ;;  %v1797_v1 = vcvt.s32.f32 %v773_v40  ;;  %v373_v48 = vunpack.c.3.s8 %v93_v42  ;;  %v309_v40 = vld [vmem:[#allocation5 + $0x6e8] sm:$0xff] }
 0x1c9   :  { %v2477_v24 = vpack.c.bf16 %v1541_v10, %v1533_v39  ;;  %3437 = vmatpush.bf16.msra.mxu0 %v2413_v33  ;;  %v1389_v37 = vcvt.s32.f32 %v365_v25  ;;  %v493_v52 = vunpack.c.2.s8 %v125_v34  ;;  %v501_v22 = vunpack.c.3.s8 %v125_v34  ;;  %v341_v25 = vld [vmem:[#allocation5 + $0x7e8] sm:$0xff] }
 0x1ca   :  { %v2541_v44 = vpack.c.bf16 %v1669_v0, %v1661_v26  ;;  %v2605_v55 = vpack.c.bf16 %v1797_v1, %v1789_v21  ;;  %v1397_v53 = vcvt.s32.f32 %v373_v48  ;;  %v621_v61 = vunpack.c.2.s8 %v157_v57 }
 0x1cb   :  { %3450 = vmatpush.bf16.msra.mxu1 %v2477_v24  ;;  %v1517_v51 = vcvt.s32.f32 %v493_v52  ;;  %v1525_v47 = vcvt.s32.f32 %v501_v22  ;;  %v629_v3 = vunpack.c.3.s8 %v157_v57  ;;  %v749_v59 = vunpack.c.2.s8 %v189_v54 }
 0x1cc   :  { %3463 = vmatpush.bf16.msra.mxu2 %v2541_v44  ;;  %3476 = vmatpush.bf16.msra.mxu3 %v2605_v55  ;;  %v2405_v62 = vpack.c.bf16 %v1397_v53, %v1389_v37  ;;  %v1645_v29 = vcvt.s32.f32 %v621_v61  ;;  %v757_v45 = vunpack.c.3.s8 %v189_v54  ;;  %v349_v17 = vunpack.c.0.s8 %v93_v42 }
 0x1cd   :  { %v2469_v60 = vpack.c.bf16 %v1525_v47, %v1517_v51  ;;  %v1653_v43 = vcvt.s32.f32 %v629_v3  ;;  %v1773_v46 = vcvt.s32.f32 %v749_v59  ;;  %v357_v13 = vunpack.c.1.s8 %v93_v42 }
 0x1ce   :  { %3438 = vmatpush.bf16.msra.mxu0 %v2405_v62  ;;  %v1781_v12 = vcvt.s32.f32 %v757_v45  ;;  %v477_v4 = vunpack.c.0.s8 %v125_v34  ;;  %v3747_v16 = vrot.slane %v5385_v58, 4  ;;  %v5238_v5 = vmov 8.0  }
 0x1cf   :  { %3451 = vmatpush.bf16.msra.mxu1 %v2469_v60  ;;  %v2533_v8 = vpack.c.bf16 %v1653_v43, %v1645_v29  ;;  %5085 = vrcp.f32 %v5238_v5  ;;  %v1373_v18 = vcvt.s32.f32 %v349_v17  ;;  %v485_v28 = vunpack.c.1.s8 %v125_v34 }
 0x1d0   :  { %v2597_v11 = vpack.c.bf16 %v1781_v12, %v1773_v46  ;;  %v1381_v19 = vcvt.s32.f32 %v357_v13  ;;  %v1501_v30 = vcvt.s32.f32 %v477_v4  ;;  %v605_v23 = vunpack.c.0.s8 %v157_v57 }
 0x1d1   :  { %3464 = vmatpush.bf16.msra.mxu2 %v2533_v8  ;;  %v3810_v15 = vmul.f32 %v5385_v58, %v5385_v58  ;;  %v1509_v27 = vcvt.s32.f32 %v485_v28  ;;  %v613_v20 = vunpack.c.1.s8 %v157_v57  ;;  %v733_v42 = vunpack.c.0.s8 %v189_v54  ;;  %v237_v28 = vld [vmem:[#allocation5 + $0x4a8] sm:$0xff] }
 0x1d2   :  { %3477 = vmatpush.bf16.msra.mxu3 %v2597_v11  ;;  %v2397_v14 = vpack.c.bf16 %v1381_v19, %v1373_v18  ;;  %v1629_v39 = vcvt.s32.f32 %v605_v23  ;;  %v741_v10 = vunpack.c.1.s8 %v189_v54  ;;  %v5497_v56 = vadd.f32 %v3747_v16, %v5385_v58 }
 0x1d3   :  { %v2461_v26 = vpack.c.bf16 %v1509_v27, %v1501_v30  ;;  %v1637_v36 = vcvt.s32.f32 %v613_v20  ;;  %v973_v33 = vunpack.c.2.s8 %v245_v49  ;;  %v1757_v34 = vcvt.s32.f32 %v733_v42 }
 0x1d4   :  { %3439 = vmatpush.bf16.msra.mxu0 %v2397_v14  ;;  %v1765_v24 = vcvt.s32.f32 %v741_v10  ;;  %v981_v0 = vunpack.c.3.s8 %v245_v49  ;;  %v1101_v21 = vunpack.c.2.s8 %v5494_v50  ;;  %v3818_v48 = vrot.slane %v3810_v15, 4 }
 0x1d5   :  { %v5500_v1 = vpop.eup %5085  ;;  %3452 = vmatpush.bf16.msra.mxu1 %v2461_v26  ;;  %v2525_v57 = vpack.c.bf16 %v1637_v36, %v1629_v39  ;;  %v1997_v44 = vcvt.s32.f32 %v973_v33  ;;  %v1109_v37 = vunpack.c.3.s8 %v5494_v50  ;;  %v1229_v55 = vunpack.c.2.s8 %v309_v40  ;;  %v5517_v26 = vpop.f32.mrf.mxu0 }
 0x1d6   :  { %v2589_v52 = vpack.c.bf16 %v1765_v24, %v1757_v34  ;;  %v2005_v22 = vcvt.s32.f32 %v981_v0  ;;  %v2125_v54 = vcvt.s32.f32 %v1101_v21  ;;  %v3749_v53 = vrot.slane %v5497_v56, 2  ;;  %v5519_v36 = vpop.f32.mrf.mxu1  ;;  %v301_v0 = vld [vmem:[#allocation5 + $0x6a8] sm:$0xff] }
 0x1d7   :  { %3465 = vmatpush.bf16.msra.mxu2 %v2525_v57  ;;  %v2133_v51 = vcvt.s32.f32 %v1109_v37  ;;  %v1237_v47 = vunpack.c.3.s8 %v309_v40  ;;  %v1357_v61 = vunpack.c.2.s8 %v341_v25  ;;  %3440 = vmatmul.bf16.vlgmr.msra.gmra.mxu0 %v5293_v31  ;;  %v2253_v62 = vcvt.s32.f32 %v1229_v55  ;;  %v5522_v21 = vld [vmem:[#allocation5 + $0x7a8] sm:$0xff] }
 0x1d8   :  { %3478 = vmatpush.bf16.msra.mxu3 %v2589_v52  ;;  %v2709_v3 = vpack.c.bf16 %v2005_v22, %v1997_v44  ;;  %v1365_v59 = vunpack.c.3.s8 %v341_v25  ;;  %v957_v60 = vunpack.c.0.s8 %v245_v49  ;;  %3453 = vmatmul.bf16.vlgmr.msra.gmra.mxu1 %v5298_v38  ;;  %v5507_v29 = vmul.f32 8.0, %v5500_v1 }
 0x1d9   :  { %v5509_v43 = vadd.f32 %v3818_v48, %v3810_v15  ;;  %v2773_v45 = vpack.c.bf16 %v2133_v51, %v2125_v54  ;;  %v2261_v46 = vcvt.s32.f32 %v1237_v47  ;;  %v2381_v17 = vcvt.s32.f32 %v1357_v61  ;;  %v5515_v15 = vld [vmem:[#allocation5 + $0x5a8] sm:$0xff] }
 0x1da   :  { %3484 = vmatpush.bf16.msrb.mxu0 %v2709_v3  ;;  %v2389_v8 = vcvt.s32.f32 %v1365_v59  ;;  %v965_v12 = vunpack.c.1.s8 %v245_v49  ;;  %v1981_v13 = vcvt.s32.f32 %v957_v60  ;;  %3466 = vmatmul.bf16.vlgmr.msra.gmra.mxu2 %v5284_v6  ;;  %v1085_v16 = vunpack.c.0.s8 %v5494_v50 }
 0x1db   :  { %3497 = vmatpush.bf16.msrb.mxu1 %v2773_v45  ;;  %v2837_v4 = vpack.c.bf16 %v2261_v46, %v2253_v62  ;;  %v1093_v5 = vunpack.c.1.s8 %v5494_v50  ;;  %v1213_v18 = vunpack.c.0.s8 %v309_v40  ;;  %3479 = vmatmul.bf16.vlgmr.msra.gmra.mxu3 %v5295_v35  ;;  %v1221_v30 = vunpack.c.1.s8 %v309_v40 }
 0x1dc   :  { %v2901_v11 = vpack.c.bf16 %v2389_v8, %v2381_v17  ;;  %v1989_v19 = vcvt.s32.f32 %v965_v12  ;;  %v1341_v23 = vunpack.c.0.s8 %v341_v25  ;;  %v2109_v49 = vcvt.s32.f32 %v1085_v16 }
 0x1dd   :  { %3510 = vmatpush.bf16.msrb.mxu2 %v2837_v4  ;;  %v2117_v27 = vcvt.s32.f32 %v1093_v5  ;;  %v2237_v20 = vcvt.s32.f32 %v1213_v18  ;;  %v1349_v14 = vunpack.c.1.s8 %v341_v25  ;;  %v2245_v42 = vcvt.s32.f32 %v1221_v30  ;;  %v3235_v18 = vpop.f32.mrf.mxu0 }
 0x1de   :  { %3523 = vmatpush.bf16.msrb.mxu3 %v2901_v11  ;;  %v2701_v39 = vpack.c.bf16 %v1989_v19, %v1981_v13  ;;  %v2365_v10 = vcvt.s32.f32 %v1341_v23  ;;  %v941_v50 = vunpack.c.2.s8 %v237_v28  ;;  %v949_v40 = vunpack.c.3.s8 %v237_v28  ;;  %v3248_v11 = vpop.f32.mrf.mxu1 }
 0x1df   :  { %v2765_v33 = vpack.c.bf16 %v2117_v27, %v2109_v49  ;;  %v2373_v34 = vcvt.s32.f32 %v1349_v14  ;;  %v1069_v24 = vunpack.c.2.s8 %v5515_v15  ;;  %v5525_v48 = vadd.f32 %v3749_v53, %v5497_v56  ;;  %v229_v27 = vld [vmem:[#allocation5 + $0x468] sm:$0xff] }
 0x1e0   :  { %v3820_v25 = vrot.slane %v5509_v43, 2  ;;  %3485 = vmatpush.bf16.msrb.mxu0 %v2701_v39  ;;  %v2829_v57 = vpack.c.bf16 %v2245_v42, %v2237_v20  ;;  %v1965_v44 = vcvt.s32.f32 %v941_v50  ;;  %v1973_v52 = vcvt.s32.f32 %v949_v40  ;;  %v5542_v39 = vpop.f32.mrf.mxu2  ;;  %v5544_v42 = vpop.f32.mrf.mxu3  ;;  %v293_v40 = vld [vmem:[#allocation5 + $0x668] sm:$0xff] }
 0x1e1   :  { %3498 = vmatpush.bf16.msrb.mxu1 %v2765_v33  ;;  %v2893_v37 = vpack.c.bf16 %v2373_v34, %v2365_v10  ;;  %v1077_v22 = vunpack.c.3.s8 %v5515_v15  ;;  %v2093_v54 = vcvt.s32.f32 %v1069_v24  ;;  %v3797_v55 = vsub.f32 1.0, %v5507_v29  ;;  %v261_v34 = vld [vmem:[#allocation5 + $0x568] sm:$0xff] }
 0x1e2   :  { %3511 = vmatpush.bf16.msrb.mxu2 %v2829_v57  ;;  %v1197_v51 = vunpack.c.2.s8 %v301_v0  ;;  %v1205_v47 = vunpack.c.3.s8 %v301_v0  ;;  %v1325_v61 = vunpack.c.2.s8 %v5522_v21  ;;  %v2693_v56 = vpack.c.bf16 %v1973_v52, %v1965_v44  ;;  %v325_v44 = vld [vmem:[#allocation5 + $0x768] sm:$0xff] }
 0x1e3   :  { %3524 = vmatpush.bf16.msrb.mxu3 %v2893_v37  ;;  %v2101_v53 = vcvt.s32.f32 %v1077_v22  ;;  %v1333_v3 = vunpack.c.3.s8 %v5522_v21  ;;  %v925_v62 = vunpack.c.0.s8 %v237_v28  ;;  %v3751_v59 = vrot.slane %v5525_v48, 1 }
 0x1e4   :  { %v2221_v60 = vcvt.s32.f32 %v1197_v51  ;;  %v2229_v45 = vcvt.s32.f32 %v1205_v47  ;;  %v2349_v46 = vcvt.s32.f32 %v1325_v61  ;;  %3486 = vmatpush.bf16.msrb.mxu0 %v2693_v56  ;;  %v933_v29 = vunpack.c.1.s8 %v237_v28 }
 0x1e5   :  { %v2757_v17 = vpack.c.bf16 %v2101_v53, %v2093_v54  ;;  %v2357_v8 = vcvt.s32.f32 %v1333_v3  ;;  %v1949_v12 = vcvt.s32.f32 %v925_v62  ;;  %v5534_v13 = vadd.f32 %v3820_v25, %v5509_v43 }
 0x1e6   :  { %v2821_v4 = vpack.c.bf16 %v2229_v45, %v2221_v60  ;;  %v1053_v16 = vunpack.c.0.s8 %v5515_v15  ;;  %v1061_v5 = vunpack.c.1.s8 %v5515_v15  ;;  %v1957_v30 = vcvt.s32.f32 %v933_v29 }
 0x1e7   :  { %3499 = vmatpush.bf16.msrb.mxu1 %v2757_v17  ;;  %v2885_v19 = vpack.c.bf16 %v2357_v8, %v2349_v46  ;;  %v1181_v23 = vunpack.c.0.s8 %v301_v0  ;;  %v1189_v49 = vunpack.c.1.s8 %v301_v0  ;;  %v5539_v20 = vmul.f32 %v5500_v1, %v3797_v55 }
 0x1e8   :  { %3512 = vmatpush.bf16.msrb.mxu2 %v2821_v4  ;;  %v2077_v28 = vcvt.s32.f32 %v1053_v16  ;;  %v2085_v43 = vcvt.s32.f32 %v1061_v5  ;;  %v1309_v14 = vunpack.c.0.s8 %v5522_v21  ;;  %v2685_v15 = vpack.c.bf16 %v1957_v30, %v1949_v12  ;;  %v3261_v11 = vpop.f32.mrf.mxu2 }
 0x1e9   :  { %3525 = vmatpush.bf16.msrb.mxu3 %v2885_v19  ;;  %v2205_v10 = vcvt.s32.f32 %v1181_v23  ;;  %v2213_v50 = vcvt.s32.f32 %v1189_v49  ;;  %v1317_v33 = vunpack.c.1.s8 %v5522_v21  ;;  %v3753_v24 = vrot.slane %v5440_v63, 4  ;;  %v3274_v19 = vpop.f32.mrf.mxu3 }
 0x1ea   :  { %v2749_v0 = vpack.c.bf16 %v2085_v43, %v2077_v28  ;;  %v2333_v25 = vcvt.s32.f32 %v1309_v14  ;;  %v909_v57 = vunpack.c.2.s8 %v229_v27  ;;  %v5550_v37 = vmul.f32 %v5440_v63, %v5440_v63  ;;  %3487 = vmatpush.bf16.msrb.mxu0 %v2685_v15  ;;  %v221_v43 = vld [vmem:[#allocation5 + $0x428] sm:$0xff] }
 0x1eb   :  { %v2813_v52 = vpack.c.bf16 %v2213_v50, %v2205_v10  ;;  %v2341_v22 = vcvt.s32.f32 %v1317_v33  ;;  %v917_v54 = vunpack.c.3.s8 %v229_v27  ;;  %v1037_v51 = vunpack.c.2.s8 %v261_v34  ;;  %v253_v33 = vld [vmem:[#allocation5 + $0x528] sm:$0xff] }
 0x1ec   :  { %3500 = vmatpush.bf16.msrb.mxu1 %v2749_v0  ;;  %v1933_v55 = vcvt.s32.f32 %v909_v57  ;;  %v1045_v21 = vunpack.c.3.s8 %v261_v34  ;;  %v1165_v47 = vunpack.c.2.s8 %v293_v40  ;;  %v1173_v53 = vunpack.c.3.s8 %v293_v40 }
 0x1ed   :  { %3513 = vmatpush.bf16.msrb.mxu2 %v2813_v52  ;;  %v2877_v61 = vpack.c.bf16 %v2341_v22, %v2333_v25  ;;  %v1941_v56 = vcvt.s32.f32 %v917_v54  ;;  %v1293_v3 = vunpack.c.2.s8 %v325_v44  ;;  %v2061_v62 = vcvt.s32.f32 %v1037_v51  ;;  %v285_v51 = vld [vmem:[#allocation5 + $0x628] sm:$0xff] }
 0x1ee   :  { %v2069_v60 = vcvt.s32.f32 %v1045_v21  ;;  %v2189_v45 = vcvt.s32.f32 %v1165_v47  ;;  %v1301_v46 = vunpack.c.3.s8 %v325_v44  ;;  %v2197_v8 = vcvt.s32.f32 %v1173_v53 }
 0x1ef   :  { %3526 = vmatpush.bf16.msrb.mxu3 %v2877_v61  ;;  %v2677_v17 = vpack.c.bf16 %v1941_v56, %v1933_v55  ;;  %v2317_v29 = vcvt.s32.f32 %v1293_v3  ;;  %v893_v12 = vunpack.c.0.s8 %v229_v27  ;;  %v901_v5 = vunpack.c.1.s8 %v229_v27  ;;  %v317_v56 = vld [vmem:[#allocation5 + $0x728] sm:$0xff] }
 0x1f0   :  { %v2741_v4 = vpack.c.bf16 %v2069_v60, %v2061_v62  ;;  %v2325_v16 = vcvt.s32.f32 %v1301_v46  ;;  %v1021_v18 = vunpack.c.0.s8 %v261_v34  ;;  %v2805_v30 = vpack.c.bf16 %v2197_v8, %v2189_v45 }
 0x1f1   :  { %3488 = vmatpush.bf16.msrb.mxu0 %v2677_v17  ;;  %v1917_v23 = vcvt.s32.f32 %v893_v12  ;;  %v1029_v49 = vunpack.c.1.s8 %v261_v34  ;;  %v1149_v28 = vunpack.c.0.s8 %v293_v40  ;;  %v1925_v15 = vcvt.s32.f32 %v901_v5 }
 0x1f2   :  { %3501 = vmatpush.bf16.msrb.mxu1 %v2741_v4  ;;  %v2869_v14 = vpack.c.bf16 %v2325_v16, %v2317_v29  ;;  %v2045_v10 = vcvt.s32.f32 %v1021_v18  ;;  %v1157_v50 = vunpack.c.1.s8 %v293_v40  ;;  %3514 = vmatpush.bf16.msrb.mxu2 %v2805_v30  ;;  %v1277_v57 = vunpack.c.0.s8 %v325_v44  ;;  %v5552_v4 = vpop.f32.mrf.mxu0  ;;  %v5554_v16 = vpop.f32.mrf.mxu1 }
 0x1f3   :  { %v2053_v0 = vcvt.s32.f32 %v1029_v49  ;;  %v2173_v25 = vcvt.s32.f32 %v1149_v28  ;;  %v1285_v27 = vunpack.c.1.s8 %v325_v44  ;;  %v2669_v52 = vpack.c.bf16 %v1925_v15, %v1917_v23 }
 0x1f4   :  { %3527 = vmatpush.bf16.msrb.mxu3 %v2869_v14  ;;  %v2181_v22 = vcvt.s32.f32 %v1157_v50  ;;  %v877_v54 = vunpack.c.2.s8 %v221_v43  ;;  %v885_v55 = vunpack.c.3.s8 %v221_v43  ;;  %v2301_v21 = vcvt.s32.f32 %v1277_v57 }
 0x1f5   :  { %v2733_v34 = vpack.c.bf16 %v2053_v0, %v2045_v10  ;;  %v2309_v47 = vcvt.s32.f32 %v1285_v27  ;;  %v1005_v61 = vunpack.c.2.s8 %v253_v33  ;;  %3489 = vmatpush.bf16.msrb.mxu0 %v2669_v52  ;;  %v1013_v62 = vunpack.c.3.s8 %v253_v33  ;;  %v5558_v0 = vld [vmem:[#allocation5 + $0xf0] sm:$0xff] }
 0x1f6   :  { %v2797_v53 = vpack.c.bf16 %v2181_v22, %v2173_v25  ;;  %v1901_v40 = vcvt.s32.f32 %v877_v54  ;;  %v1909_v3 = vcvt.s32.f32 %v885_v55  ;;  %v1133_v44 = vunpack.c.2.s8 %v285_v51  ;;  %v5560_v55 = vld [vmem:[#allocation5 + $0x1f0] sm:$0xff] }
 0x1f7   :  { %3502 = vmatpush.bf16.msrb.mxu1 %v2733_v34  ;;  %v2861_v60 = vpack.c.bf16 %v2309_v47, %v2301_v21  ;;  %v2029_v45 = vcvt.s32.f32 %v1005_v61  ;;  %v1141_v46 = vunpack.c.3.s8 %v285_v51  ;;  %v2037_v8 = vcvt.s32.f32 %v1013_v62  ;;  %v5562_v34 = vpop.f32.mrf.mxu2 }
 0x1f8   :  { %3515 = vmatpush.bf16.msrb.mxu2 %v2797_v53  ;;  %v2661_v17 = vpack.c.bf16 %v1909_v3, %v1901_v40  ;;  %v1261_v29 = vunpack.c.2.s8 %v317_v56  ;;  %v1269_v12 = vunpack.c.3.s8 %v317_v56  ;;  %v2157_v5 = vcvt.s32.f32 %v1133_v44  ;;  %v182_v53 = vld [vmem:[#allocation5 + $0x2f0] sm:$0xff] }
 0x1f9   :  { %3528 = vmatpush.bf16.msrb.mxu3 %v2861_v60  ;;  %v2165_v18 = vcvt.s32.f32 %v1141_v46  ;;  %v3247_v11 = vadd.f32 %v5519_v36, %v5517_v26  ;;  %v861_v19 = vunpack.c.0.s8 %v221_v43  ;;  %v2725_v30 = vpack.c.bf16 %v2037_v8, %v2029_v45  ;;  %v214_v60 = vld [vmem:[#allocation5 + $0x3f0] sm:$0xff] }
 0x1fa   :  { %3490 = vmatpush.bf16.msrb.mxu0 %v2661_v17  ;;  %v2285_v23 = vcvt.s32.f32 %v1261_v29  ;;  %v2293_v49 = vcvt.s32.f32 %v1269_v12  ;;  %v869_v28 = vunpack.c.1.s8 %v221_v43  ;;  %v989_v10 = vunpack.c.0.s8 %v253_v33  ;;  %v5564_v43 = vpop.f32.mrf.mxu3  ;;  %v3287_v17 = vpop.f32.mrf.mxu0 }
 0x1fb   :  { %v2789_v14 = vpack.c.bf16 %v2165_v18, %v2157_v5  ;;  %v1885_v15 = vcvt.s32.f32 %v861_v19  ;;  %v997_v50 = vunpack.c.1.s8 %v253_v33  ;;  %3503 = vmatpush.bf16.msrb.mxu1 %v2725_v30  ;;  %v1117_v27 = vunpack.c.0.s8 %v285_v51  ;;  %v3300_v8 = vpop.f32.mrf.mxu1 }
 0x1fc   :  { %v2853_v25 = vpack.c.bf16 %v2293_v49, %v2285_v23  ;;  %v1893_v57 = vcvt.s32.f32 %v869_v28  ;;  %v1125_v52 = vunpack.c.1.s8 %v285_v51  ;;  %v2013_v22 = vcvt.s32.f32 %v989_v10 }
 0x1fd   :  { %3516 = vmatpush.bf16.msrb.mxu2 %v2789_v14  ;;  %v2021_v26 = vcvt.s32.f32 %v997_v50  ;;  %v1245_v36 = vunpack.c.0.s8 %v317_v56  ;;  %v1253_v54 = vunpack.c.1.s8 %v317_v56  ;;  %v2141_v21 = vcvt.s32.f32 %v1117_v27 }
 0x1fe   :  { %3529 = vmatpush.bf16.msrb.mxu3 %v2853_v25  ;;  %v2653_v33 = vpack.c.bf16 %v1893_v57, %v1885_v15  ;;  %v2149_v47 = vcvt.s32.f32 %v1125_v52  ;;  %v462_v61 = vunpack.c.2.s8 %v5558_v0  ;;  %v470_v62 = vunpack.c.3.s8 %v5558_v0 }
 0x1ff   :  { %v2717_v40 = vpack.c.bf16 %v2021_v26, %v2013_v22  ;;  %v2269_v51 = vcvt.s32.f32 %v1245_v36  ;;  %v2277_v3 = vcvt.s32.f32 %v1253_v54  ;;  %v590_v44 = vunpack.c.2.s8 %v5560_v55  ;;  %v3313_v36 = vpop.f32.mrf.mxu2 }
 0x200   :  { %3491 = vmatpush.bf16.msrb.mxu0 %v2653_v33  ;;  %v2781_v56 = vpack.c.bf16 %v2149_v47, %v2141_v21  ;;  %v1486_v45 = vcvt.s32.f32 %v462_v61  ;;  %v598_v46 = vunpack.c.3.s8 %v5560_v55  ;;  %v1494_v12 = vcvt.s32.f32 %v470_v62  ;;  %v142_v62 = vld [vmem:[#allocation5 + $0x1b0] sm:$0xff] }
 0x201   :  { %3504 = vmatpush.bf16.msrb.mxu1 %v2717_v40  ;;  %v2845_v29 = vpack.c.bf16 %v2277_v3, %v2269_v51  ;;  %v718_v5 = vunpack.c.2.s8 %v182_v53  ;;  %v726_v18 = vunpack.c.3.s8 %v182_v53  ;;  %v1614_v19 = vcvt.s32.f32 %v590_v44 }
 0x202   :  { %3517 = vmatpush.bf16.msrb.mxu2 %v2781_v56  ;;  %v1622_v30 = vcvt.s32.f32 %v598_v46  ;;  %v846_v23 = vunpack.c.2.s8 %v214_v60  ;;  %v854_v49 = vunpack.c.3.s8 %v214_v60  ;;  %v2454_v28 = vpack.c.bf16 %v1494_v12, %v1486_v45  ;;  %v3326_v54 = vpop.f32.mrf.mxu3  ;;  %v174_v46 = vld [vmem:[#allocation5 + $0x2b0] sm:$0xff] }
 0x203   :  { %3530 = vmatpush.bf16.msrb.mxu3 %v2845_v29  ;;  %v1742_v14 = vcvt.s32.f32 %v718_v5  ;;  %v1750_v15 = vcvt.s32.f32 %v726_v18  ;;  %v3260_v10 = vadd.f32 %v5542_v39, %v3247_v11  ;;  %3492 = vmatmul.bf16.vlgmr.msrb.gmra.mxu0 %v5312_v7  ;;  %v446_v27 = vunpack.c.0.s8 %v5558_v0  ;;  %v110_v11 = vld [vmem:[#allocation5 + $0xb0] sm:$0xff] }
 0x204   :  { %v2518_v50 = vpack.c.bf16 %v1622_v30, %v1614_v19  ;;  %v1870_v25 = vcvt.s32.f32 %v846_v23  ;;  %v1878_v57 = vcvt.s32.f32 %v854_v49  ;;  %3505 = vmatmul.bf16.vlgmr.msrb.gmra.mxu1 %v5321_v32  ;;  %3536 = vmatpush.bf16.msra.mxu0 %v2454_v28  ;;  %v454_v26 = vunpack.c.1.s8 %v5558_v0  ;;  %v206_v5 = vld [vmem:[#allocation5 + $0x3b0] sm:$0xff] }
 0x205   :  { %v2582_v52 = vpack.c.bf16 %v1750_v15, %v1742_v14  ;;  %3518 = vmatmul.bf16.vlgmr.msrb.gmra.mxu2 %v5310_v2  ;;  %v5576_v22 = vadd.f32 %v5544_v42, %v3260_v10  ;;  %v574_v39 = vunpack.c.0.s8 %v5560_v55  ;;  %v1470_v21 = vcvt.s32.f32 %v446_v27 }
 0x206   :  { %3549 = vmatpush.bf16.msra.mxu1 %v2518_v50  ;;  %v2646_v33 = vpack.c.bf16 %v1878_v57, %v1870_v25  ;;  %3531 = vmatmul.bf16.vlgmr.msrb.gmra.mxu3 %v5315_v9  ;;  %v582_v47 = vunpack.c.1.s8 %v5560_v55  ;;  %v702_v61 = vunpack.c.0.s8 %v182_v53  ;;  %v1478_v40 = vcvt.s32.f32 %v454_v26 }
 0x207   :  { %3562 = vmatpush.bf16.msra.mxu2 %v2582_v52  ;;  %v1598_v51 = vcvt.s32.f32 %v574_v39  ;;  %v710_v42 = vunpack.c.1.s8 %v182_v53  ;;  %v830_v3 = vunpack.c.0.s8 %v214_v60  ;;  %v838_v45 = vunpack.c.1.s8 %v214_v60 }
 0x208   :  { %3575 = vmatpush.bf16.msra.mxu3 %v2646_v33  ;;  %v1606_v0 = vcvt.s32.f32 %v582_v47  ;;  %v1726_v56 = vcvt.s32.f32 %v702_v61  ;;  %v430_v44 = vunpack.c.2.s8 %v110_v11  ;;  %v2446_v17 = vpack.c.bf16 %v1478_v40, %v1470_v21 }
 0x209   :  { %v1734_v8 = vcvt.s32.f32 %v710_v42  ;;  %v1854_v29 = vcvt.s32.f32 %v830_v3  ;;  %v438_v12 = vunpack.c.3.s8 %v110_v11  ;;  %v1862_v55 = vcvt.s32.f32 %v838_v45  ;;  %v102_v3 = vld [vmem:[#allocation5 + $0x70] sm:$0xff] }
 0x20a   :  { %v2510_v18 = vpack.c.bf16 %v1606_v0, %v1598_v51  ;;  %v1454_v19 = vcvt.s32.f32 %v430_v44  ;;  %v558_v30 = vunpack.c.2.s8 %v142_v62  ;;  %3537 = vmatpush.bf16.msra.mxu0 %v2446_v17  ;;  %v566_v49 = vunpack.c.3.s8 %v142_v62  ;;  %v134_v17 = vld [vmem:[#allocation5 + $0x170] sm:$0xff] }
 0x20b   :  { %v2574_v23 = vpack.c.bf16 %v1734_v8, %v1726_v56  ;;  %v1462_v53 = vcvt.s32.f32 %v438_v12  ;;  %v686_v28 = vunpack.c.2.s8 %v174_v46  ;;  %v2638_v14 = vpack.c.bf16 %v1862_v55, %v1854_v29 }
 0x20c   :  { %3550 = vmatpush.bf16.msra.mxu1 %v2510_v18  ;;  %v1582_v15 = vcvt.s32.f32 %v558_v30  ;;  %v694_v60 = vunpack.c.3.s8 %v174_v46  ;;  %v814_v10 = vunpack.c.2.s8 %v206_v5  ;;  %v1590_v25 = vcvt.s32.f32 %v566_v49  ;;  %v166_v30 = vld [vmem:[#allocation5 + $0x270] sm:$0xff] }
 0x20d   :  { %3563 = vmatpush.bf16.msra.mxu2 %v2574_v23  ;;  %v2438_v50 = vpack.c.bf16 %v1462_v53, %v1454_v19  ;;  %v1710_v57 = vcvt.s32.f32 %v686_v28  ;;  %v822_v27 = vunpack.c.3.s8 %v206_v5  ;;  %3576 = vmatpush.bf16.msra.mxu3 %v2638_v14  ;;  %v414_v39 = vunpack.c.0.s8 %v110_v11 }
 0x20e   :  { %v1718_v52 = vcvt.s32.f32 %v694_v60  ;;  %v1838_v26 = vcvt.s32.f32 %v814_v10  ;;  %v422_v36 = vunpack.c.1.s8 %v110_v11  ;;  %v2502_v54 = vpack.c.bf16 %v1590_v25, %v1582_v15 }
 0x20f   :  { %3538 = vmatpush.bf16.msra.mxu0 %v2438_v50  ;;  %v1846_v33 = vcvt.s32.f32 %v822_v27  ;;  %v542_v21 = vunpack.c.0.s8 %v142_v62  ;;  %v550_v47 = vunpack.c.1.s8 %v142_v62  ;;  %v1438_v40 = vcvt.s32.f32 %v414_v39 }
 0x210   :  { %v2566_v61 = vpack.c.bf16 %v1718_v52, %v1710_v57  ;;  %v1446_v51 = vcvt.s32.f32 %v422_v36  ;;  %v670_v42 = vunpack.c.0.s8 %v174_v46  ;;  %3551 = vmatpush.bf16.msra.mxu1 %v2502_v54  ;;  %v678_v44 = vunpack.c.1.s8 %v174_v46  ;;  %v198_v46 = vld [vmem:[#allocation5 + $0x370] sm:$0xff] }
 0x211   :  { %v2630_v0 = vpack.c.bf16 %v1846_v33, %v1838_v26  ;;  %v1566_v56 = vcvt.s32.f32 %v542_v21  ;;  %v1574_v45 = vcvt.s32.f32 %v550_v47  ;;  %v798_v11 = vunpack.c.0.s8 %v206_v5 }
 0x212   :  { %3564 = vmatpush.bf16.msra.mxu2 %v2566_v61  ;;  %v2430_v8 = vpack.c.bf16 %v1446_v51, %v1438_v40  ;;  %v1694_v29 = vcvt.s32.f32 %v670_v42  ;;  %v806_v12 = vunpack.c.1.s8 %v206_v5  ;;  %v1702_v55 = vcvt.s32.f32 %v678_v44 }
 0x213   :  { %3577 = vmatpush.bf16.msra.mxu3 %v2630_v0  ;;  %v2494_v18 = vpack.c.bf16 %v1574_v45, %v1566_v56  ;;  %v3286_v62 = vadd.f32 %v5552_v4, %v5576_v22  ;;  %v398_v19 = vunpack.c.2.s8 %v102_v3  ;;  %v1822_v23 = vcvt.s32.f32 %v798_v11 }
 0x214   :  { %3539 = vmatpush.bf16.msra.mxu0 %v2430_v8  ;;  %v1830_v53 = vcvt.s32.f32 %v806_v12  ;;  %v406_v49 = vunpack.c.3.s8 %v102_v3  ;;  %v526_v28 = vunpack.c.2.s8 %v134_v17  ;;  %v2558_v14 = vpack.c.bf16 %v1702_v55, %v1694_v29 }
 0x215   :  { %3552 = vmatpush.bf16.msra.mxu1 %v2494_v18  ;;  %v3299_v15 = vadd.f32 %v5554_v16, %v3286_v62  ;;  %v1422_v60 = vcvt.s32.f32 %v398_v19  ;;  %v534_v5 = vunpack.c.3.s8 %v134_v17  ;;  %v654_v57 = vunpack.c.2.s8 %v166_v30 }
 0x216   :  { %v2622_v10 = vpack.c.bf16 %v1830_v53, %v1822_v23  ;;  %v1430_v50 = vcvt.s32.f32 %v406_v49  ;;  %v1550_v25 = vcvt.s32.f32 %v526_v28  ;;  %vm3800_vm0 = vweird.f32 %v5500_v1  ;;  %3565 = vmatpush.bf16.msra.mxu2 %v2558_v14 }
 0x217   :  { %v1558_v4 = vcvt.s32.f32 %v534_v5  ;;  %v662_v22 = vunpack.c.3.s8 %v166_v30  ;;  %v782_v27 = vunpack.c.2.s8 %v198_v46  ;;  %v790_v52 = vunpack.c.3.s8 %v198_v46 }
 0x218   :  { %3578 = vmatpush.bf16.msra.mxu3 %v2622_v10  ;;  %v2422_v26 = vpack.c.bf16 %v1430_v50, %v1422_v60  ;;  %v1678_v39 = vcvt.s32.f32 %v654_v57  ;;  %v3312_v36 = vadd.f32 %v5562_v34, %v3299_v15  ;;  %v382_v54 = vunpack.c.0.s8 %v102_v3  ;;  %v158_v60 = vld [vmem:[#allocation5 + $0x230] sm:$0xff] }
 0x219   :  { %v2486_v16 = vpack.c.bf16 %v1558_v4, %v1550_v25  ;;  %v1686_v33 = vcvt.s32.f32 %v662_v22  ;;  %v1806_v21 = vcvt.s32.f32 %v782_v27  ;;  %v1814_v47 = vcvt.s32.f32 %v790_v52  ;;  %v190_v25 = vld [vmem:[#allocation5 + $0x330] sm:$0xff] }
 0x21a   :  { %3540 = vmatpush.bf16.msra.mxu0 %v2422_v26  ;;  %v5588_v61 = vadd.f32 %v5564_v43, %v3312_v36  ;;  %v390_v40 = vunpack.c.1.s8 %v102_v3  ;;  %v1406_v51 = vcvt.s32.f32 %v382_v54  ;;  %v510_v42 = vunpack.c.0.s8 %v134_v17  ;;  %v94_v43 = vld [vmem:[#allocation5 + $0x30] sm:$0xff] }
 0x21b   :  { %3553 = vmatpush.bf16.msra.mxu1 %v2486_v16  ;;  %v2550_v0 = vpack.c.bf16 %v1686_v33, %v1678_v39  ;;  %v2614_v56 = vpack.c.bf16 %v1814_v47, %v1806_v21  ;;  %v518_v45 = vunpack.c.1.s8 %v134_v17  ;;  %v638_v44 = vunpack.c.0.s8 %v166_v30 }
 0x21c   :  { %v3752_v34 = vadd.f32 %v3751_v59, %v5525_v48  ;;  %v3754_v8 = vadd.f32 %v3753_v24, %v5440_v63  ;;  %v1414_v29 = vcvt.s32.f32 %v390_v40  ;;  %v1534_v11 = vcvt.s32.f32 %v510_v42  ;;  %v126_v59 = vld [vmem:[#allocation5 + $0x130] sm:$0xff] }
 0x21d   :  { %3566 = vmatpush.bf16.msra.mxu2 %v2550_v0  ;;  %3579 = vmatpush.bf16.msra.mxu3 %v2614_v56  ;;  %v1542_v3 = vcvt.s32.f32 %v518_v45  ;;  %v646_v12 = vunpack.c.1.s8 %v166_v30  ;;  %v1662_v18 = vcvt.s32.f32 %v638_v44  ;;  %v766_v55 = vunpack.c.0.s8 %v198_v46 }
 0x21e   :  { %v3799_v17 = vadd.f32 %v5500_v1, %v5539_v20  ;;  %v3824_v62 = vrot.slane %v5550_v37, 4  ;;  %v2414_v19 = vpack.c.bf16 %v1414_v29, %v1406_v51  ;;  %v774_v48 = vunpack.c.1.s8 %v198_v46 }
 0x21f   :  { %v2478_v23 = vpack.c.bf16 %v1542_v3, %v1534_v11  ;;  %v1670_v53 = vcvt.s32.f32 %v646_v12  ;;  %v1790_v24 = vcvt.s32.f32 %v766_v55  ;;  %v366_v49 = vunpack.c.2.s8 %v94_v43 }
 0x220   :  { %v3822_v28 = vrot.slane %v5534_v13, 1  ;;  %v3755_v14 = vrot.slane %v3754_v8, 2  ;;  %3541 = vmatpush.bf16.msra.mxu0 %v2414_v19  ;;  %v1798_v15 = vcvt.s32.f32 %v774_v48  ;;  %v374_v30 = vunpack.c.3.s8 %v94_v43 }
 0x221   :  { %3554 = vmatpush.bf16.msra.mxu1 %v2478_v23  ;;  %v2542_v5 = vpack.c.bf16 %v1670_v53, %v1662_v18  ;;  %v1390_v10 = vcvt.s32.f32 %v366_v49  ;;  %v494_v20 = vunpack.c.2.s8 %v126_v59  ;;  %v502_v50 = vunpack.c.3.s8 %v126_v59  ;;  %v278_v23 = vld [vmem:[#allocation5 + $0x5f0] sm:$0xff] }
 0x222   :  { %v5603_v46 = vsel %vm3800_vm0, %v5500_v1, %v3799_v17  ;;  %v3825_v57 = vadd.f32 %v3824_v62, %v5550_v37  ;;  %v2606_v4 = vpack.c.bf16 %v1798_v15, %v1790_v24  ;;  %v1398_v22 = vcvt.s32.f32 %v374_v30  ;;  %v246_v17 = vld [vmem:[#allocation5 + $0x4f0] sm:$0xff] }
 0x223   :  { %3567 = vmatpush.bf16.msra.mxu2 %v2542_v5  ;;  %v1518_v27 = vcvt.s32.f32 %v494_v20  ;;  %v1526_v52 = vcvt.s32.f32 %v502_v50  ;;  %v622_v26 = vunpack.c.2.s8 %v158_v60  ;;  %v630_v39 = vunpack.c.3.s8 %v158_v60  ;;  %v310_v5 = vld [vmem:[#allocation5 + $0x6f0] sm:$0xff] }
 0x224   :  { %v3823_v36 = vadd.f32 %v3822_v28, %v5534_v13  ;;  %v3756_v54 = vadd.f32 %v3755_v14, %v3754_v8  ;;  %3580 = vmatpush.bf16.msra.mxu3 %v2606_v4  ;;  %v2406_v16 = vpack.c.bf16 %v1398_v22, %v1390_v10  ;;  %v750_v33 = vunpack.c.2.s8 %v190_v25  ;;  %v342_v22 = vld [vmem:[#allocation5 + $0x7f0] sm:$0xff] }
 0x225   :  { %v2470_v21 = vpack.c.bf16 %v1526_v52, %v1518_v27  ;;  %v1646_v47 = vcvt.s32.f32 %v622_v26  ;;  %v1654_v40 = vcvt.s32.f32 %v630_v39  ;;  %v758_v1 = vunpack.c.3.s8 %v190_v25 }
 0x226   :  { %v5608_v51 = vmul.f32 %v5603_v46, %v3752_v34  ;;  %v3826_v37 = vrot.slane %v3825_v57, 2  ;;  %3542 = vmatpush.bf16.msra.mxu0 %v2406_v16  ;;  %v1774_v42 = vcvt.s32.f32 %v750_v33  ;;  %v350_v0 = vunpack.c.0.s8 %v94_v43 }
 0x227   :  { %3555 = vmatpush.bf16.msra.mxu1 %v2470_v21  ;;  %v2534_v56 = vpack.c.bf16 %v1654_v40, %v1646_v47  ;;  %v1782_v45 = vcvt.s32.f32 %v758_v1  ;;  %v358_v44 = vunpack.c.1.s8 %v94_v43  ;;  %v478_v13 = vunpack.c.0.s8 %v126_v59 }
 0x228   :  { %v5611_v8 = vmul.f32 %v3823_v36, %v5603_v46  ;;  %v3757_v29 = vrot.slane %v3756_v54, 1  ;;  %v1374_v11 = vcvt.s32.f32 %v350_v0  ;;  %v486_v3 = vunpack.c.1.s8 %v126_v59 }
 0x229   :  { %3568 = vmatpush.bf16.msra.mxu2 %v2534_v56  ;;  %v2598_v12 = vpack.c.bf16 %v1782_v45, %v1774_v42  ;;  %v1382_v18 = vcvt.s32.f32 %v358_v44  ;;  %v1502_v34 = vcvt.s32.f32 %v478_v13  ;;  %v606_v55 = vunpack.c.0.s8 %v158_v60 }
 0x22a   :  { %v5615_v62 = vmul.f32 %v5608_v51, %v5608_v51  ;;  %v3827_v19 = vadd.f32 %v3826_v37, %v3825_v57  ;;  %v1510_v48 = vcvt.s32.f32 %v486_v3  ;;  %v614_v43 = vunpack.c.1.s8 %v158_v60 }
 0x22b   :  { %3581 = vmatpush.bf16.msra.mxu3 %v2598_v12  ;;  %v2398_v53 = vpack.c.bf16 %v1382_v18, %v1374_v11  ;;  %v1630_v24 = vcvt.s32.f32 %v606_v55  ;;  %v734_v49 = vunpack.c.0.s8 %v190_v25  ;;  %v742_v28 = vunpack.c.1.s8 %v190_v25 }
 0x22c   :  { %v3758_v59 = vadd.f32 %v3757_v29, %v3756_v54  ;;  %v2462_v14 = vpack.c.bf16 %v1510_v48, %v1502_v34  ;;  %v1638_v15 = vcvt.s32.f32 %v614_v43  ;;  %v974_v30 = vunpack.c.2.s8 %v246_v17  ;;  %v238_v34 = vld [vmem:[#allocation5 + $0x4b0] sm:$0xff] }
 0x22d   :  { %3543 = vmatpush.bf16.msra.mxu0 %v2398_v53  ;;  %v1758_v10 = vcvt.s32.f32 %v734_v49  ;;  %v1766_v20 = vcvt.s32.f32 %v742_v28  ;;  %v982_v50 = vunpack.c.3.s8 %v246_v17  ;;  %v1102_v4 = vunpack.c.2.s8 %v278_v23  ;;  %v270_v43 = vld [vmem:[#allocation5 + $0x5b0] sm:$0xff] }
 0x22e   :  { %v3828_v57 = vrot.slane %v3827_v19, 1  ;;  %3556 = vmatpush.bf16.msra.mxu1 %v2462_v14  ;;  %v2526_v60 = vpack.c.bf16 %v1638_v15, %v1630_v24  ;;  %v1998_v27 = vcvt.s32.f32 %v974_v30  ;;  %v1110_v52 = vunpack.c.3.s8 %v278_v23  ;;  %v5628_v30 = vpop.f32.mrf.mxu1 }
 0x22f   :  { %v2590_v26 = vpack.c.bf16 %v1766_v20, %v1758_v10  ;;  %v2006_v39 = vcvt.s32.f32 %v982_v50  ;;  %v2126_v36 = vcvt.s32.f32 %v1102_v4  ;;  %v1230_v25 = vunpack.c.2.s8 %v310_v5  ;;  %v302_v4 = vld [vmem:[#allocation5 + $0x6b0] sm:$0xff] }
 0x230   :  { %v3882_v54 = vsub.f32 %v5611_v8, %v5615_v62  ;;  %3569 = vmatpush.bf16.msra.mxu2 %v2526_v60  ;;  %v2134_v16 = vcvt.s32.f32 %v1110_v52  ;;  %v1238_v33 = vunpack.c.3.s8 %v310_v5  ;;  %v1358_v21 = vunpack.c.2.s8 %v342_v22  ;;  %3544 = vmatmul.bf16.vlgmr.msra.gmra.mxu0 %v5293_v31 }
 0x231   :  { %3582 = vmatpush.bf16.msra.mxu3 %v2590_v26  ;;  %v2710_v47 = vpack.c.bf16 %v2006_v39, %v1998_v27  ;;  %v2254_v40 = vcvt.s32.f32 %v1230_v25  ;;  %v1366_v1 = vunpack.c.3.s8 %v342_v22  ;;  %v958_v37 = vunpack.c.0.s8 %v246_v17  ;;  %3557 = vmatmul.bf16.vlgmr.msra.gmra.mxu1 %v5298_v38 }
 0x232   :  { %v5622_v42 = vmul.f32 %v5603_v46, %v3758_v59  ;;  %v3829_v0 = vadd.f32 %v3828_v57, %v3827_v19  ;;  %v2774_v56 = vpack.c.bf16 %v2134_v16, %v2126_v36  ;;  %v2262_v45 = vcvt.s32.f32 %v1238_v33  ;;  %v5630_v57 = vld [vmem:[#allocation5 + $0x7b0] sm:$0xff] }
 0x233   :  { %3588 = vmatpush.bf16.msrb.mxu0 %v2710_v47  ;;  %v2382_v44 = vcvt.s32.f32 %v1358_v21  ;;  %v2390_v13 = vcvt.s32.f32 %v1366_v1  ;;  %v966_v8 = vunpack.c.1.s8 %v246_v17  ;;  %v1982_v29 = vcvt.s32.f32 %v958_v37  ;;  %3570 = vmatmul.bf16.vlgmr.msra.gmra.mxu2 %v5284_v6 }
 0x234   :  { %3601 = vmatpush.bf16.msrb.mxu1 %v2774_v56  ;;  %v2838_v11 = vpack.c.bf16 %v2262_v45, %v2254_v40  ;;  %v1086_v3 = vunpack.c.0.s8 %v278_v23  ;;  %v1094_v12 = vunpack.c.1.s8 %v278_v23  ;;  %v1214_v18 = vunpack.c.0.s8 %v310_v5  ;;  %3583 = vmatmul.bf16.vlgmr.msra.gmra.mxu3 %v5295_v35  ;;  %v5626_v23 = vpop.f32.mrf.mxu0 }
 0x235   :  { %v2902_v55 = vpack.c.bf16 %v2390_v13, %v2382_v44  ;;  %v1990_v62 = vcvt.s32.f32 %v966_v8  ;;  %v1222_v19 = vunpack.c.1.s8 %v310_v5  ;;  %v1342_v48 = vunpack.c.0.s8 %v342_v22 }
 0x236   :  { %3614 = vmatpush.bf16.msrb.mxu2 %v2838_v11  ;;  %v2110_v53 = vcvt.s32.f32 %v1086_v3  ;;  %v2118_v24 = vcvt.s32.f32 %v1094_v12  ;;  %v2238_v17 = vcvt.s32.f32 %v1214_v18  ;;  %v1350_v49 = vunpack.c.1.s8 %v342_v22 }
 0x237   :  { %3627 = vmatpush.bf16.msrb.mxu3 %v2902_v55  ;;  %v2702_v28 = vpack.c.bf16 %v1990_v62, %v1982_v29  ;;  %v2246_v59 = vcvt.s32.f32 %v1222_v19  ;;  %v2366_v14 = vcvt.s32.f32 %v1342_v48  ;;  %v942_v15 = vunpack.c.2.s8 %v238_v34  ;;  %v3352_v19 = vpop.f32.mrf.mxu1 }
 0x238   :  { %v2766_v10 = vpack.c.bf16 %v2118_v24, %v2110_v53  ;;  %v2374_v20 = vcvt.s32.f32 %v1350_v49  ;;  %v950_v50 = vunpack.c.3.s8 %v238_v34  ;;  %v1070_v5 = vunpack.c.2.s8 %v270_v43  ;;  %v230_v49 = vld [vmem:[#allocation5 + $0x470] sm:$0xff] }
 0x239   :  { %v3890_v60 = vmax.f32 %v3882_v54, 0.0  ;;  %v3867_v27 = vmul.f32 %v3829_v0, %v5603_v46  ;;  %3589 = vmatpush.bf16.msrb.mxu0 %v2702_v28  ;;  %v2830_v22 = vpack.c.bf16 %v2246_v59, %v2238_v17  ;;  %v1966_v52 = vcvt.s32.f32 %v942_v15  ;;  %v5640_v15 = vpop.f32.mrf.mxu2 }
 0x23a   :  { %3602 = vmatpush.bf16.msrb.mxu1 %v2766_v10  ;;  %v2894_v26 = vpack.c.bf16 %v2374_v20, %v2366_v14  ;;  %v1974_v39 = vcvt.s32.f32 %v950_v50  ;;  %v1078_v36 = vunpack.c.3.s8 %v270_v43  ;;  %v2094_v25 = vcvt.s32.f32 %v1070_v5  ;;  %v262_v5 = vld [vmem:[#allocation5 + $0x570] sm:$0xff] }
 0x23b   :  { %v3875_v16 = vmul.f32 %v5622_v42, %v5622_v42  ;;  %3615 = vmatpush.bf16.msrb.mxu2 %v2830_v22  ;;  %v1198_v33 = vunpack.c.2.s8 %v302_v4  ;;  %v1206_v21 = vunpack.c.3.s8 %v302_v4  ;;  %v1326_v47 = vunpack.c.2.s8 %v5630_v57 }
 0x23c   :  { %3628 = vmatpush.bf16.msrb.mxu3 %v2894_v26  ;;  %v2694_v54 = vpack.c.bf16 %v1974_v39, %v1966_v52  ;;  %v2102_v40 = vcvt.s32.f32 %v1078_v36  ;;  %v1334_v1 = vunpack.c.3.s8 %v5630_v57  ;;  %v926_v37 = vunpack.c.0.s8 %v238_v34  ;;  %v3339_v62 = vpop.f32.mrf.mxu0  ;;  %v326_v52 = vld [vmem:[#allocation5 + $0x770] sm:$0xff] }
 0x23d   :  { %v5637_v0 = vadd.f32 1e-05, %v3890_v60  ;;  %v2222_v56 = vcvt.s32.f32 %v1198_v33  ;;  %v2230_v45 = vcvt.s32.f32 %v1206_v21  ;;  %v2350_v44 = vcvt.s32.f32 %v1326_v47  ;;  %v294_v60 = vld [vmem:[#allocation5 + $0x670] sm:$0xff] }
 0x23e   :  { %3590 = vmatpush.bf16.msrb.mxu0 %v2694_v54  ;;  %v2758_v13 = vpack.c.bf16 %v2102_v40, %v2094_v25  ;;  %v2358_v8 = vcvt.s32.f32 %v1334_v1  ;;  %v934_v29 = vunpack.c.1.s8 %v238_v34  ;;  %v1950_v11 = vcvt.s32.f32 %v926_v37  ;;  %v5642_v34 = vpop.f32.mrf.mxu3 }
 0x23f   :  { %v3883_v3 = vsub.f32 %v3867_v27, %v3875_v16  ;;  %v2822_v12 = vpack.c.bf16 %v2230_v45, %v2222_v56  ;;  %v1054_v18 = vunpack.c.0.s8 %v270_v43  ;;  %v1062_v55 = vunpack.c.1.s8 %v270_v43 }
 0x240   :  { %3603 = vmatpush.bf16.msrb.mxu1 %v2758_v13  ;;  %v2886_v48 = vpack.c.bf16 %v2358_v8, %v2350_v44  ;;  %v1958_v53 = vcvt.s32.f32 %v934_v29  ;;  %v1182_v24 = vunpack.c.0.s8 %v302_v4  ;;  %v1190_v17 = vunpack.c.1.s8 %v302_v4 }
 0x241   :  { %3616 = vmatpush.bf16.msrb.mxu2 %v2822_v12  ;;  %v2078_v28 = vcvt.s32.f32 %v1054_v18  ;;  %v2086_v59 = vcvt.s32.f32 %v1062_v55  ;;  %v1310_v14 = vunpack.c.0.s8 %v5630_v57  ;;  %v1318_v50 = vunpack.c.1.s8 %v5630_v57  ;;  %v3365_v19 = vpop.f32.mrf.mxu2 }
 0x242   :  { %3629 = vmatpush.bf16.msrb.mxu3 %v2886_v48  ;;  %v2686_v10 = vpack.c.bf16 %v1958_v53, %v1950_v11  ;;  %v2206_v43 = vcvt.s32.f32 %v1182_v24  ;;  %v2214_v20 = vcvt.s32.f32 %v1190_v17  ;;  %5087 = vrsqrt.f32 %v5637_v0 }
 0x243   :  { %v2750_v4 = vpack.c.bf16 %v2086_v59, %v2078_v28  ;;  %v2334_v27 = vcvt.s32.f32 %v1310_v14  ;;  %v910_v22 = vunpack.c.2.s8 %v230_v49  ;;  %v5646_v26 = vmax.f32 %v3883_v3, 0.0  ;;  %v222_v59 = vld [vmem:[#allocation5 + $0x430] sm:$0xff] }
 0x244   :  { %3591 = vmatpush.bf16.msrb.mxu0 %v2686_v10  ;;  %v2814_v39 = vpack.c.bf16 %v2214_v20, %v2206_v43  ;;  %v2342_v36 = vcvt.s32.f32 %v1318_v50  ;;  %v918_v25 = vunpack.c.3.s8 %v230_v49  ;;  %v1038_v33 = vunpack.c.2.s8 %v262_v5  ;;  %v254_v50 = vld [vmem:[#allocation5 + $0x530] sm:$0xff] }
 0x245   :  { %3604 = vmatpush.bf16.msrb.mxu1 %v2750_v4  ;;  %v1934_v16 = vcvt.s32.f32 %v910_v22  ;;  %v1046_v21 = vunpack.c.3.s8 %v262_v5  ;;  %v1166_v47 = vunpack.c.2.s8 %v294_v60  ;;  %v1174_v40 = vunpack.c.3.s8 %v294_v60 }
 0x246   :  { %3617 = vmatpush.bf16.msrb.mxu2 %v2814_v39  ;;  %v2878_v57 = vpack.c.bf16 %v2342_v36, %v2334_v27  ;;  %v1942_v54 = vcvt.s32.f32 %v918_v25  ;;  %v1294_v1 = vunpack.c.2.s8 %v326_v52  ;;  %v2062_v37 = vcvt.s32.f32 %v1038_v33  ;;  %v3378_v48 = vpop.f32.mrf.mxu3  ;;  %v286_v33 = vld [vmem:[#allocation5 + $0x630] sm:$0xff] }
 0x247   :  { %v2070_v56 = vcvt.s32.f32 %v1046_v21  ;;  %v2190_v45 = vcvt.s32.f32 %v1166_v47  ;;  %v1302_v44 = vunpack.c.3.s8 %v326_v52  ;;  %v2198_v8 = vcvt.s32.f32 %v1174_v40 }
 0x248   :  { %3630 = vmatpush.bf16.msrb.mxu3 %v2878_v57  ;;  %v2678_v13 = vpack.c.bf16 %v1942_v54, %v1934_v16  ;;  %v2318_v29 = vcvt.s32.f32 %v1294_v1  ;;  %v894_v11 = vunpack.c.0.s8 %v230_v49  ;;  %v5648_v3 = vpop.eup %5087  ;;  %v902_v55 = vunpack.c.1.s8 %v230_v49  ;;  %v318_v54 = vld [vmem:[#allocation5 + $0x730] sm:$0xff] }
 0x249   :  { %v2742_v12 = vpack.c.bf16 %v2070_v56, %v2062_v37  ;;  %v2326_v18 = vcvt.s32.f32 %v1302_v44  ;;  %v1022_v62 = vunpack.c.0.s8 %v262_v5  ;;  %v2806_v53 = vpack.c.bf16 %v2198_v8, %v2190_v45 }
 0x24a   :  { %3592 = vmatpush.bf16.msrb.mxu0 %v2678_v13  ;;  %v1918_v24 = vcvt.s32.f32 %v894_v11  ;;  %v1030_v17 = vunpack.c.1.s8 %v262_v5  ;;  %v1150_v28 = vunpack.c.0.s8 %v294_v60  ;;  %v1926_v10 = vcvt.s32.f32 %v902_v55 }
 0x24b   :  { %3605 = vmatpush.bf16.msrb.mxu1 %v2742_v12  ;;  %v2870_v14 = vpack.c.bf16 %v2326_v18, %v2318_v29  ;;  %v2046_v43 = vcvt.s32.f32 %v1022_v62  ;;  %v1158_v20 = vunpack.c.1.s8 %v294_v60  ;;  %3618 = vmatpush.bf16.msrb.mxu2 %v2806_v53  ;;  %v1278_v22 = vunpack.c.0.s8 %v326_v52  ;;  %v5650_v12 = vpop.f32.mrf.mxu0  ;;  %v5652_v18 = vpop.f32.mrf.mxu1 }
 0x24c   :  { %v2054_v4 = vcvt.s32.f32 %v1030_v17  ;;  %v2174_v27 = vcvt.s32.f32 %v1150_v28  ;;  %v1286_v49 = vunpack.c.1.s8 %v326_v52  ;;  %v2670_v39 = vpack.c.bf16 %v1926_v10, %v1918_v24 }
 0x24d   :  { %3631 = vmatpush.bf16.msrb.mxu3 %v2870_v14  ;;  %v2182_v36 = vcvt.s32.f32 %v1158_v20  ;;  %v878_v25 = vunpack.c.2.s8 %v222_v59  ;;  %v886_v16 = vunpack.c.3.s8 %v222_v59  ;;  %v2302_v21 = vcvt.s32.f32 %v1278_v22 }
 0x24e   :  { %v2734_v5 = vpack.c.bf16 %v2054_v4, %v2046_v43  ;;  %v2310_v47 = vcvt.s32.f32 %v1286_v49  ;;  %v1006_v57 = vunpack.c.2.s8 %v254_v50  ;;  %3593 = vmatpush.bf16.msrb.mxu0 %v2670_v39  ;;  %v1014_v37 = vunpack.c.3.s8 %v254_v50  ;;  %v5656_v4 = vld [vmem:[#allocation5 + $0xf8] sm:$0xff] }
 0x24f   :  { %v2798_v40 = vpack.c.bf16 %v2182_v36, %v2174_v27  ;;  %v1902_v60 = vcvt.s32.f32 %v878_v25  ;;  %v1910_v1 = vcvt.s32.f32 %v886_v16  ;;  %v1134_v52 = vunpack.c.2.s8 %v286_v33  ;;  %v5658_v16 = vld [vmem:[#allocation5 + $0x1f8] sm:$0xff] }
 0x250   :  { %3606 = vmatpush.bf16.msrb.mxu1 %v2734_v5  ;;  %v2862_v56 = vpack.c.bf16 %v2310_v47, %v2302_v21  ;;  %v2030_v45 = vcvt.s32.f32 %v1006_v57  ;;  %v1142_v44 = vunpack.c.3.s8 %v286_v33  ;;  %v2038_v8 = vcvt.s32.f32 %v1014_v37  ;;  %v5660_v5 = vpop.f32.mrf.mxu2 }
 0x251   :  { %3619 = vmatpush.bf16.msrb.mxu2 %v2798_v40  ;;  %v2662_v13 = vpack.c.bf16 %v1910_v1, %v1902_v60  ;;  %v1262_v29 = vunpack.c.2.s8 %v318_v54  ;;  %v1270_v11 = vunpack.c.3.s8 %v318_v54  ;;  %v2158_v55 = vcvt.s32.f32 %v1134_v52  ;;  %v183_v40 = vld [vmem:[#allocation5 + $0x2f8] sm:$0xff] }
 0x252   :  { %3632 = vmatpush.bf16.msrb.mxu3 %v2862_v56  ;;  %v2166_v62 = vcvt.s32.f32 %v1142_v44  ;;  %v3351_v19 = vadd.f32 %v5628_v30, %v5626_v23  ;;  %v862_v48 = vunpack.c.0.s8 %v222_v59  ;;  %v2726_v53 = vpack.c.bf16 %v2038_v8, %v2030_v45  ;;  %v215_v56 = vld [vmem:[#allocation5 + $0x3f8] sm:$0xff] }
 0x253   :  { %3594 = vmatpush.bf16.msrb.mxu0 %v2662_v13  ;;  %v2286_v24 = vcvt.s32.f32 %v1262_v29  ;;  %v2294_v17 = vcvt.s32.f32 %v1270_v11  ;;  %v870_v28 = vunpack.c.1.s8 %v222_v59  ;;  %v990_v43 = vunpack.c.0.s8 %v254_v50  ;;  %v5662_v59 = vpop.f32.mrf.mxu3  ;;  %v3391_v13 = vpop.f32.mrf.mxu0 }
 0x254   :  { %v2790_v14 = vpack.c.bf16 %v2166_v62, %v2158_v55  ;;  %v1886_v10 = vcvt.s32.f32 %v862_v48  ;;  %v998_v20 = vunpack.c.1.s8 %v254_v50  ;;  %3607 = vmatpush.bf16.msrb.mxu1 %v2726_v53  ;;  %v1118_v49 = vunpack.c.0.s8 %v286_v33  ;;  %v3404_v8 = vpop.f32.mrf.mxu1 }
 0x255   :  { %v2854_v27 = vpack.c.bf16 %v2294_v17, %v2286_v24  ;;  %v1894_v22 = vcvt.s32.f32 %v870_v28  ;;  %v1126_v39 = vunpack.c.1.s8 %v286_v33  ;;  %v2014_v36 = vcvt.s32.f32 %v990_v43 }
 0x256   :  { %3620 = vmatpush.bf16.msrb.mxu2 %v2790_v14  ;;  %v2022_v23 = vcvt.s32.f32 %v998_v20  ;;  %v1246_v30 = vunpack.c.0.s8 %v318_v54  ;;  %v1254_v25 = vunpack.c.1.s8 %v318_v54  ;;  %v2142_v21 = vcvt.s32.f32 %v1118_v49 }
 0x257   :  { %3633 = vmatpush.bf16.msrb.mxu3 %v2854_v27  ;;  %v2654_v50 = vpack.c.bf16 %v1894_v22, %v1886_v10  ;;  %v2150_v47 = vcvt.s32.f32 %v1126_v39  ;;  %v463_v57 = vunpack.c.2.s8 %v5656_v4  ;;  %v471_v37 = vunpack.c.3.s8 %v5656_v4 }
 0x258   :  { %v2718_v60 = vpack.c.bf16 %v2022_v23, %v2014_v36  ;;  %v2270_v33 = vcvt.s32.f32 %v1246_v30  ;;  %v2278_v1 = vcvt.s32.f32 %v1254_v25  ;;  %v591_v52 = vunpack.c.2.s8 %v5658_v16  ;;  %v3417_v30 = vpop.f32.mrf.mxu2 }
 0x259   :  { %3595 = vmatpush.bf16.msrb.mxu0 %v2654_v50  ;;  %v2782_v54 = vpack.c.bf16 %v2150_v47, %v2142_v21  ;;  %v1487_v45 = vcvt.s32.f32 %v463_v57  ;;  %v599_v44 = vunpack.c.3.s8 %v5658_v16  ;;  %v1495_v11 = vcvt.s32.f32 %v471_v37  ;;  %v143_v37 = vld [vmem:[#allocation5 + $0x1b8] sm:$0xff] }
 0x25a   :  { %3608 = vmatpush.bf16.msrb.mxu1 %v2718_v60  ;;  %v2846_v29 = vpack.c.bf16 %v2278_v1, %v2270_v33  ;;  %v719_v55 = vunpack.c.2.s8 %v183_v40  ;;  %v727_v62 = vunpack.c.3.s8 %v183_v40  ;;  %v1615_v48 = vcvt.s32.f32 %v591_v52 }
 0x25b   :  { %3621 = vmatpush.bf16.msrb.mxu2 %v2782_v54  ;;  %v1623_v53 = vcvt.s32.f32 %v599_v44  ;;  %v847_v24 = vunpack.c.2.s8 %v215_v56  ;;  %v855_v17 = vunpack.c.3.s8 %v215_v56  ;;  %v2455_v28 = vpack.c.bf16 %v1495_v11, %v1487_v45  ;;  %v3430_v25 = vpop.f32.mrf.mxu3  ;;  %v175_v44 = vld [vmem:[#allocation5 + $0x2b8] sm:$0xff] }
 0x25c   :  { %3634 = vmatpush.bf16.msrb.mxu3 %v2846_v29  ;;  %v1743_v14 = vcvt.s32.f32 %v719_v55  ;;  %v1751_v10 = vcvt.s32.f32 %v727_v62  ;;  %v3364_v43 = vadd.f32 %v5640_v15, %v3351_v19  ;;  %3596 = vmatmul.bf16.vlgmr.msrb.gmra.mxu0 %v5312_v7  ;;  %v447_v49 = vunpack.c.0.s8 %v5656_v4  ;;  %v111_v19 = vld [vmem:[#allocation5 + $0xb8] sm:$0xff] }
 0x25d   :  { %v2519_v20 = vpack.c.bf16 %v1623_v53, %v1615_v48  ;;  %v1871_v27 = vcvt.s32.f32 %v847_v24  ;;  %v1879_v22 = vcvt.s32.f32 %v855_v17  ;;  %3609 = vmatmul.bf16.vlgmr.msrb.gmra.mxu1 %v5321_v32  ;;  %3640 = vmatpush.bf16.msra.mxu0 %v2455_v28  ;;  %v455_v23 = vunpack.c.1.s8 %v5656_v4  ;;  %v207_v55 = vld [vmem:[#allocation5 + $0x3b8] sm:$0xff] }
 0x25e   :  { %v2583_v39 = vpack.c.bf16 %v1751_v10, %v1743_v14  ;;  %3622 = vmatmul.bf16.vlgmr.msrb.gmra.mxu2 %v5310_v2  ;;  %v5674_v36 = vadd.f32 %v5642_v34, %v3364_v43  ;;  %v575_v15 = vunpack.c.0.s8 %v5658_v16  ;;  %v1471_v21 = vcvt.s32.f32 %v447_v49 }
 0x25f   :  { %3653 = vmatpush.bf16.msra.mxu1 %v2519_v20  ;;  %v2647_v50 = vpack.c.bf16 %v1879_v22, %v1871_v27  ;;  %3635 = vmatmul.bf16.vlgmr.msrb.gmra.mxu3 %v5315_v9  ;;  %v583_v47 = vunpack.c.1.s8 %v5658_v16  ;;  %v703_v57 = vunpack.c.0.s8 %v183_v40  ;;  %v1479_v60 = vcvt.s32.f32 %v455_v23 }
 0x260   :  { %3666 = vmatpush.bf16.msra.mxu2 %v2583_v39  ;;  %v1599_v33 = vcvt.s32.f32 %v575_v15  ;;  %v711_v34 = vunpack.c.1.s8 %v183_v40  ;;  %v831_v1 = vunpack.c.0.s8 %v215_v56  ;;  %v839_v45 = vunpack.c.1.s8 %v215_v56 }
 0x261   :  { %3679 = vmatpush.bf16.msra.mxu3 %v2647_v50  ;;  %v1607_v4 = vcvt.s32.f32 %v583_v47  ;;  %v1727_v54 = vcvt.s32.f32 %v703_v57  ;;  %v431_v52 = vunpack.c.2.s8 %v111_v19  ;;  %v2447_v13 = vpack.c.bf16 %v1479_v60, %v1471_v21 }
 0x262   :  { %v1735_v8 = vcvt.s32.f32 %v711_v34  ;;  %v1855_v29 = vcvt.s32.f32 %v831_v1  ;;  %v439_v11 = vunpack.c.3.s8 %v111_v19  ;;  %v1863_v16 = vcvt.s32.f32 %v839_v45  ;;  %v103_v1 = vld [vmem:[#allocation5 + $0x78] sm:$0xff] }
 0x263   :  { %v2511_v62 = vpack.c.bf16 %v1607_v4, %v1599_v33  ;;  %v1455_v48 = vcvt.s32.f32 %v431_v52  ;;  %v559_v53 = vunpack.c.2.s8 %v143_v37  ;;  %3641 = vmatpush.bf16.msra.mxu0 %v2447_v13  ;;  %v567_v17 = vunpack.c.3.s8 %v143_v37  ;;  %v135_v13 = vld [vmem:[#allocation5 + $0x178] sm:$0xff] }
 0x264   :  { %v2575_v24 = vpack.c.bf16 %v1735_v8, %v1727_v54  ;;  %v1463_v40 = vcvt.s32.f32 %v439_v11  ;;  %v687_v28 = vunpack.c.2.s8 %v175_v44  ;;  %v2639_v14 = vpack.c.bf16 %v1863_v16, %v1855_v29 }
 0x265   :  { %3654 = vmatpush.bf16.msra.mxu1 %v2511_v62  ;;  %v1583_v10 = vcvt.s32.f32 %v559_v53  ;;  %v695_v56 = vunpack.c.3.s8 %v175_v44  ;;  %v815_v43 = vunpack.c.2.s8 %v207_v55  ;;  %v1591_v27 = vcvt.s32.f32 %v567_v17  ;;  %v167_v53 = vld [vmem:[#allocation5 + $0x278] sm:$0xff] }
 0x266   :  { %3667 = vmatpush.bf16.msra.mxu2 %v2575_v24  ;;  %v2439_v20 = vpack.c.bf16 %v1463_v40, %v1455_v48  ;;  %v1711_v22 = vcvt.s32.f32 %v687_v28  ;;  %v823_v49 = vunpack.c.3.s8 %v207_v55  ;;  %3680 = vmatpush.bf16.msra.mxu3 %v2639_v14  ;;  %v415_v15 = vunpack.c.0.s8 %v111_v19 }
 0x267   :  { %v1719_v39 = vcvt.s32.f32 %v695_v56  ;;  %v1839_v23 = vcvt.s32.f32 %v815_v43  ;;  %v423_v30 = vunpack.c.1.s8 %v111_v19  ;;  %v2503_v25 = vpack.c.bf16 %v1591_v27, %v1583_v10 }
 0x268   :  { %3642 = vmatpush.bf16.msra.mxu0 %v2439_v20  ;;  %v1847_v50 = vcvt.s32.f32 %v823_v49  ;;  %v543_v21 = vunpack.c.0.s8 %v143_v37  ;;  %v551_v47 = vunpack.c.1.s8 %v143_v37  ;;  %v1439_v60 = vcvt.s32.f32 %v415_v15 }
 0x269   :  { %v2567_v57 = vpack.c.bf16 %v1719_v39, %v1711_v22  ;;  %v1447_v33 = vcvt.s32.f32 %v423_v30  ;;  %v671_v34 = vunpack.c.0.s8 %v175_v44  ;;  %3655 = vmatpush.bf16.msra.mxu1 %v2503_v25  ;;  %v679_v52 = vunpack.c.1.s8 %v175_v44  ;;  %v199_v44 = vld [vmem:[#allocation5 + $0x378] sm:$0xff] }
 0x26a   :  { %v2631_v4 = vpack.c.bf16 %v1847_v50, %v1839_v23  ;;  %v1567_v54 = vcvt.s32.f32 %v543_v21  ;;  %v1575_v45 = vcvt.s32.f32 %v551_v47  ;;  %v799_v19 = vunpack.c.0.s8 %v207_v55 }
 0x26b   :  { %3668 = vmatpush.bf16.msra.mxu2 %v2567_v57  ;;  %v2431_v8 = vpack.c.bf16 %v1447_v33, %v1439_v60  ;;  %v1695_v29 = vcvt.s32.f32 %v671_v34  ;;  %v807_v11 = vunpack.c.1.s8 %v207_v55  ;;  %v1703_v16 = vcvt.s32.f32 %v679_v52 }
 0x26c   :  { %3681 = vmatpush.bf16.msra.mxu3 %v2631_v4  ;;  %v2495_v62 = vpack.c.bf16 %v1575_v45, %v1567_v54  ;;  %v3390_v37 = vadd.f32 %v5650_v12, %v5674_v36  ;;  %v399_v48 = vunpack.c.2.s8 %v103_v1  ;;  %v1823_v24 = vcvt.s32.f32 %v799_v19  ;;  %v95_v19 = vld [vmem:[#allocation5 + $0x38] sm:$0xff] }
 0x26d   :  { %3643 = vmatpush.bf16.msra.mxu0 %v2431_v8  ;;  %v1831_v40 = vcvt.s32.f32 %v807_v11  ;;  %v407_v17 = vunpack.c.3.s8 %v103_v1  ;;  %v527_v28 = vunpack.c.2.s8 %v135_v13  ;;  %v2559_v14 = vpack.c.bf16 %v1703_v16, %v1695_v29 }
 0x26e   :  { %3656 = vmatpush.bf16.msra.mxu1 %v2495_v62  ;;  %v3403_v10 = vadd.f32 %v5652_v18, %v3390_v37  ;;  %v1423_v56 = vcvt.s32.f32 %v399_v48  ;;  %v535_v55 = vunpack.c.3.s8 %v135_v13  ;;  %v655_v22 = vunpack.c.2.s8 %v167_v53  ;;  %v127_v48 = vld [vmem:[#allocation5 + $0x138] sm:$0xff] }
 0x26f   :  { %v2623_v43 = vpack.c.bf16 %v1831_v40, %v1823_v24  ;;  %v1431_v20 = vcvt.s32.f32 %v407_v17  ;;  %v1551_v27 = vcvt.s32.f32 %v527_v28  ;;  %3669 = vmatpush.bf16.msra.mxu2 %v2559_v14  ;;  %v663_v36 = vunpack.c.3.s8 %v167_v53  ;;  %v159_v14 = vld [vmem:[#allocation5 + $0x238] sm:$0xff] }
 0x270   :  { %v1559_v12 = vcvt.s32.f32 %v535_v55  ;;  %v783_v49 = vunpack.c.2.s8 %v199_v44  ;;  %v791_v39 = vunpack.c.3.s8 %v199_v44  ;;  %v1679_v15 = vcvt.s32.f32 %v655_v22 }
 0x271   :  { %3682 = vmatpush.bf16.msra.mxu3 %v2623_v43  ;;  %v2423_v23 = vpack.c.bf16 %v1431_v20, %v1423_v56  ;;  %v3416_v30 = vadd.f32 %v5660_v5, %v3403_v10  ;;  %v383_v25 = vunpack.c.0.s8 %v103_v1  ;;  %v1687_v21 = vcvt.s32.f32 %v663_v36  ;;  %v191_v43 = vld [vmem:[#allocation5 + $0x338] sm:$0xff] }
 0x272   :  { %v2487_v50 = vpack.c.bf16 %v1559_v12, %v1551_v27  ;;  %v1807_v18 = vcvt.s32.f32 %v783_v49  ;;  %v1815_v47 = vcvt.s32.f32 %v791_v39  ;;  %v391_v60 = vunpack.c.1.s8 %v103_v1 }
 0x273   :  { %3644 = vmatpush.bf16.msra.mxu0 %v2423_v23  ;;  %v5685_v57 = vadd.f32 %v5662_v59, %v3416_v30  ;;  %v1407_v33 = vcvt.s32.f32 %v383_v25  ;;  %v511_v34 = vunpack.c.0.s8 %v135_v13  ;;  %v2551_v4 = vpack.c.bf16 %v1687_v21, %v1679_v15 }
 0x274   :  { %3657 = vmatpush.bf16.msra.mxu1 %v2487_v50  ;;  %v2615_v54 = vpack.c.bf16 %v1815_v47, %v1807_v18  ;;  %v519_v45 = vunpack.c.1.s8 %v135_v13  ;;  %v639_v52 = vunpack.c.0.s8 %v167_v53  ;;  %v5688_v8 = vadd.f32 1e-05, %v5646_v26 }
 0x275   :  { %v1415_v5 = vcvt.s32.f32 %v391_v60  ;;  %v1535_v29 = vcvt.s32.f32 %v511_v34  ;;  %3670 = vmatpush.bf16.msra.mxu2 %v2551_v4  ;;  %v647_v62 = vunpack.c.1.s8 %v167_v53  ;;  %v767_v16 = vunpack.c.0.s8 %v199_v44 }
 0x276   :  { %3683 = vmatpush.bf16.msra.mxu3 %v2615_v54  ;;  %v1543_v11 = vcvt.s32.f32 %v519_v45  ;;  %v1663_v59 = vcvt.s32.f32 %v639_v52  ;;  %v775_v37 = vunpack.c.1.s8 %v199_v44  ;;  %v367_v13 = vunpack.c.2.s8 %v95_v19 }
 0x277   :  { %v2415_v1 = vpack.c.bf16 %v1415_v5, %v1407_v33  ;;  %v1671_v40 = vcvt.s32.f32 %v647_v62  ;;  %v1791_v17 = vcvt.s32.f32 %v767_v16  ;;  %5089 = vrsqrt.f32 %v5688_v8 }
 0x278   :  { %v2479_v24 = vpack.c.bf16 %v1543_v11, %v1535_v29  ;;  %v1799_v26 = vcvt.s32.f32 %v775_v37  ;;  %v375_v28 = vunpack.c.3.s8 %v95_v19  ;;  %v1391_v56 = vcvt.s32.f32 %v367_v13 }
 0x279   :  { %3645 = vmatpush.bf16.msra.mxu0 %v2415_v1  ;;  %v2543_v10 = vpack.c.bf16 %v1671_v40, %v1663_v59  ;;  %v495_v55 = vunpack.c.2.s8 %v127_v48  ;;  %v503_v53 = vunpack.c.3.s8 %v127_v48  ;;  %v623_v12 = vunpack.c.2.s8 %v159_v14  ;;  %v247_v59 = vld [vmem:[#allocation5 + $0x4f8] sm:$0xff] }
 0x27a   :  { %3658 = vmatpush.bf16.msra.mxu1 %v2479_v24  ;;  %v2607_v20 = vpack.c.bf16 %v1799_v26, %v1791_v17  ;;  %v1399_v27 = vcvt.s32.f32 %v375_v28  ;;  %v631_v36 = vunpack.c.3.s8 %v159_v14  ;;  %v3907_v49 = vmul.f32 %v5648_v3, %v5637_v0  ;;  %v279_v24 = vld [vmem:[#allocation5 + $0x5f8] sm:$0xff] }
 0x27b   :  { %3671 = vmatpush.bf16.msra.mxu2 %v2543_v10  ;;  %v1519_v44 = vcvt.s32.f32 %v495_v55  ;;  %v1527_v22 = vcvt.s32.f32 %v503_v53  ;;  %v751_v23 = vunpack.c.2.s8 %v191_v43  ;;  %v1647_v30 = vcvt.s32.f32 %v623_v12 }
 0x27c   :  { %3684 = vmatpush.bf16.msra.mxu3 %v2607_v20  ;;  %v2407_v39 = vpack.c.bf16 %v1399_v27, %v1391_v56  ;;  %v1655_v25 = vcvt.s32.f32 %v631_v36  ;;  %v759_v50 = vunpack.c.3.s8 %v191_v43  ;;  %v351_v47 = vunpack.c.0.s8 %v95_v19  ;;  %v311_v56 = vld [vmem:[#allocation5 + $0x6f8] sm:$0xff] }
 0x27d   :  { %v2471_v15 = vpack.c.bf16 %v1527_v22, %v1519_v44  ;;  %v5693_v21 = vpop.eup %5089  ;;  %v1775_v18 = vcvt.s32.f32 %v751_v23  ;;  %v359_v34 = vunpack.c.1.s8 %v95_v19  ;;  %v479_v4 = vunpack.c.0.s8 %v127_v48  ;;  %v343_v44 = vld [vmem:[#allocation5 + $0x7f8] sm:$0xff] }
 0x27e   :  { %3646 = vmatpush.bf16.msra.mxu0 %v2407_v39  ;;  %v2535_v60 = vpack.c.bf16 %v1655_v25, %v1647_v30  ;;  %v1783_v33 = vcvt.s32.f32 %v759_v50  ;;  %v3908_v54 = vmul.f32 %v5648_v3, %v3907_v49  ;;  %v1375_v45 = vcvt.s32.f32 %v351_v47 }
 0x27f   :  { %3659 = vmatpush.bf16.msra.mxu1 %v2471_v15  ;;  %v487_v52 = vunpack.c.1.s8 %v127_v48  ;;  %v1383_v29 = vcvt.s32.f32 %v359_v34  ;;  %v1503_v11 = vcvt.s32.f32 %v479_v4  ;;  %v607_v62 = vunpack.c.0.s8 %v159_v14 }
 0x280   :  { %3672 = vmatpush.bf16.msra.mxu2 %v2535_v60  ;;  %v2599_v5 = vpack.c.bf16 %v1783_v33, %v1775_v18  ;;  %v3917_v16 = vmul.f32 %v5693_v21, %v5688_v8  ;;  %v615_v37 = vunpack.c.1.s8 %v159_v14  ;;  %v735_v17 = vunpack.c.0.s8 %v191_v43 }
 0x281   :  { %v1511_v1 = vcvt.s32.f32 %v487_v52  ;;  %v2399_v40 = vpack.c.bf16 %v1383_v29, %v1375_v45  ;;  %v1631_v19 = vcvt.s32.f32 %v607_v62  ;;  %v743_v13 = vunpack.c.1.s8 %v191_v43 }
 0x282   :  { %3685 = vmatpush.bf16.msra.mxu3 %v2599_v5  ;;  %v5698_v26 = vmul.f32 0.5, %v3908_v54  ;;  %v1639_v28 = vcvt.s32.f32 %v615_v37  ;;  %v975_v10 = vunpack.c.2.s8 %v247_v59  ;;  %v1759_v55 = vcvt.s32.f32 %v735_v17  ;;  %v5710_v17 = vld [vmem:[#allocation5 + $0x5b8] sm:$0xff] }
 0x283   :  { %v2463_v48 = vpack.c.bf16 %v1511_v1, %v1503_v11  ;;  %3647 = vmatpush.bf16.msra.mxu0 %v2399_v40  ;;  %v1767_v53 = vcvt.s32.f32 %v743_v13  ;;  %v983_v20 = vunpack.c.3.s8 %v247_v59  ;;  %v1103_v27 = vunpack.c.2.s8 %v279_v24  ;;  %v5707_v1 = vld [vmem:[#allocation5 + $0x4b8] sm:$0xff] }
 0x284   :  { %v3918_v14 = vmul.f32 %v5693_v21, %v3917_v16  ;;  %v2527_v22 = vpack.c.bf16 %v1639_v28, %v1631_v19  ;;  %v1999_v12 = vcvt.s32.f32 %v975_v10  ;;  %v1111_v36 = vunpack.c.3.s8 %v279_v24 }
 0x285   :  { %3660 = vmatpush.bf16.msra.mxu1 %v2463_v48  ;;  %v2591_v49 = vpack.c.bf16 %v1767_v53, %v1759_v55  ;;  %v2007_v43 = vcvt.s32.f32 %v983_v20  ;;  %v2127_v39 = vcvt.s32.f32 %v1103_v27  ;;  %v1231_v23 = vunpack.c.2.s8 %v311_v56  ;;  %v5716_v55 = vpop.f32.mrf.mxu1 }
 0x286   :  { %3673 = vmatpush.bf16.msra.mxu2 %v2527_v22  ;;  %v2135_v15 = vcvt.s32.f32 %v1111_v36  ;;  %v1239_v30 = vunpack.c.3.s8 %v311_v56  ;;  %v1359_v25 = vunpack.c.2.s8 %v343_v44  ;;  %3648 = vmatmul.bf16.vlgmr.msra.gmra.mxu0 %v5293_v31  ;;  %v1367_v47 = vunpack.c.3.s8 %v343_v44 }
 0x287   :  { %3686 = vmatpush.bf16.msra.mxu3 %v2591_v49  ;;  %v2711_v50 = vpack.c.bf16 %v2007_v43, %v1999_v12  ;;  %v2255_v18 = vcvt.s32.f32 %v1231_v23  ;;  %v959_v60 = vunpack.c.0.s8 %v247_v59  ;;  %v3910_v33 = vsub.f32 1.5, %v5698_v26 }
 0x288   :  { %3661 = vmatmul.bf16.vlgmr.msra.gmra.mxu1 %v5298_v38  ;;  %v5704_v34 = vmul.f32 0.5, %v3918_v14  ;;  %v2775_v4 = vpack.c.bf16 %v2135_v15, %v2127_v39  ;;  %v2263_v54 = vcvt.s32.f32 %v1239_v30  ;;  %v2383_v45 = vcvt.s32.f32 %v1359_v25  ;;  %v303_v14 = vld [vmem:[#allocation5 + $0x6b8] sm:$0xff] }
 0x289   :  { %3692 = vmatpush.bf16.msrb.mxu0 %v2711_v50  ;;  %v2391_v52 = vcvt.s32.f32 %v1367_v47  ;;  %v967_v5 = vunpack.c.1.s8 %v247_v59  ;;  %v1983_v29 = vcvt.s32.f32 %v959_v60  ;;  %3674 = vmatmul.bf16.vlgmr.msra.gmra.mxu2 %v5284_v6  ;;  %v1087_v11 = vunpack.c.0.s8 %v279_v24 }
 0x28a   :  { %3705 = vmatpush.bf16.msrb.mxu1 %v2775_v4  ;;  %v2839_v31 = vpack.c.bf16 %v2263_v54, %v2255_v18  ;;  %v1095_v62 = vunpack.c.1.s8 %v279_v24  ;;  %v1215_v16 = vunpack.c.0.s8 %v311_v56  ;;  %3687 = vmatmul.bf16.vlgmr.msra.gmra.mxu3 %v5295_v35  ;;  %v1223_v40 = vunpack.c.1.s8 %v311_v56  ;;  %v5714_v35 = vpop.f32.mrf.mxu0 }
 0x28b   :  { %v2903_v38 = vpack.c.bf16 %v2391_v52, %v2383_v45  ;;  %v1991_v37 = vcvt.s32.f32 %v967_v5  ;;  %v1343_v19 = vunpack.c.0.s8 %v343_v44  ;;  %v2111_v59 = vcvt.s32.f32 %v1087_v11 }
 0x28c   :  { %3718 = vmatpush.bf16.msrb.mxu2 %v2839_v31  ;;  %v2119_v13 = vcvt.s32.f32 %v1095_v62  ;;  %v2239_v26 = vcvt.s32.f32 %v1215_v16  ;;  %v1351_v6 = vunpack.c.1.s8 %v343_v44  ;;  %vm3913_vm1 = vweird.f32 %v5648_v3  ;;  %v5720_v44 = vld [vmem:[#allocation5 + $0x7b8] sm:$0xff] }
 0x28d   :  { %3731 = vmatpush.bf16.msrb.mxu3 %v2903_v38  ;;  %v2703_v24 = vpack.c.bf16 %v1991_v37, %v1983_v29  ;;  %v2247_v48 = vcvt.s32.f32 %v1223_v40  ;;  %v2367_v28 = vcvt.s32.f32 %v1343_v19  ;;  %v943_v10 = vunpack.c.2.s8 %v5707_v1  ;;  %v5739_v37 = vpop.f32.mrf.mxu3 }
 0x28e   :  { %v2767_v56 = vpack.c.bf16 %v2119_v13, %v2111_v59  ;;  %v2375_v53 = vcvt.s32.f32 %v1351_v6  ;;  %v951_v20 = vunpack.c.3.s8 %v5707_v1  ;;  %v1071_v27 = vunpack.c.2.s8 %v5710_v17  ;;  %v3456_v6 = vpop.f32.mrf.mxu1 }
 0x28f   :  { %v5723_v22 = vmul.f32 %v5648_v3, %v3910_v33  ;;  %vm3912_vm2 = vweird.f32 %v5637_v0  ;;  %v3920_v12 = vsub.f32 1.5, %v5704_v34  ;;  %3693 = vmatpush.bf16.msrb.mxu0 %v2703_v24  ;;  %v2831_v36 = vpack.c.bf16 %v2247_v48, %v2239_v26  ;;  %v5732_v34 = vpop.f32.mrf.mxu2 }
 0x290   :  { %v1967_v49 = vcvt.s32.f32 %v943_v10  ;;  %3706 = vmatpush.bf16.msrb.mxu1 %v2767_v56  ;;  %v2895_v43 = vpack.c.bf16 %v2375_v53, %v2367_v28  ;;  %v1975_v39 = vcvt.s32.f32 %v951_v20  ;;  %v1079_v23 = vunpack.c.3.s8 %v5710_v17  ;;  %vm5755_vm6 = vmor %vm3912_vm2, %vm3913_vm1 }
 0x291   :  { %v2095_v15 = vcvt.s32.f32 %v1071_v27  ;;  %vm3923_vm3 = vweird.f32 %v5693_v21  ;;  %3719 = vmatpush.bf16.msrb.mxu2 %v2831_v36  ;;  %v1199_v30 = vunpack.c.2.s8 %v303_v14  ;;  %v1207_v25 = vunpack.c.3.s8 %v303_v14 }
 0x292   :  { %v1327_v50 = vunpack.c.2.s8 %v5720_v44  ;;  %3732 = vmatpush.bf16.msrb.mxu3 %v2895_v43  ;;  %v2695_v18 = vpack.c.bf16 %v1975_v39, %v1967_v49  ;;  %v2103_v47 = vcvt.s32.f32 %v1079_v23  ;;  %v1335_v60 = vunpack.c.3.s8 %v5720_v44  ;;  %v3443_v40 = vpop.f32.mrf.mxu0  ;;  %v327_v43 = vld [vmem:[#allocation5 + $0x778] sm:$0xff] }
 0x293   :  { %v927_v33 = vunpack.c.0.s8 %v5707_v1  ;;  %v3921_v4 = vmul.f32 %v5693_v21, %v3920_v12  ;;  %v2223_v54 = vcvt.s32.f32 %v1199_v30  ;;  %v2231_v45 = vcvt.s32.f32 %v1207_v25 }
 0x294   :  { %v2351_v52 = vcvt.s32.f32 %v1327_v50  ;;  %3694 = vmatpush.bf16.msrb.mxu0 %v2695_v18  ;;  %v2759_v5 = vpack.c.bf16 %v2103_v47, %v2095_v15  ;;  %v2359_v29 = vcvt.s32.f32 %v1335_v60  ;;  %v935_v31 = vunpack.c.1.s8 %v5707_v1 }
 0x295   :  { %v1951_v11 = vcvt.s32.f32 %v927_v33  ;;  %vm3922_vm4 = vweird.f32 %v5688_v8  ;;  %v2823_v62 = vpack.c.bf16 %v2231_v45, %v2223_v54  ;;  %v1055_v16 = vunpack.c.0.s8 %v5710_v17  ;;  %v231_v8 = vld [vmem:[#allocation5 + $0x478] sm:$0xff] }
 0x296   :  { %v1063_v38 = vunpack.c.1.s8 %v5710_v17  ;;  %vm5743_vm5 = vmor %vm3922_vm4, %vm3923_vm3  ;;  %3707 = vmatpush.bf16.msrb.mxu1 %v2759_v5  ;;  %v2887_v59 = vpack.c.bf16 %v2359_v29, %v2351_v52  ;;  %v1959_v1 = vcvt.s32.f32 %v935_v31  ;;  %v1183_v13 = vunpack.c.0.s8 %v303_v14  ;;  %v3482_v31 = vpop.f32.mrf.mxu3  ;;  %v5768_v19 = vpop.f32.mrf.mxu1 }
 0x297   :  { %v1191_v26 = vunpack.c.1.s8 %v303_v14  ;;  %v3925_v17 = vsel %vm5743_vm5, %v5693_v21, %v3921_v4  ;;  %3720 = vmatpush.bf16.msrb.mxu2 %v2823_v62  ;;  %v2079_v24 = vcvt.s32.f32 %v1055_v16  ;;  %v1311_v28 = vunpack.c.0.s8 %v5720_v44  ;;  %v263_v21 = vld [vmem:[#allocation5 + $0x578] sm:$0xff]  ;;  %v3469_v25 = vpop.f32.mrf.mxu2 }
 0x298   :  { %v2087_v48 = vcvt.s32.f32 %v1063_v38  ;;  %3733 = vmatpush.bf16.msrb.mxu3 %v2887_v59  ;;  %v2687_v56 = vpack.c.bf16 %v1959_v1, %v1951_v11  ;;  %v2207_v53 = vcvt.s32.f32 %v1183_v13  ;;  %v1319_v27 = vunpack.c.1.s8 %v5720_v44  ;;  %v295_v14 = vld [vmem:[#allocation5 + $0x678] sm:$0xff] }
 0x299   :  { %v2215_v20 = vcvt.s32.f32 %v1191_v26  ;;  %v3915_v12 = vsel %vm5755_vm6, %v5648_v3, %v5723_v22  ;;  %v2335_v49 = vcvt.s32.f32 %v1311_v28  ;;  %v911_v0 = vunpack.c.2.s8 %v231_v8  ;;  %v223_v28 = vld [vmem:[#allocation5 + $0x438] sm:$0xff] }
 0x29a   :  { %v2751_v36 = vpack.c.bf16 %v2087_v48, %v2079_v24  ;;  %v5764_v39 = vrot.slane %v3925_v17, 7  ;;  %3695 = vmatpush.bf16.msrb.mxu0 %v2687_v56  ;;  %v2343_v15 = vcvt.s32.f32 %v1319_v27  ;;  %v919_v30 = vunpack.c.3.s8 %v231_v8  ;;  %v5766_v11 = vpop.f32.mrf.mxu0 }
 0x29b   :  { %v2815_v23 = vpack.c.bf16 %v2215_v20, %v2207_v53  ;;  %v1935_v44 = vcvt.s32.f32 %v911_v0  ;;  %v1039_v50 = vunpack.c.2.s8 %v263_v21  ;;  %v1047_v18 = vunpack.c.3.s8 %v263_v21 }
 0x29c   :  { %3708 = vmatpush.bf16.msrb.mxu1 %v2751_v36  ;;  %v1167_v47 = vunpack.c.2.s8 %v295_v14  ;;  %v2879_v60 = vpack.c.bf16 %v2343_v15, %v2335_v49  ;;  %v1943_v33 = vcvt.s32.f32 %v919_v30  ;;  %v1175_v4 = vunpack.c.3.s8 %v295_v14  ;;  %v255_v36 = vld [vmem:[#allocation5 + $0x538] sm:$0xff] }
 0x29d   :  { %3721 = vmatpush.bf16.msrb.mxu2 %v2815_v23  ;;  %v1295_v54 = vunpack.c.2.s8 %v327_v43  ;;  %v2063_v45 = vcvt.s32.f32 %v1039_v50  ;;  %v2071_v52 = vcvt.s32.f32 %v1047_v18  ;;  %v1303_v29 = vunpack.c.3.s8 %v327_v43  ;;  %v287_v50 = vld [vmem:[#allocation5 + $0x638] sm:$0xff] }
 0x29e   :  { %v2191_v5 = vcvt.s32.f32 %v1167_v47  ;;  %3734 = vmatpush.bf16.msrb.mxu3 %v2879_v60  ;;  %v2679_v62 = vpack.c.bf16 %v1943_v33, %v1935_v44  ;;  %v2199_v16 = vcvt.s32.f32 %v1175_v4  ;;  %v895_v40 = vunpack.c.0.s8 %v231_v8  ;;  %v319_v4 = vld [vmem:[#allocation5 + $0x738] sm:$0xff] }
 0x29f   :  { %v2319_v38 = vcvt.s32.f32 %v1295_v54  ;;  %v2743_v59 = vpack.c.bf16 %v2071_v52, %v2063_v45  ;;  %v2327_v1 = vcvt.s32.f32 %v1303_v29  ;;  %v903_v13 = vunpack.c.1.s8 %v231_v8  ;;  %v5770_v30 = vpop.f32.mrf.mxu2 }
 0x2a0   :  { %v1023_v26 = vunpack.c.0.s8 %v263_v21  ;;  %3696 = vmatpush.bf16.msrb.mxu0 %v2679_v62  ;;  %v2807_v6 = vpack.c.bf16 %v2199_v16, %v2191_v5  ;;  %v1919_v17 = vcvt.s32.f32 %v895_v40  ;;  %v1031_v24 = vunpack.c.1.s8 %v263_v21  ;;  %v5772_v5 = vpop.f32.mrf.mxu3 }
 0x2a1   :  { %v1151_v48 = vunpack.c.0.s8 %v295_v14  ;;  %3709 = vmatpush.bf16.msrb.mxu1 %v2743_v59  ;;  %v2871_v56 = vpack.c.bf16 %v2327_v1, %v2319_v38  ;;  %v1927_v53 = vcvt.s32.f32 %v903_v13  ;;  %v1159_v27 = vunpack.c.1.s8 %v295_v14  ;;  %v3508_v38 = vpop.f32.mrf.mxu1 }
 0x2a2   :  { %v2047_v20 = vcvt.s32.f32 %v1023_v26  ;;  %3722 = vmatpush.bf16.msrb.mxu2 %v2807_v6  ;;  %v2055_v49 = vcvt.s32.f32 %v1031_v24  ;;  %v1279_v23 = vunpack.c.0.s8 %v327_v43  ;;  %v1287_v15 = vunpack.c.1.s8 %v327_v43  ;;  %v3495_v43 = vpop.f32.mrf.mxu0 }
 0x2a3   :  { %v2175_v0 = vcvt.s32.f32 %v1151_v48  ;;  %3735 = vmatpush.bf16.msrb.mxu3 %v2871_v56  ;;  %v2671_v8 = vpack.c.bf16 %v1927_v53, %v1919_v17  ;;  %v2183_v25 = vcvt.s32.f32 %v1159_v27  ;;  %v879_v44 = vunpack.c.2.s8 %v223_v28 }
 0x2a4   :  { %v887_v21 = vunpack.c.3.s8 %v223_v28  ;;  %v2735_v18 = vpack.c.bf16 %v2055_v49, %v2047_v20  ;;  %v2303_v47 = vcvt.s32.f32 %v1279_v23  ;;  %v2311_v60 = vcvt.s32.f32 %v1287_v15 }
 0x2a5   :  { %v1007_v33 = vunpack.c.2.s8 %v255_v36  ;;  %3697 = vmatpush.bf16.msrb.mxu0 %v2671_v8  ;;  %v2799_v14 = vpack.c.bf16 %v2183_v25, %v2175_v0  ;;  %v1903_v54 = vcvt.s32.f32 %v879_v44  ;;  %v1015_v52 = vunpack.c.3.s8 %v255_v36 }
 0x2a6   :  { %v1911_v45 = vcvt.s32.f32 %v887_v21  ;;  %3710 = vmatpush.bf16.msrb.mxu1 %v2735_v18  ;;  %v2863_v29 = vpack.c.bf16 %v2311_v60, %v2303_v47  ;;  %v1135_v62 = vunpack.c.2.s8 %v287_v50  ;;  %v1143_v16 = vunpack.c.3.s8 %v287_v50 }
 0x2a7   :  { %v2031_v31 = vcvt.s32.f32 %v1007_v33  ;;  %3723 = vmatpush.bf16.msrb.mxu2 %v2799_v14  ;;  %v2039_v59 = vcvt.s32.f32 %v1015_v52  ;;  %v1263_v1 = vunpack.c.2.s8 %v319_v4  ;;  %v1271_v13 = vunpack.c.3.s8 %v319_v4  ;;  %v3521_v15 = vpop.f32.mrf.mxu2 }
 0x2a8   :  { %v2663_v40 = vpack.c.bf16 %v1911_v45, %v1903_v54  ;;  %3736 = vmatpush.bf16.msrb.mxu3 %v2863_v29  ;;  %v2159_v26 = vcvt.s32.f32 %v1135_v62  ;;  %v2167_v6 = vcvt.s32.f32 %v1143_v16  ;;  %v3455_v17 = vadd.f32 %v5716_v55, %v5714_v35  ;;  %v3534_v54 = vpop.f32.mrf.mxu3 }
 0x2a9   :  { %v863_v24 = vunpack.c.0.s8 %v223_v28  ;;  %v2727_v48 = vpack.c.bf16 %v2039_v59, %v2031_v31  ;;  %v2287_v56 = vcvt.s32.f32 %v1263_v1  ;;  %v2295_v53 = vcvt.s32.f32 %v1271_v13 }
 0x2aa   :  { %3698 = vmatpush.bf16.msrb.mxu0 %v2663_v40  ;;  %v871_v20 = vunpack.c.1.s8 %v223_v28  ;;  %v2791_v27 = vpack.c.bf16 %v2167_v6, %v2159_v26  ;;  %v991_v0 = vunpack.c.0.s8 %v255_v36  ;;  %v999_v23 = vunpack.c.1.s8 %v255_v36 }
 0x2ab   :  { %v1887_v49 = vcvt.s32.f32 %v863_v24  ;;  %3711 = vmatpush.bf16.msrb.mxu1 %v2727_v48  ;;  %v2855_v8 = vpack.c.bf16 %v2295_v53, %v2287_v56  ;;  %v1119_v44 = vunpack.c.0.s8 %v287_v50  ;;  %v1127_v21 = vunpack.c.1.s8 %v287_v50 }
 0x2ac   :  { %v1895_v25 = vcvt.s32.f32 %v871_v20  ;;  %3724 = vmatpush.bf16.msrb.mxu2 %v2791_v27  ;;  %v2015_v18 = vcvt.s32.f32 %v991_v0  ;;  %v2023_v47 = vcvt.s32.f32 %v999_v23  ;;  %v1247_v35 = vunpack.c.0.s8 %v319_v4 }
 0x2ad   :  { %v1255_v55 = vunpack.c.1.s8 %v319_v4  ;;  %3737 = vmatpush.bf16.msrb.mxu3 %v2855_v8  ;;  %v2143_v33 = vcvt.s32.f32 %v1119_v44  ;;  %v2151_v14 = vcvt.s32.f32 %v1127_v21  ;;  %v3468_v28 = vadd.f32 %v5732_v34, %v3455_v17 }
 0x2ae   :  { %v2655_v60 = vpack.c.bf16 %v1895_v25, %v1887_v49  ;;  %v2719_v45 = vpack.c.bf16 %v2023_v47, %v2015_v18  ;;  %v2271_v36 = vcvt.s32.f32 %v1247_v35  ;;  %v5785_v4 = vsel %vm4001_vm7, %v3915_v12, %v5764_v39  ;;  %v3558_v26 = vpop.f32.mrf.mxu1 }
 0x2af   :  { %v2279_v52 = vcvt.s32.f32 %v1255_v55  ;;  %v2783_v43 = vpack.c.bf16 %v2151_v14, %v2143_v33  ;;  %v3481_v50 = vadd.f32 %v5739_v37, %v3468_v28  ;;  %v3765_v31 = vrot.slane %v5588_v61, 4 }
 0x2b0   :  { %3699 = vmatpush.bf16.msrb.mxu0 %v2655_v60  ;;  %3712 = vmatpush.bf16.msrb.mxu1 %v2719_v45  ;;  %v3813_v37 = vmul.f32 %v5588_v61, %v5588_v61  ;;  %v3759_v22 = vrot.slane %v5489_v41, 4  ;;  %v3812_v10 = vmul.f32 %v5489_v41, %v5489_v41 }
 0x2b1   :  { %v2847_v34 = vpack.c.bf16 %v2279_v52, %v2271_v36  ;;  %3725 = vmatpush.bf16.msrb.mxu2 %v2783_v43  ;;  %v3494_v29 = vadd.f32 %v5766_v11, %v3481_v50  ;;  %v3766_v12 = vadd.f32 %v3765_v31, %v5588_v61 }
 0x2b2   :  { %v3836_v39 = vrot.slane %v3813_v37, 4 }
 0x2b3   :  { %3738 = vmatpush.bf16.msrb.mxu3 %v2847_v34  ;;  %3700 = vmatmul.bf16.vlgmr.msrb.gmra.mxu0 %v5312_v7  ;;  %v3507_v3 = vadd.f32 %v5768_v19, %v3494_v29  ;;  %v3830_v19 = vrot.slane %v3812_v10, 4  ;;  %v3767_v62 = vrot.slane %v3766_v12, 2 }
 0x2b4   :  { %3713 = vmatmul.bf16.vlgmr.msrb.gmra.mxu1 %v5321_v32  ;;  %3726 = vmatmul.bf16.vlgmr.msrb.gmra.mxu2 %v5310_v2  ;;  %v3760_v32 = vadd.f32 %v3759_v22, %v5489_v41  ;;  %v3837_v2 = vadd.f32 %v3836_v39, %v3813_v37 }
 0x2b5   :  { %v3520_v7 = vadd.f32 %v5770_v30, %v3507_v3  ;;  %v3831_v38 = vadd.f32 %v3830_v19, %v3812_v10  ;;  %v3768_v40 = vadd.f32 %v3767_v62, %v3766_v12 }
 0x2b6   :  { %3739 = vmatmul.bf16.vlgmr.msrb.gmra.mxu3 %v5315_v9  ;;  %v3761_v16 = vrot.slane %v3760_v32, 2  ;;  %v3838_v59 = vrot.slane %v3837_v2, 2  ;;  %v3545_v9 = vpop.f32.mrf.mxu0  ;;  %v3571_v6 = vpop.f32.mrf.mxu2 }
 0x2b7   :  { %v5802_v11 = vadd.f32 %v5772_v5, %v3520_v7  ;;  %v3832_v13 = vrot.slane %v3831_v38, 2  ;;  %v3559_v30 = vadd.f32 %v3558_v26, %v3545_v9  ;;  %v3584_v17 = vpop.f32.mrf.mxu3  ;;  %v3769_v24 = vrot.slane %v3768_v40, 1  ;;  %v3560_v8 = vpop.f32.mrf.mxu1 }
 0x2b8   :  { %v3762_v1 = vadd.f32 %v3761_v16, %v3760_v32  ;;  %v3839_v48 = vadd.f32 %v3838_v59, %v3837_v2 }
 0x2b9   :  { %v3572_v5 = vadd.f32 %v3571_v6, %v3559_v30  ;;  %v3833_v53 = vadd.f32 %v3832_v13, %v3831_v38  ;;  %v3770_v27 = vadd.f32 %v3769_v24, %v3768_v40 }
 0x2ba   :  { %v3763_v56 = vrot.slane %v3762_v1, 1  ;;  %v3840_v49 = vrot.slane %v3839_v48, 1 }
 0x2bb   :  { %v3585_v20 = vadd.f32 %v3584_v17, %v3572_v5  ;;  %v3834_v23 = vrot.slane %v3833_v53, 1  ;;  %v5806_v21 = vmul.f32 %v5603_v46, %v3770_v27 }
 0x2bc   :  { %v3764_v0 = vadd.f32 %v3763_v56, %v3762_v1  ;;  %v3841_v18 = vadd.f32 %v3840_v49, %v3839_v48 }
 0x2bd   :  { %v3835_v35 = vadd.f32 %v3834_v23, %v3833_v53  ;;  %v3877_v60 = vmul.f32 %v5806_v21, %v5806_v21 }
 0x2be   :  { %v3547_v15 = vpop.f32.mrf.mxu0  ;;  %v3573_v25 = vpop.f32.mrf.mxu2  ;;  %v5809_v47 = vmul.f32 %v5603_v46, %v3764_v0  ;;  %v3869_v55 = vmul.f32 %v3841_v18, %v5603_v46  ;;  %v3771_v18 = vrot.slane %v5685_v57, 4 }
 0x2bf   :  { %v3586_v44 = vpop.f32.mrf.mxu3  ;;  %v3868_v33 = vmul.f32 %v3835_v35, %v5603_v46  ;;  %v3777_v25 = vrot.slane %v5802_v11, 4  ;;  %v3814_v35 = vmul.f32 %v5685_v57, %v5685_v57 }
 0x2c0   :  { %v3876_v14 = vmul.f32 %v5809_v47, %v5809_v47  ;;  %v3885_v28 = vsub.f32 %v3869_v55, %v3877_v60  ;;  %v3815_v44 = vmul.f32 %v5802_v11, %v5802_v11 }
 0x2c1   :  { %v3778_v60 = vadd.f32 %v3777_v25, %v5802_v11 }
 0x2c2   :  { %v3884_v54 = vsub.f32 %v3868_v33, %v3876_v14  ;;  %v3893_v36 = vmax.f32 %v3885_v28, 0.0  ;;  %v3848_v33 = vrot.slane %v3815_v44, 4  ;;  %v3772_v14 = vadd.f32 %v3771_v18, %v5685_v57 }
 0x2c3   :  { %v3842_v28 = vrot.slane %v3814_v35, 4 }
 0x2c4   :  { %v3892_v50 = vmax.f32 %v3884_v54, 0.0  ;;  %v3901_v29 = vadd.f32 1e-05, %v3893_v36  ;;  %v3779_v36 = vrot.slane %v3778_v60, 2 }
 0x2c6   :  { %v3900_v31 = vadd.f32 1e-05, %v3892_v50  ;;  %5091 = vrsqrt.f32 %v3901_v29  ;;  %vm3942_vm10 = vweird.f32 %v3901_v29  ;;  %v3843_v50 = vadd.f32 %v3842_v28, %v3814_v35 }
 0x2c8   :  { %5093 = vrsqrt.f32 %v3900_v31  ;;  %vm3932_vm12 = vweird.f32 %v3900_v31 }
 0x2cc   :  { %v5092_v39 = vpop.eup %5091 }
 0x2cd   :  { %v3937_v2 = vmul.f32 %v5092_v39, %v3901_v29  ;;  %vm3943_vm8 = vweird.f32 %v5092_v39 }
 0x2ce   :  { %v5094_v19 = vpop.eup %5093  ;;  %vm3944_vm11 = vmor %vm3942_vm10, %vm3943_vm8 }
 0x2cf   :  { %v3927_v16 = vmul.f32 %v5094_v19, %v3900_v31  ;;  %v3938_v38 = vmul.f32 %v5092_v39, %v3937_v2  ;;  %vm3933_vm9 = vweird.f32 %v5094_v19  ;;  %v3780_v31 = vadd.f32 %v3779_v36, %v3778_v60 }
 0x2d0   :  { %vm3934_vm13 = vmor %vm3932_vm12, %vm3933_vm9 }
 0x2d1   :  { %v3928_v40 = vmul.f32 %v5094_v19, %v3927_v16  ;;  %v3939_v59 = vmul.f32 0.5, %v3938_v38 }
 0x2d3   :  { %v3929_v1 = vmul.f32 0.5, %v3928_v40  ;;  %v3940_v13 = vsub.f32 1.5, %v3939_v59 }
 0x2d5   :  { %v3930_v9 = vsub.f32 1.5, %v3929_v1  ;;  %v3941_v26 = vmul.f32 %v5092_v39, %v3940_v13 }
 0x2d7   :  { %v3931_v30 = vmul.f32 %v5094_v19, %v3930_v9  ;;  %v3945_v6 = vsel %vm3944_vm11, %v5092_v39, %v3941_v26  ;;  %v3781_v39 = vrot.slane %v3780_v31, 1 }
 0x2d8   :  { %v3996_v24 = vrot.slane %v3945_v6, 5 }
 0x2d9   :  { %v3597_v45 = vpop.f32.mrf.mxu0  ;;  %v3935_v17 = vsel %vm3934_vm13, %v5094_v19, %v3931_v30  ;;  %v3782_v40 = vadd.f32 %v3781_v39, %v3780_v31  ;;  %vm4007_vm13 = vcmask 1044484  }
 0x2da   :  { %v3598_v52 = vadd.f32 %v3597_v45, %v3585_v20  ;;  %v3610_v43 = vpop.f32.mrf.mxu1  ;;  %v3995_v48 = vrot.slane %v3935_v17, 6 }
 0x2db   :  { %v5837_v6 = vmul.f32 %v5603_v46, %v3782_v40 }
 0x2dc   :  { %v3611_v34 = vadd.f32 %v3610_v43, %v3598_v52  ;;  %v4004_v56 = vsel %vm4003_vm14, %v3995_v48, %v3996_v24  ;;  %v3849_v52 = vadd.f32 %v3848_v33, %v3815_v44  ;;  %v3773_v43 = vrot.slane %v3772_v14, 2 }
 0x2dd   :  { %v5822_v20 = vsel %vm4005_vm15, %v5785_v4, %v4004_v56 }
 0x2e1   :  { %v3623_v37 = vpop.f32.mrf.mxu2  ;;  %v3599_v3 = vpop.f32.mrf.mxu0 }
 0x2e2   :  { %v3624_v22 = vadd.f32 %v3623_v37, %v3611_v34  ;;  %v3636_v10 = vpop.f32.mrf.mxu3  ;;  %v3612_v7 = vpop.f32.mrf.mxu1  ;;  %v3850_v37 = vrot.slane %v3849_v52, 2  ;;  %v3774_v3 = vadd.f32 %v3773_v43, %v3772_v14 }
 0x2e4   :  { %v5817_v12 = vadd.f32 %v3636_v10, %v3624_v22  ;;  %v3844_v22 = vrot.slane %v3843_v50, 2  ;;  %v3775_v19 = vrot.slane %v3774_v3, 1 }
 0x2e6   :  { %v3783_v55 = vrot.slane %v5817_v12, 4  ;;  %v3816_v4 = vmul.f32 %v5817_v12, %v5817_v12  ;;  %v3776_v1 = vadd.f32 %v3775_v19, %v3774_v3 }
 0x2e8   :  { %v3784_v54 = vadd.f32 %v3783_v55, %v5817_v12  ;;  %v3854_v45 = vrot.slane %v3816_v4, 4  ;;  %v5840_v24 = vmul.f32 %v5603_v46, %v3776_v1 }
 0x2e9   :  { %v3625_v32 = vpop.f32.mrf.mxu2 }
 0x2ea   :  { %v3638_v62 = vpop.f32.mrf.mxu3  ;;  %v3785_v34 = vrot.slane %v3784_v54, 2  ;;  %v3855_v29 = vadd.f32 %v3854_v45, %v3816_v4  ;;  %v3851_v32 = vadd.f32 %v3850_v37, %v3849_v52  ;;  %v3878_v44 = vmul.f32 %v5840_v24, %v5840_v24 }
 0x2eb   :  { %v3845_v62 = vadd.f32 %v3844_v22, %v3843_v50 }
 0x2ec   :  { %v3786_v10 = vadd.f32 %v3785_v34, %v3784_v54  ;;  %v3856_v7 = vrot.slane %v3855_v29, 2  ;;  %v3852_v59 = vrot.slane %v3851_v32, 1 }
 0x2ed   :  { %v3846_v13 = vrot.slane %v3845_v62, 1 }
 0x2ee   :  { %v3787_v2 = vrot.slane %v3786_v10, 1  ;;  %v3857_v16 = vadd.f32 %v3856_v7, %v3855_v29  ;;  %v3853_v17 = vadd.f32 %v3852_v59, %v3851_v32 }
 0x2ef   :  { %v3847_v48 = vadd.f32 %v3846_v13, %v3845_v62 }
 0x2f0   :  { %v3788_v9 = vadd.f32 %v3787_v2, %v3786_v10  ;;  %v3858_v26 = vrot.slane %v3857_v16, 1 }
 0x2f1   :  { %v3870_v25 = vmul.f32 %v3847_v48, %v5603_v46 }
 0x303   :  { %v3649_v5 = vpop.f32.mrf.mxu0 }
 0x305   :  { %v3662_v53 = vpop.f32.mrf.mxu1 }
 0x306   :  { %v3663_v38 = vadd.f32 %v3662_v53, %v3649_v5  ;;  %v3859_v5 = vadd.f32 %v3858_v26, %v3857_v16 }
 0x308   :  { %v3872_v18 = vmul.f32 %v3859_v5, %v5603_v46 }
 0x30b   :  { %v3651_v27 = vpop.f32.mrf.mxu0 }
 0x30c   :  { %v3675_v49 = vpop.f32.mrf.mxu2  ;;  %v5843_v27 = vmul.f32 %v5603_v46, %v3788_v9 }
 0x30d   :  { %v3664_v0 = vpop.f32.mrf.mxu1  ;;  %v3688_v23 = vpop.f32.mrf.mxu3  ;;  %v3676_v30 = vadd.f32 %v3675_v49, %v3663_v38  ;;  %v3879_v49 = vmul.f32 %v5837_v6, %v5837_v6 }
 0x30e   :  { %v3880_v35 = vmul.f32 %v5843_v27, %v5843_v27 }
 0x30f   :  { %v3689_v53 = vadd.f32 %v3688_v23, %v3676_v30  ;;  %v3886_v23 = vsub.f32 %v3870_v25, %v3878_v44 }
 0x310   :  { %v3888_v14 = vsub.f32 %v3872_v18, %v3880_v35 }
 0x311   :  { %v3894_v43 = vmax.f32 %v3886_v23, 0.0 }
 0x312   :  { %v3896_v50 = vmax.f32 %v3888_v14, 0.0 }
 0x313   :  { %v3902_v22 = vadd.f32 1e-05, %v3894_v43  ;;  %v5018_v43 = vld [vmem:[#allocation8 + $0x38] sm:$0xff] }
 0x314   :  { %v3677_v15 = vpop.f32.mrf.mxu2  ;;  %v3904_v7 = vadd.f32 1e-05, %v3896_v50  ;;  %v5026_v50 = vld [vmem:[#allocation8 + $0x78] sm:$0xff]  ;;  %4631 = vmatpush.bf16.msra.mxu0 %v5018_v43 }
 0x315   :  { %v3690_v8 = vpop.f32.mrf.mxu3  ;;  %v3871_v15 = vmul.f32 %v3853_v17, %v5603_v46  ;;  %vm3952_vm4 = vweird.f32 %v3902_v22  ;;  %4644 = vmatpush.bf16.msra.mxu1 %v5026_v50 }
 0x316   :  { %vm3972_vm8 = vweird.f32 %v3904_v7 }
 0x317   :  { %v3887_v55 = vsub.f32 %v3871_v15, %v3879_v49 }
 0x319   :  { %v3895_v36 = vmax.f32 %v3887_v55, 0.0 }
 0x31b   :  { %v3903_v31 = vadd.f32 1e-05, %v3895_v36 }
 0x31d   :  { %5095 = vrsqrt.f32 %v3903_v31  ;;  %vm3962_vm2 = vweird.f32 %v3903_v31 }
 0x31e   :  { %5097 = vrsqrt.f32 %v3902_v22 }
 0x31f   :  { %5099 = vrsqrt.f32 %v3904_v7 }
 0x323   :  { %v5096_v1 = vpop.eup %5095 }
 0x324   :  { %v5863_v26 = vpop.eup %5097  ;;  %vm3963_vm0 = vweird.f32 %v5096_v1 }
 0x325   :  { %v5865_v30 = vpop.eup %5099  ;;  %v3947_v5 = vmul.f32 %v5863_v26, %v3902_v22  ;;  %vm3953_vm1 = vweird.f32 %v5863_v26  ;;  %vm5878_vm5 = vmor %vm3962_vm2, %vm3963_vm0  ;;  %vm4009_vm0 = vcmask 1046534   ;;  %vm4013_vm2 = vcmask 1043456  }
 0x326   :  { %vm3973_vm3 = vweird.f32 %v5865_v30  ;;  %vm5882_vm6 = vmor %vm3952_vm4, %vm3953_vm1  ;;  %vm4011_vm1 = vcmask 1045508  }
 0x327   :  { %vm5890_vm10 = vmor %vm3972_vm8, %vm3973_vm3 }
 0x330   :  { %v3701_v56 = vpop.f32.mrf.mxu0 }
 0x331   :  { %v3714_v0 = vpop.f32.mrf.mxu1  ;;  %v3702_v8 = vadd.f32 %v3701_v56, %v3689_v53  ;;  %v3957_v56 = vmul.f32 %v5096_v1, %v3903_v31 }
 0x333   :  { %v3715_v4 = vadd.f32 %v3714_v0, %v3702_v8  ;;  %v3967_v0 = vmul.f32 %v5865_v30, %v3904_v7  ;;  %v3958_v49 = vmul.f32 %v5096_v1, %v3957_v56  ;;  %v3948_v8 = vmul.f32 %v5863_v26, %v3947_v5  ;;  %v3744_v56 = vld [vmem:[#allocation7] ss:$2 sm:$0xff] }
 0x335   :  { %v3968_v44 = vmul.f32 %v5865_v30, %v3967_v0  ;;  %v3959_v18 = vmul.f32 0.5, %v3958_v49  ;;  %v3949_v35 = vmul.f32 0.5, %v3948_v8  ;;  %v5023_v49 = vld [vmem:[#allocation8 + $0x60] sm:$0xff] }
 0x337   :  { %v3727_v60 = vpop.f32.mrf.mxu2  ;;  %v3960_v55 = vsub.f32 1.5, %v3959_v18  ;;  %v3950_v23 = vsub.f32 1.5, %v3949_v35 }
 0x338   :  { %v3703_v33 = vpop.f32.mrf.mxu0  ;;  %v3728_v28 = vadd.f32 %v3727_v60, %v3715_v4 }
 0x339   :  { %v3740_v54 = vpop.f32.mrf.mxu3  ;;  %v3716_v45 = vpop.f32.mrf.mxu1  ;;  %v3961_v14 = vmul.f32 %v5096_v1, %v3960_v55 }
 0x33a   :  { %v5854_v52 = vadd.f32 %v3740_v54, %v3728_v28  ;;  %v3951_v54 = vmul.f32 %v5863_v26, %v3950_v23  ;;  %v5014_v23 = vld [vmem:[#allocation8 + $0x18] sm:$0xff] }
 0x33b   :  { %v3965_v31 = vsel %vm5878_vm5, %v5096_v1, %v3961_v14  ;;  %v5024_v1 = vld [vmem:[#allocation8 + $0x68] sm:$0xff] }
 0x33c   :  { %v3789_v34 = vrot.slane %v5854_v52, 4  ;;  %v3817_v29 = vmul.f32 %v5854_v52, %v5854_v52  ;;  %v3955_v7 = vsel %vm5882_vm6, %v5863_v26, %v3951_v54  ;;  %v5032_v26 = vld [vmem:[#allocation8 + $0xa8] sm:$0xff]  ;;  %v5030_v54 = vld [vmem:[#allocation8 + $0x98] sm:$0xff] }
 0x33e   :  { %v3790_v37 = vadd.f32 %v3789_v34, %v5854_v52  ;;  %v3860_v3 = vrot.slane %v3817_v29, 4  ;;  %v5034_v34 = vld [vmem:[#allocation8 + $0xb8] sm:$0xff] }
 0x33f   :  { %v3729_v10 = vpop.f32.mrf.mxu2  ;;  %4657 = vmatpush.bf16.msra.mxu2 %v5034_v34 }
 0x340   :  { %v3791_v39 = vrot.slane %v3790_v37, 2  ;;  %v3861_v32 = vadd.f32 %v3860_v3, %v3817_v29 }
 0x341   :  { %v3742_v19 = vpop.f32.mrf.mxu3 }
 0x342   :  { %v3792_v62 = vadd.f32 %v3791_v39, %v3790_v37  ;;  %v3862_v2 = vrot.slane %v3861_v32, 2  ;;  %v5042_v37 = vld [vmem:[#allocation8 + $0xf8] sm:$0xff]  ;;  %v5017_v39 = vld [vmem:[#allocation8 + $0x30] sm:$0xff] }
 0x343   :  { %4670 = vmatpush.bf16.msra.mxu3 %v5042_v37  ;;  %v5033_v19 = vld [vmem:[#allocation8 + $0xb0] sm:$0xff]  ;;  %4632 = vmatpush.bf16.msra.mxu0 %v5017_v39 }
 0x344   :  { %v3793_v16 = vrot.slane %v3792_v62, 1  ;;  %v3863_v38 = vadd.f32 %v3862_v2, %v3861_v32  ;;  %v5025_v32 = vld [vmem:[#allocation8 + $0x70] sm:$0xff]  ;;  %4658 = vmatpush.bf16.msra.mxu2 %v5033_v19 }
 0x345   :  { %4645 = vmatpush.bf16.msra.mxu1 %v5025_v32  ;;  %v5021_v39 = vld [vmem:[#allocation8 + $0x50] sm:$0xff] }
 0x346   :  { %v3794_v40 = vadd.f32 %v3793_v16, %v3792_v62  ;;  %v3864_v59 = vrot.slane %v3863_v38, 1  ;;  %v5041_v62 = vld [vmem:[#allocation8 + $0xf0] sm:$0xff] }
 0x347   :  { %4671 = vmatpush.bf16.msra.mxu3 %v5041_v62  ;;  %v5037_v62 = vld [vmem:[#allocation8 + $0xd0] sm:$0xff] }
 0x348   :  { %v5861_v13 = vmul.f32 %v5603_v46, %v3794_v40  ;;  %v3865_v9 = vadd.f32 %v3864_v59, %v3863_v38  ;;  %v3998_v38 = vrot.slane %v3965_v31, 3  ;;  %v5016_v59 = vld [vmem:[#allocation8 + $0x28] sm:$0xff]  ;;  %4659 = vmatpush.bf16.msra.mxu2 %v5032_v26 }
 0x349   :  { %4633 = vmatpush.bf16.msra.mxu0 %v5016_v59  ;;  %4646 = vmatpush.bf16.msra.mxu1 %v5024_v1  ;;  %v5036_v26 = vld [vmem:[#allocation8 + $0xc8] sm:$0xff] }
 0x34a   :  { %v3873_v17 = vmul.f32 %v3865_v9, %v5603_v46  ;;  %v3881_v48 = vmul.f32 %v5861_v13, %v5861_v13  ;;  %v3969_v46 = vmul.f32 0.5, %v3968_v44  ;;  %v3997_v9 = vrot.slane %v3955_v7, 4  ;;  %v5039_v44 = vld [vmem:[#allocation8 + $0xe0] sm:$0xff] }
 0x34c   :  { %v3889_v53 = vsub.f32 %v3873_v17, %v3881_v48  ;;  %v3970_v60 = vsub.f32 1.5, %v3969_v46  ;;  %v4008_v5 = vsel %vm4007_vm13, %v3997_v9, %v3998_v38  ;;  %v5012_v9 = vld [vmem:[#allocation8 + $0x8] sm:$0xff] }
 0x34d   :  { %4647 = vmatpush.bf16.msra.mxu1 %v5023_v49  ;;  %v5027_v49 = vld [vmem:[#allocation8 + $0x80] sm:$0xff] }
 0x34e   :  { %v3897_v15 = vmax.f32 %v3889_v53, 0.0  ;;  %v3971_v45 = vmul.f32 %v5865_v30, %v3970_v60  ;;  %v5022_v60 = vld [vmem:[#allocation8 + $0x58] sm:$0xff] }
 0x350   :  { %v3905_v25 = vadd.f32 1e-05, %v3897_v15  ;;  %v3975_v2 = vsel %vm5890_vm10, %v5865_v30, %v3971_v45  ;;  %v5040_v30 = vld [vmem:[#allocation8 + $0xe8] sm:$0xff]  ;;  %v5015_v15 = vld [vmem:[#allocation8 + $0x20] sm:$0xff]  ;;  %v5038_v45 = vld [vmem:[#allocation8 + $0xd8] sm:$0xff] }
 0x351   :  { %v3999_v17 = vrot.slane %v3975_v2, 2  ;;  %4672 = vmatpush.bf16.msra.mxu3 %v5040_v30  ;;  %4634 = vmatpush.bf16.msra.mxu0 %v5015_v15  ;;  %v3746_v2 = vld [vmem:[#allocation7 + $0x1] ss:$2 sm:$0xff] }
 0x352   :  { %5101 = vrsqrt.f32 %v3905_v25  ;;  %vm3982_vm11 = vweird.f32 %v3905_v25  ;;  %4648 = vmatpush.bf16.msra.mxu1 %v5022_v60  ;;  %v5074_v60 = vld [vmem:[#allocation8 + $0x1f8] sm:$0xff] }
 0x355   :  { %4673 = vmatpush.bf16.msra.mxu3 %v5039_v44  ;;  %4635 = vmatpush.bf16.msra.mxu0 %v5014_v23  ;;  %v5050_v44 = vld [vmem:[#allocation8 + $0x138] sm:$0xff] }
 0x356   :  { %4649 = vmatpush.bf16.msra.mxu1 %v5021_v39  ;;  %v5066_v23 = vld [vmem:[#allocation8 + $0x1b8] sm:$0xff] }
 0x358   :  { %v5102_v4 = vpop.eup %5101 }
 0x359   :  { %v3977_v33 = vmul.f32 %v5102_v4, %v3905_v25  ;;  %vm3983_vm9 = vweird.f32 %v5102_v4  ;;  %v5031_v25 = vld [vmem:[#allocation8 + $0xa0] sm:$0xff]  ;;  %4674 = vmatpush.bf16.msra.mxu3 %v5038_v45 }
 0x35a   :  { %vm3984_vm12 = vmor %vm3982_vm11, %vm3983_vm9  ;;  %4660 = vmatpush.bf16.msra.mxu2 %v5031_v25 }
 0x35b   :  { %v3978_v28 = vmul.f32 %v5102_v4, %v3977_v33 }
 0x35d   :  { %v3979_v36 = vmul.f32 0.5, %v3978_v28  ;;  %4675 = vmatpush.bf16.msra.mxu3 %v5037_v62  ;;  %v5047_v62 = vld [vmem:[#allocation8 + $0x120] sm:$0xff] }
 0x35e   :  { %4661 = vmatpush.bf16.msra.mxu2 %v5030_v54 }
 0x35f   :  { %v3980_v10 = vsub.f32 1.5, %v3979_v36 }
 0x361   :  { %v3981_v16 = vmul.f32 %v5102_v4, %v3980_v10  ;;  %4676 = vmatpush.bf16.msra.mxu3 %v5036_v26  ;;  %v5067_v26 = vld [vmem:[#allocation8 + $0x1c0] sm:$0xff] }
 0x363   :  { %v3985_v40 = vsel %vm3984_vm12, %v5102_v4, %v3981_v16 }
 0x364   :  { %v4000_v48 = vrot.slane %v3985_v40, 1 }
 0x366   :  { %v4010_v53 = vsel %vm4009_vm0, %v3999_v17, %v4000_v48  ;;  %v5020_v17 = vld [vmem:[#allocation8 + $0x48] sm:$0xff] }
 0x367   :  { %v4012_v0 = vsel %vm4011_vm1, %v4008_v5, %v4010_v53  ;;  %4650 = vmatpush.bf16.msra.mxu1 %v5020_v17  ;;  %v5011_v5 = vld [vmem:[#allocation8] sm:$0xff]  ;;  %v5068_v17 = vld [vmem:[#allocation8 + $0x1c8] sm:$0xff] }
 0x368   :  { %v4014_v8 = vsel %vm4013_vm2, %v5822_v20, %v4012_v0 }
 0x369   :  { %v5906_v18 = vmul.f32 %v4014_v8, %v3744_v56  ;;  %v5035_v8 = vld [vmem:[#allocation8 + $0xc0] sm:$0xff] }
 0x36a   :  { %4677 = vmatpush.bf16.msra.mxu3 %v5035_v8 }
 0x36b   :  { %v4018_v35 = vperm.slane %v5906_v18, 0  ;;  %v4019_v46 = vperm.slane %v5906_v18, 1  ;;  %v4020_v55 = vperm.slane %v5906_v18, 2  ;;  %v4021_v4 = vperm.slane %v5906_v18, 3 }
 0x36c   :  { %v4022_v20 = vperm.slane %v5906_v18, 4  ;;  %v4023_v33 = vperm.slane %v5906_v18, 5  ;;  %v4024_v14 = vperm.slane %v5906_v18, 6  ;;  %v4025_v28 = vperm.slane %v5906_v18, 7  ;;  %v5071_v18 = vld [vmem:[#allocation8 + $0x1e0] sm:$0xff] }
 0x36d   :  { %v4034_v36 = vmul.f32 %v4018_v35, %v5608_v51  ;;  %v4035_v43 = vmul.f32 %v4019_v46, %v5622_v42  ;;  %v4036_v50 = vmul.f32 %v4020_v55, %v5809_v47  ;;  %v4037_v34 = vmul.f32 %v4021_v4, %v5806_v21  ;;  %v5013_v21 = vld [vmem:[#allocation8 + $0x10] sm:$0xff] }
 0x36e   :  { %v4038_v29 = vmul.f32 %v4022_v20, %v5840_v24  ;;  %v4039_v37 = vmul.f32 %v4023_v33, %v5837_v6  ;;  %v4040_v3 = vmul.f32 %v4024_v14, %v5843_v27  ;;  %v4041_v51 = vmul.f32 %v4025_v28, %v5861_v13  ;;  %v5029_v6 = vld [vmem:[#allocation8 + $0x90] sm:$0xff]  ;;  %4636 = vmatpush.bf16.msra.mxu0 %v5013_v21 }
 0x36f   :  { %v4050_v31 = vrot.slane %v4035_v43, 7  ;;  %v4051_v42 = vrot.slane %v4036_v50, 6  ;;  %v4052_v10 = vrot.slane %v4037_v34, 5  ;;  %v4073_v47 = vmul.f32 %v4025_v28, %v5854_v52  ;;  %4662 = vmatpush.bf16.msra.mxu2 %v5029_v6  ;;  %4722 = vmatpush.bf16.msrb.mxu3 %v5074_v60  ;;  %v5072_v6 = vld [vmem:[#allocation8 + $0x1e8] sm:$0xff] }
 0x370   :  { %v4053_v24 = vrot.slane %v4038_v29, 4  ;;  %v4054_v32 = vrot.slane %v4039_v37, 3  ;;  %v4055_v22 = vrot.slane %v4040_v3, 2  ;;  %v4056_v19 = vrot.slane %v4041_v51, 1  ;;  %v5049_v51 = vld [vmem:[#allocation8 + $0x130] sm:$0xff] }
 0x371   :  { %v4057_v27 = vsel %vm4001_vm7, %v4034_v36, %v4050_v31  ;;  %v4058_v13 = vsel %vm4003_vm14, %v4051_v42, %v4052_v10  ;;  %v4066_v7 = vmul.f32 %v4018_v35, %v5385_v58  ;;  %v4067_v52 = vmul.f32 %v4019_v46, %v5440_v63  ;;  %v5028_v63 = vld [vmem:[#allocation8 + $0x88] sm:$0xff]  ;;  %v5058_v35 = vld [vmem:[#allocation8 + $0x178] sm:$0xff]  ;;  %v5065_v10 = vld [vmem:[#allocation8 + $0x1b0] sm:$0xff] }
 0x372   :  { %v4059_v16 = vsel %vm4005_vm15, %v4057_v27, %v4058_v13  ;;  %v4060_v38 = vsel %vm4007_vm13, %v4053_v24, %v4054_v32  ;;  %v4061_v40 = vsel %vm4009_vm0, %v4055_v22, %v4056_v19  ;;  %v4068_v59 = vmul.f32 %v4020_v55, %v5489_v41  ;;  %4637 = vmatpush.bf16.msra.mxu0 %v5012_v9  ;;  %v5019_v41 = vld [vmem:[#allocation8 + $0x40] sm:$0xff]  ;;  %v5056_v32 = vld [vmem:[#allocation8 + $0x168] sm:$0xff] }
 0x373   :  { %v4062_v1 = vsel %vm4011_vm1, %v4060_v38, %v4061_v40  ;;  %v4069_v48 = vmul.f32 %v4021_v4, %v5588_v61  ;;  %4663 = vmatpush.bf16.msra.mxu2 %v5028_v63  ;;  %v4070_v54 = vmul.f32 %v4022_v20, %v5685_v57  ;;  %4651 = vmatpush.bf16.msra.mxu1 %v5019_v41  ;;  %v5057_v57 = vld [vmem:[#allocation8 + $0x170] sm:$0xff]  ;;  %v5064_v19 = vld [vmem:[#allocation8 + $0x1a8] sm:$0xff]  ;;  %v5055_v27 = vld [vmem:[#allocation8 + $0x160] sm:$0xff] }
 0x374   :  { %v4063_v58 = vsel %vm4013_vm2, %v4059_v16, %v4062_v1  ;;  %v4071_v37 = vmul.f32 %v4023_v33, %v5802_v11  ;;  %v4072_v11 = vmul.f32 %v4024_v14, %v5817_v12  ;;  %v5048_v33 = vld [vmem:[#allocation8 + $0x128] sm:$0xff]  ;;  %v5063_v13 = vld [vmem:[#allocation8 + $0x1a0] sm:$0xff]  ;;  %v5046_v12 = vld [vmem:[#allocation8 + $0x118] sm:$0xff] }
 0x375   :  { %v4065_v30 = vsub.f32 %v3746_v2, %v4063_v58  ;;  %v5054_v14 = vld [vmem:[#allocation8 + $0x158] sm:$0xff]  ;;  %v5045_v2 = vld [vmem:[#allocation8 + $0x110] sm:$0xff]  ;;  %v5052_v1 = vld [vmem:[#allocation8 + $0x148] sm:$0xff] }
 0x376   :  { %4638 = vmatpush.bf16.msra.mxu0 %v5011_v5  ;;  %v5053_v16 = vld [vmem:[#allocation8 + $0x150] sm:$0xff]  ;;  %v5060_v9 = vld [vmem:[#allocation8 + $0x188] sm:$0xff]  ;;  %v5051_v58 = vld [vmem:[#allocation8 + $0x140] sm:$0xff] }
 0x377   :  { %v4082_v56 = vperm.slane %v4065_v30, 7  ;;  %v4075_v53 = vperm.slane %v4065_v30, 0  ;;  %v4076_v0 = vperm.slane %v4065_v30, 1  ;;  %v4077_v15 = vperm.slane %v4065_v30, 2  ;;  %4664 = vmatpush.bf16.msra.mxu2 %v5027_v49  ;;  %4696 = vmatpush.bf16.msrb.mxu1 %v5058_v35  ;;  %v5061_v38 = vld [vmem:[#allocation8 + $0x190] sm:$0xff]  ;;  %v5059_v63 = vld [vmem:[#allocation8 + $0x180] sm:$0xff] }
 0x378   :  { %v4078_v61 = vperm.slane %v4065_v30, 3  ;;  %v4079_v45 = vperm.slane %v4065_v30, 4  ;;  %v4080_v3 = vperm.slane %v4065_v30, 5  ;;  %v4081_v42 = vperm.slane %v4065_v30, 6  ;;  %v5069_v40 = vld [vmem:[#allocation8 + $0x1d0] sm:$0xff] }
 0x379   :  { %v5942_v25 = vadd.f32 %v4082_v56, %v4073_v47  ;;  %v4091_v46 = vadd.f32 %v4075_v53, %v4066_v7  ;;  %v4092_v55 = vadd.f32 %v4076_v0, %v4067_v52  ;;  %v4093_v4 = vadd.f32 %v4077_v15, %v4068_v59  ;;  %v5073_v47 = vld [vmem:[#allocation8 + $0x1f0] sm:$0xff]  ;;  %v5062_v7 = vld [vmem:[#allocation8 + $0x198] sm:$0xff]  ;;  %v5044_v59 = vld [vmem:[#allocation8 + $0x108] sm:$0xff] }
 0x37a   :  { %v4094_v28 = vadd.f32 %v4078_v61, %v4069_v48  ;;  %v5947_v29 = vadd.f32 %v4079_v45, %v4070_v54  ;;  %4683 = vmatpush.bf16.msrb.mxu0 %v5050_v44  ;;  %v5952_v24 = vadd.f32 %v4080_v3, %v4071_v37  ;;  %v4097_v22 = vadd.f32 %v4081_v42, %v4072_v11  ;;  %v5070_v52 = vld [vmem:[#allocation8 + $0x1d8] sm:$0xff]  ;;  %v5043_v48 = vld [vmem:[#allocation8 + $0x100] sm:$0xff] }
 0x37b   :  { %v4099_v36 = vmax.f32 %v4091_v46, 0.0  ;;  %v4100_v43 = vmax.f32 %v4092_v55, 0.0  ;;  %v4101_v50 = vmax.f32 %v4093_v4, 0.0  ;;  %4709 = vmatpush.bf16.msrb.mxu2 %v5066_v23  ;;  %4697 = vmatpush.bf16.msrb.mxu1 %v5057_v57  ;;  %v4106_v5 = vmax.f32 %v5942_v25, 0.0  ;;  %v5084_v25 = vld [vmem:[%s5970_s4] ss:$0 sm:$0xff] }
 0x37c   :  { %v4102_v34 = vmax.f32 %v4094_v28, 0.0  ;;  %4723 = vmatpush.bf16.msrb.mxu3 %v5073_v47  ;;  %v4103_v30 = vmax.f32 %v5947_v29, 0.0  ;;  %v4104_v56 = vmax.f32 %v5952_v24, 0.0  ;;  %v4105_v41 = vmax.f32 %v4097_v22, 0.0 }
 0x37d   :  { %v4107_v20 = vpack.c.bf16 %v4099_v36, %v4099_v36  ;;  %v4108_v31 = vpack.c.bf16 %v4100_v43, %v4100_v43  ;;  %v4109_v21 = vpack.c.bf16 %v4101_v50, %v4101_v50  ;;  %v4114_v15 = vpack.c.bf16 %v4106_v5, %v4106_v5 }
 0x37e   :  { %v4110_v39 = vpack.c.bf16 %v4102_v34, %v4102_v34  ;;  %4684 = vmatpush.bf16.msrb.mxu0 %v5049_v51  ;;  %v4111_v53 = vpack.c.bf16 %v4103_v30, %v4103_v30  ;;  %v4112_v0 = vpack.c.bf16 %v4104_v56, %v4104_v56  ;;  %v4113_v49 = vpack.c.bf16 %v4105_v41, %v4105_v41 }
 0x37f   :  { %4639 = vmatmul.bf16.vlgmr.msra.gmra.mxu0 %v4107_v20  ;;  %4652 = vmatmul.bf16.vlgmr.msra.gmra.mxu1 %v4108_v31 }
 0x380   :  { %4665 = vmatmul.bf16.vlgmr.msra.gmra.mxu2 %v4109_v21  ;;  %4678 = vmatmul.bf16.vlgmr.msra.gmra.mxu3 %v4110_v39 }
 0x381   :  { %4710 = vmatpush.bf16.msrb.mxu2 %v5065_v10  ;;  %4698 = vmatpush.bf16.msrb.mxu1 %v5056_v32 }
 0x382   :  { %4685 = vmatpush.bf16.msrb.mxu0 %v5048_v33  ;;  %4724 = vmatpush.bf16.msrb.mxu3 %v5072_v6 }
 0x385   :  { %4711 = vmatpush.bf16.msrb.mxu2 %v5064_v19  ;;  %4699 = vmatpush.bf16.msrb.mxu1 %v5055_v27 }
 0x386   :  { %4686 = vmatpush.bf16.msrb.mxu0 %v5047_v62  ;;  %4725 = vmatpush.bf16.msrb.mxu3 %v5071_v18 }
 0x389   :  { %4712 = vmatpush.bf16.msrb.mxu2 %v5063_v13  ;;  %4700 = vmatpush.bf16.msrb.mxu1 %v5054_v14 }
 0x38a   :  { %4687 = vmatpush.bf16.msrb.mxu0 %v5046_v12  ;;  %4726 = vmatpush.bf16.msrb.mxu3 %v5070_v52 }
 0x38d   :  { %4713 = vmatpush.bf16.msrb.mxu2 %v5062_v7  ;;  %4701 = vmatpush.bf16.msrb.mxu1 %v5053_v16 }
 0x38e   :  { %4688 = vmatpush.bf16.msrb.mxu0 %v5045_v2  ;;  %4727 = vmatpush.bf16.msrb.mxu3 %v5069_v40 }
 0x391   :  { %4714 = vmatpush.bf16.msrb.mxu2 %v5061_v38  ;;  %4702 = vmatpush.bf16.msrb.mxu1 %v5052_v1 }
 0x392   :  { %4689 = vmatpush.bf16.msrb.mxu0 %v5044_v59  ;;  %4728 = vmatpush.bf16.msrb.mxu3 %v5068_v17 }
 0x395   :  { %4715 = vmatpush.bf16.msrb.mxu2 %v5060_v9  ;;  %4703 = vmatpush.bf16.msrb.mxu1 %v5051_v58 }
 0x396   :  { %4690 = vmatpush.bf16.msrb.mxu0 %v5043_v48  ;;  %4729 = vmatpush.bf16.msrb.mxu3 %v5067_v26 }
 0x398   :  { %4704 = vmatmul.bf16.vlgmr.msrb.gmra.mxu1 %v4112_v0 }
 0x399   :  { %4716 = vmatpush.bf16.msrb.mxu2 %v5059_v63  ;;  %4691 = vmatmul.bf16.vlgmr.msrb.gmra.mxu0 %v4111_v53 }
 0x39a   :  { %4730 = vmatmul.bf16.vlgmr.msrb.gmra.mxu3 %v4114_v15 }
 0x39c   :  { %4717 = vmatmul.bf16.vlgmr.msrb.gmra.mxu2 %v4113_v49 }
 0x3fc   :  { %v4640_v8 = vpop.f32.mrf.mxu0  ;;  %v4653_v61 = vpop.f32.mrf.mxu1 }
 0x3fd   :  { %v4641_v60 = vadd.f32 %v5084_v25, %v4640_v8 }
 0x3ff   :  { %v4654_v28 = vadd.f32 %v4653_v61, %v4641_v60 }
 0x403   :  { %v4666_v44 = vpop.f32.mrf.mxu2  ;;  %v4679_v35 = vpop.f32.mrf.mxu3 }
 0x404   :  { %v4642_v46 = vpop.f32.mrf.mxu0  ;;  %v4655_v55 = vpop.f32.mrf.mxu1  ;;  %v4667_v54 = vadd.f32 %v4666_v44, %v4654_v28 }
 0x406   :  { %v4680_v45 = vadd.f32 %v4679_v35, %v4667_v54 }
 0x40b   :  { %v4668_v4 = vpop.f32.mrf.mxu2  ;;  %v4681_v23 = vpop.f32.mrf.mxu3 }
 0x415   :  { %v4705_v43 = vpop.f32.mrf.mxu1 }
 0x416   :  { %v4692_v36 = vpop.f32.mrf.mxu0 }
 0x417   :  { %v4693_v50 = vadd.f32 %v4692_v36, %v4680_v45 }
 0x419   :  { %v4706_v34 = vadd.f32 %v4705_v43, %v4693_v50 }
 0x41d   :  { %v4731_v37 = vpop.f32.mrf.mxu3  ;;  %v4707_v57 = vpop.f32.mrf.mxu1 }
 0x41e   :  { %v4694_v51 = vpop.f32.mrf.mxu0 }
 0x41f   :  { %v4718_v29 = vpop.f32.mrf.mxu2 }
 0x420   :  { %v4719_v3 = vadd.f32 %v4718_v29, %v4706_v34 }
 0x422   :  { %v4732_v20 = vadd.f32 %v4731_v37, %v4719_v3 }
 0x424   :  { %4735 = vst [vmem:[#allocation10] sm:$0xff] %v4732_v20 }
 0x425   :  { %4746 = dma.vmem_to_hbm [thread:$0]  %s4742_s15, 128, %s4744_s18, [#allocation4]   ;;  %v4733_v42 = vpop.f32.mrf.mxu3 }
 0x427   :  { %v4720_v31 = vpop.f32.mrf.mxu2 }
 0x428   :  { %5229 = dma.done.wait [#allocation4], 128  }
 0x429   :  { %5230 = vsyncadd [#allocation4], 4294967168 }
 0x42a   :  { %4751 = vsyncpa [#allocation3], 1 }
 0x42b   :  { %4752 = vsyncpa [#allocation6], 1 }
 0x42c   :  { %4753 = vsyncpa [#allocation9], 1 }
 0x42d   :  { %4754 = vsyncpa [#allocation4], 1 }

</bundles_post_ra>
